<compile_context>
chip_gen: v5e
topology: v5e:2x2
jax: 0.10.0
libtpu: 0.0.40
codegen_flags: <defaults>
</compile_context>

<pallas_src>
import jax
import jax.numpy as jnp
from jax.experimental import pallas as pl
from jax.experimental.pallas import tpu as pltpu

EPS = 1e-5


def _basic_block_kernel(xt_ref, w1_ref, b1_ref, w2_ref, b2_ref, out_ref):
    # xt_ref : (1, TH+4, W+4, Cin)  f32   input row-tile, spatially padded by 2
    # w1_ref : (9*Cin,  Cout)       bf16  conv1 weights, BN1 scale folded in
    # b1_ref : (1, Cout)            f32   BN1 shift
    # w2_ref : (9*Cout, Cout)       bf16  conv2 weights, BN2 scale folded in
    # b2_ref : (1, Cout)            f32   BN2 shift
    # out_ref: (1, TH, W, Cout)     f32
    TH = out_ref.shape[1]
    W = out_ref.shape[2]
    Cout = out_ref.shape[3]
    Cin = xt_ref.shape[3]
    OH, OW = TH + 2, W + 2          # conv1 computed on a 1-ring-extended grid

    xt = xt_ref[0]                  # (TH+4, W+4, Cin), f32

    # ---- conv1 (+ folded BN1 scale) as a single im2col matmul, then shift+relu
    taps1 = [xt[kh:kh + OH, kw:kw + OW, :]
             for kh in range(3) for kw in range(3)]
    p1 = jnp.concatenate(taps1, axis=-1)                      # (OH, OW, 9*Cin)
    p1 = p1.reshape(OH * OW, 9 * Cin).astype(jnp.bfloat16)
    acc1 = jnp.dot(p1, w1_ref[...], preferred_element_type=jnp.float32)
    mid = jnp.maximum(acc1 + b1_ref[...], 0.0).reshape(OH, OW, Cout)

    # ---- conv2's zero padding: zero positions that fall outside the image ---
    t = pl.program_id(1)
    n_t = pl.num_programs(1)
    rows = jax.lax.broadcasted_iota(jnp.int32, (OH, OW, 1), 0)
    cols = jax.lax.broadcasted_iota(jnp.int32, (OH, OW, 1), 1)
    inside = (cols >= 1) & (cols <= W)
    inside &= (rows >= 1) | (t > 0)
    inside &= (rows <= TH) | (t < n_t - 1)
    mid = jnp.where(inside, mid, 0.0)

    # ---- conv2 (+ folded BN2 scale) as a single im2col matmul ---------------
    taps2 = [mid[kh:kh + TH, kw:kw + W, :]
             for kh in range(3) for kw in range(3)]
    p2 = jnp.concatenate(taps2, axis=-1)                      # (TH, W, 9*Cout)
    p2 = p2.reshape(TH * W, 9 * Cout).astype(jnp.bfloat16)
    acc2 = jnp.dot(p2, w2_ref[...], preferred_element_type=jnp.float32)

    # ---- BN2 shift + residual (f32, from the input tile interior) + relu ----
    identity = xt[2:TH + 2, 2:W + 2, :].reshape(TH * W, Cout)
    out = jnp.maximum(acc2 + b2_ref[...] + identity, 0.0)
    out_ref[0] = out.reshape(TH, W, Cout)


def basic_block_forward(x_nhwc, params, tile_h=8):
    B, H, W, Cin = x_nhwc.shape
    Cout = params["w1"].shape[-1]
    assert Cin == Cout, "stride=1 / downsample=None path requires Cin == Cout"
    if H % tile_h != 0:
        tile_h = H
    n_t = H // tile_h

    # Fold eval-mode BN: scale folded into the conv weights, shift kept apart.
    def fold(w, gamma, beta, mean, var):
        scale = gamma / jnp.sqrt(var + EPS)                    # (Cout,)
        w_folded = (w * scale).reshape(-1, w.shape[-1])        # (9*Cin, Cout)
        shift = (beta - mean * scale).reshape(1, -1)           # (1, Cout)
        return w_folded.astype(jnp.bfloat16), shift.astype(jnp.float32)

    w1, b1 = fold(params["w1"], params["gamma1"], params["beta1"],
                  params["mean1"], params["var1"])
    w2, b2 = fold(params["w2"], params["gamma2"], params["beta2"],
                  params["mean2"], params["var2"])

    # Row tiles with a 2-row / 2-col halo (conv1 needs +1, conv2 +1 more).
    xp = jnp.pad(x_nhwc, ((0, 0), (2, 2), (2, 2), (0, 0)))
    tiles = jnp.stack(
        [xp[:, t * tile_h: t * tile_h + tile_h + 4] for t in range(n_t)],
        axis=1).reshape(B * n_t, tile_h + 4, W + 4, Cin)

    out = pl.pallas_call(
        _basic_block_kernel,
        out_shape=jax.ShapeDtypeStruct((B, H, W, Cout), jnp.float32),
        grid_spec=pltpu.PrefetchScalarGridSpec(
            num_scalar_prefetch=0,
            grid=(B, n_t),
            in_specs=[
                pl.BlockSpec((1, tile_h + 4, W + 4, Cin),
                             lambda b, t: (b * n_t + t, 0, 0, 0)),
                pl.BlockSpec((9 * Cin, Cout), lambda b, t: (0, 0)),
                pl.BlockSpec((1, Cout), lambda b, t: (0, 0)),
                pl.BlockSpec((9 * Cout, Cout), lambda b, t: (0, 0)),
                pl.BlockSpec((1, Cout), lambda b, t: (0, 0)),
            ],
            out_specs=pl.BlockSpec((1, tile_h, W, Cout),
                                   lambda b, t: (b, t, 0, 0)),
        ),
        compiler_params=pltpu.CompilerParams(
            dimension_semantics=("parallel", "parallel"),
            vmem_limit_bytes=48 * 1024 * 1024),
    )(tiles, w1, b1, w2, b2)
    return out


def _reference(x_nhwc, params):
    """Pure-JAX f32 reference matching the PyTorch BasicBlock (eval-mode BN)."""
    def conv(x, w):
        return jax.lax.conv_general_dilated(
            x, w, window_strides=(1, 1), padding=((1, 1), (1, 1)),
            dimension_numbers=("NHWC", "HWIO", "NHWC"))

    def bn(x, g, b, m, v):
        return (x - m) / jnp.sqrt(v + EPS) * g + b

    out = conv(x_nhwc, params["w1"])
    out = jnp.maximum(bn(out, params["gamma1"], params["beta1"],
                         params["mean1"], params["var1"]), 0.0)
    out = conv(out, params["w2"])
    out = bn(out, params["gamma2"], params["beta2"],
             params["mean2"], params["var2"])
    out = out + x_nhwc
    return jnp.maximum(out, 0.0)


if __name__ == "__main__":
    key = jax.random.PRNGKey(0)
    B, H, W, C = 2, 16, 16, 4          # NHWC; equals NCHW (2, 4, 16, 16)
    ks = jax.random.split(key, 11)
    params = {
        "w1": 0.1 * jax.random.normal(ks[0], (3, 3, C, C), jnp.float32),
        "gamma1": 1.0 + 0.1 * jax.random.normal(ks[1], (C,), jnp.float32),
        "beta1": 0.1 * jax.random.normal(ks[2], (C,), jnp.float32),
        "mean1": 0.1 * jax.random.normal(ks[3], (C,), jnp.float32),
        "var1": 1.0 + 0.1 * jax.random.uniform(ks[4], (C,), jnp.float32),
        "w2": 0.1 * jax.random.normal(ks[5], (3, 3, C, C), jnp.float32),
        "gamma2": 1.0 + 0.1 * jax.random.normal(ks[6], (C,), jnp.float32),
        "beta2": 0.1 * jax.random.normal(ks[7], (C,), jnp.float32),
        "mean2": 0.1 * jax.random.normal(ks[8], (C,), jnp.float32),
        "var2": 1.0 + 0.1 * jax.random.uniform(ks[9], (C,), jnp.float32),
    }
    x = jax.random.normal(ks[10], (B, H, W, C), jnp.float32)

    out = jax.block_until_ready(basic_block_forward(x, params))
    ref = _reference(x, params)
    assert out.shape == (B, H, W, C)
    # Tolerance accounts for bf16 MXU inputs (f32 accumulation/residual).
    assert bool(jnp.allclose(out, ref, atol=3e-2, rtol=3e-2)), "mismatch vs reference"
    print("KERNEL_OK")
</pallas_src>

<mosaic_0001>
module attributes {stable_mosaic.version = 11 : i64} {
  func.func @_basic_block_kernel(%arg0: i32, %arg1: i32, %arg2: memref<1x12x20x4xf32, #tpu.memory_space<vmem>>, %arg3: memref<36x4xbf16, #tpu.memory_space<vmem>>, %arg4: memref<1x4xf32, #tpu.memory_space<vmem>>, %arg5: memref<36x4xbf16, #tpu.memory_space<vmem>>, %arg6: memref<1x4xf32, #tpu.memory_space<vmem>>, %arg7: memref<1x8x16x4xf32, #tpu.memory_space<vmem>>) attributes {dimension_semantics = [#tpu.dimension_semantics<parallel>, #tpu.dimension_semantics<parallel>], iteration_bounds = array<i64: 2, 2>, scalar_prefetch = 0 : i64, scratch_operands = 0 : i64, tpu.core_type = #tpu.core_type<tc>, window_params = [{transform_indices = @transform_0, window_bounds = array<i64: 1, 12, 20, 4>}, {pipeline_mode = #tpu.pipeline_mode<synchronous>, transform_indices = @transform_1, window_bounds = array<i64: 36, 4>}, {pipeline_mode = #tpu.pipeline_mode<synchronous>, transform_indices = @transform_2, window_bounds = array<i64: 1, 4>}, {pipeline_mode = #tpu.pipeline_mode<synchronous>, transform_indices = @transform_3, window_bounds = array<i64: 36, 4>}, {pipeline_mode = #tpu.pipeline_mode<synchronous>, transform_indices = @transform_4, window_bounds = array<i64: 1, 4>}, {transform_indices = @transform_5, window_bounds = array<i64: 1, 8, 16, 4>}]} {
    %c0 = arith.constant 0 : index
    %c0_0 = arith.constant 0 : index
    %c0_1 = arith.constant 0 : index
    %c0_2 = arith.constant 0 : index
    %0 = vector.load %arg2[%c0, %c0_0, %c0_1, %c0_2] : memref<1x12x20x4xf32, #tpu.memory_space<vmem>>, vector<1x12x20x4xf32>
    %1 = vector.shape_cast %0 : vector<1x12x20x4xf32> to vector<12x20x4xf32>
    %2 = vector.extract_strided_slice %1 {offsets = [0, 0, 0], sizes = [10, 18, 4], strides = [1, 1, 1]} : vector<12x20x4xf32> to vector<10x18x4xf32>
    %3 = vector.extract_strided_slice %1 {offsets = [0, 1, 0], sizes = [10, 18, 4], strides = [1, 1, 1]} : vector<12x20x4xf32> to vector<10x18x4xf32>
    %4 = vector.extract_strided_slice %1 {offsets = [0, 2, 0], sizes = [10, 18, 4], strides = [1, 1, 1]} : vector<12x20x4xf32> to vector<10x18x4xf32>
    %5 = vector.extract_strided_slice %1 {offsets = [1, 0, 0], sizes = [10, 18, 4], strides = [1, 1, 1]} : vector<12x20x4xf32> to vector<10x18x4xf32>
    %6 = vector.extract_strided_slice %1 {offsets = [1, 1, 0], sizes = [10, 18, 4], strides = [1, 1, 1]} : vector<12x20x4xf32> to vector<10x18x4xf32>
    %7 = vector.extract_strided_slice %1 {offsets = [1, 2, 0], sizes = [10, 18, 4], strides = [1, 1, 1]} : vector<12x20x4xf32> to vector<10x18x4xf32>
    %8 = vector.extract_strided_slice %1 {offsets = [2, 0, 0], sizes = [10, 18, 4], strides = [1, 1, 1]} : vector<12x20x4xf32> to vector<10x18x4xf32>
    %9 = vector.extract_strided_slice %1 {offsets = [2, 1, 0], sizes = [10, 18, 4], strides = [1, 1, 1]} : vector<12x20x4xf32> to vector<10x18x4xf32>
    %10 = vector.extract_strided_slice %1 {offsets = [2, 2, 0], sizes = [10, 18, 4], strides = [1, 1, 1]} : vector<12x20x4xf32> to vector<10x18x4xf32>
    %11 = tpu.concatenate %2, %3, %4, %5, %6, %7, %8, %9, %10 in 2 : vector<10x18x4xf32>, vector<10x18x4xf32>, vector<10x18x4xf32>, vector<10x18x4xf32>, vector<10x18x4xf32>, vector<10x18x4xf32>, vector<10x18x4xf32>, vector<10x18x4xf32>, vector<10x18x4xf32> -> vector<10x18x36xf32>
    %12 = vector.shape_cast %11 : vector<10x18x36xf32> to vector<180x36xf32>
    %13 = arith.truncf %12 : vector<180x36xf32> to vector<180x36xbf16>
    %c0_3 = arith.constant 0 : index
    %c0_4 = arith.constant 0 : index
    %14 = vector.load %arg3[%c0_3, %c0_4] : memref<36x4xbf16, #tpu.memory_space<vmem>>, vector<36x4xbf16>
    %cst = arith.constant dense<0.000000e+00> : vector<180x4xf32>
    %15 = tpu.matmul %13, %14, %cst {dimension_numbers = #tpu.dot_dimension_numbers<[1], [0], [0], [1], [0, 0, 1, 1], [], []>} : vector<180x36xbf16>, vector<36x4xbf16>, vector<180x4xf32> -> vector<180x4xf32>
    %c0_5 = arith.constant 0 : index
    %c0_6 = arith.constant 0 : index
    %16 = vector.load %arg4[%c0_5, %c0_6] : memref<1x4xf32, #tpu.memory_space<vmem>>, vector<1x4xf32>
    %17 = vector.broadcast %16 : vector<1x4xf32> to vector<180x4xf32>
    %18 = arith.addf %15, %17 : vector<180x4xf32>
    %cst_7 = arith.constant 0.000000e+00 : f32
    %19 = vector.broadcast %cst_7 : f32 to vector<180x4xf32>
    %20 = arith.maximumf %18, %19 : vector<180x4xf32>
    %21 = vector.shape_cast %20 : vector<180x4xf32> to vector<10x18x4xf32>
    %22 = tpu.iota {dimensions = array<i32: 0>} : vector<10x18x1xi32>
    %23 = tpu.iota {dimensions = array<i32: 1>} : vector<10x18x1xi32>
    %c1_i32 = arith.constant 1 : i32
    %24 = vector.broadcast %c1_i32 : i32 to vector<10x18x1xi32>
    %25 = arith.cmpi sge, %23, %24 : vector<10x18x1xi32>
    %c16_i32 = arith.constant 16 : i32
    %26 = vector.broadcast %c16_i32 : i32 to vector<10x18x1xi32>
    %27 = arith.cmpi sle, %23, %26 : vector<10x18x1xi32>
    %28 = arith.andi %25, %27 : vector<10x18x1xi1>
    %c1_i32_8 = arith.constant 1 : i32
    %29 = vector.broadcast %c1_i32_8 : i32 to vector<10x18x1xi32>
    %30 = arith.cmpi sge, %22, %29 : vector<10x18x1xi32>
    %c0_i32 = arith.constant 0 : i32
    %31 = arith.cmpi sgt, %arg1, %c0_i32 : i32
    %32 = vector.broadcast %31 : i1 to vector<10x18x1xi1>
    %33 = arith.ori %30, %32 : vector<10x18x1xi1>
    %34 = arith.andi %28, %33 : vector<10x18x1xi1>
    %c8_i32 = arith.constant 8 : i32
    %35 = vector.broadcast %c8_i32 : i32 to vector<10x18x1xi32>
    %36 = arith.cmpi sle, %22, %35 : vector<10x18x1xi32>
    %c1_i32_9 = arith.constant 1 : i32
    %37 = arith.cmpi slt, %arg1, %c1_i32_9 : i32
    %38 = vector.broadcast %37 : i1 to vector<10x18x1xi1>
    %39 = arith.ori %36, %38 : vector<10x18x1xi1>
    %40 = arith.andi %34, %39 : vector<10x18x1xi1>
    %cst_10 = arith.constant 0.000000e+00 : f32
    %41 = vector.shape_cast %40 : vector<10x18x1xi1> to vector<10x18x1xi1>
    %42 = vector.broadcast %41 : vector<10x18x1xi1> to vector<10x18x4xi1>
    %43 = vector.broadcast %cst_10 : f32 to vector<10x18x4xf32>
    %44 = arith.select %42, %21, %43 : vector<10x18x4xi1>, vector<10x18x4xf32>
    %45 = vector.extract_strided_slice %44 {offsets = [0, 0, 0], sizes = [8, 16, 4], strides = [1, 1, 1]} : vector<10x18x4xf32> to vector<8x16x4xf32>
    %46 = vector.extract_strided_slice %44 {offsets = [0, 1, 0], sizes = [8, 16, 4], strides = [1, 1, 1]} : vector<10x18x4xf32> to vector<8x16x4xf32>
    %47 = vector.extract_strided_slice %44 {offsets = [0, 2, 0], sizes = [8, 16, 4], strides = [1, 1, 1]} : vector<10x18x4xf32> to vector<8x16x4xf32>
    %48 = vector.extract_strided_slice %44 {offsets = [1, 0, 0], sizes = [8, 16, 4], strides = [1, 1, 1]} : vector<10x18x4xf32> to vector<8x16x4xf32>
    %49 = vector.extract_strided_slice %44 {offsets = [1, 1, 0], sizes = [8, 16, 4], strides = [1, 1, 1]} : vector<10x18x4xf32> to vector<8x16x4xf32>
    %50 = vector.extract_strided_slice %44 {offsets = [1, 2, 0], sizes = [8, 16, 4], strides = [1, 1, 1]} : vector<10x18x4xf32> to vector<8x16x4xf32>
    %51 = vector.extract_strided_slice %44 {offsets = [2, 0, 0], sizes = [8, 16, 4], strides = [1, 1, 1]} : vector<10x18x4xf32> to vector<8x16x4xf32>
    %52 = vector.extract_strided_slice %44 {offsets = [2, 1, 0], sizes = [8, 16, 4], strides = [1, 1, 1]} : vector<10x18x4xf32> to vector<8x16x4xf32>
    %53 = vector.extract_strided_slice %44 {offsets = [2, 2, 0], sizes = [8, 16, 4], strides = [1, 1, 1]} : vector<10x18x4xf32> to vector<8x16x4xf32>
    %54 = tpu.concatenate %45, %46, %47, %48, %49, %50, %51, %52, %53 in 2 : vector<8x16x4xf32>, vector<8x16x4xf32>, vector<8x16x4xf32>, vector<8x16x4xf32>, vector<8x16x4xf32>, vector<8x16x4xf32>, vector<8x16x4xf32>, vector<8x16x4xf32>, vector<8x16x4xf32> -> vector<8x16x36xf32>
    %55 = vector.shape_cast %54 : vector<8x16x36xf32> to vector<128x36xf32>
    %56 = arith.truncf %55 : vector<128x36xf32> to vector<128x36xbf16>
    %c0_11 = arith.constant 0 : index
    %c0_12 = arith.constant 0 : index
    %57 = vector.load %arg5[%c0_11, %c0_12] : memref<36x4xbf16, #tpu.memory_space<vmem>>, vector<36x4xbf16>
    %cst_13 = arith.constant dense<0.000000e+00> : vector<128x4xf32>
    %58 = tpu.matmul %56, %57, %cst_13 {dimension_numbers = #tpu.dot_dimension_numbers<[1], [0], [0], [1], [0, 0, 1, 1], [], []>} : vector<128x36xbf16>, vector<36x4xbf16>, vector<128x4xf32> -> vector<128x4xf32>
    %59 = vector.extract_strided_slice %1 {offsets = [2, 2, 0], sizes = [8, 16, 4], strides = [1, 1, 1]} : vector<12x20x4xf32> to vector<8x16x4xf32>
    %60 = vector.shape_cast %59 : vector<8x16x4xf32> to vector<128x4xf32>
    %c0_14 = arith.constant 0 : index
    %c0_15 = arith.constant 0 : index
    %61 = vector.load %arg6[%c0_14, %c0_15] : memref<1x4xf32, #tpu.memory_space<vmem>>, vector<1x4xf32>
    %62 = vector.broadcast %61 : vector<1x4xf32> to vector<128x4xf32>
    %63 = arith.addf %58, %62 : vector<128x4xf32>
    %64 = arith.addf %63, %60 : vector<128x4xf32>
    %cst_16 = arith.constant 0.000000e+00 : f32
    %65 = vector.broadcast %cst_16 : f32 to vector<128x4xf32>
    %66 = arith.maximumf %64, %65 : vector<128x4xf32>
    %67 = vector.shape_cast %66 : vector<128x4xf32> to vector<8x16x4xf32>
    %c0_17 = arith.constant 0 : index
    %c0_18 = arith.constant 0 : index
    %c0_19 = arith.constant 0 : index
    %c0_20 = arith.constant 0 : index
    %68 = vector.load %arg7[%c0_17, %c0_18, %c0_19, %c0_20] : memref<1x8x16x4xf32, #tpu.memory_space<vmem>>, vector<1x8x16x4xf32>
    %69 = vector.shape_cast %68 : vector<1x8x16x4xf32> to vector<8x16x4xf32>
    %70 = vector.shape_cast %67 : vector<8x16x4xf32> to vector<1x8x16x4xf32>
    tpu.vector_store %arg7[%c0_17, %c0_18, %c0_19, %c0_20], %70 {strides = array<i32>} : memref<1x8x16x4xf32, #tpu.memory_space<vmem>>, vector<1x8x16x4xf32>,
    return
  }
  func.func @transform_0(%arg0: i32, %arg1: i32) -> (i32, i32, i32, i32) {
    %c2_i32 = arith.constant 2 : i32
    %0 = arith.muli %arg0, %c2_i32 : i32
    %1 = arith.addi %0, %arg1 : i32
    %c0_i32 = arith.constant 0 : i32
    %c0_i32_0 = arith.constant 0 : i32
    %c0_i32_1 = arith.constant 0 : i32
    %c0_i32_2 = arith.constant 0 : i32
    return %1, %c0_i32, %c0_i32_0, %c0_i32_1 : i32, i32, i32, i32
  }
  func.func @transform_1(%arg0: i32, %arg1: i32) -> (i32, i32) {
    %c0_i32 = arith.constant 0 : i32
    %c0_i32_0 = arith.constant 0 : i32
    %c0_i32_1 = arith.constant 0 : i32
    return %c0_i32, %c0_i32_0 : i32, i32
  }
  func.func @transform_2(%arg0: i32, %arg1: i32) -> (i32, i32) {
    %c0_i32 = arith.constant 0 : i32
    %c0_i32_0 = arith.constant 0 : i32
    %c0_i32_1 = arith.constant 0 : i32
    return %c0_i32, %c0_i32_0 : i32, i32
  }
  func.func @transform_3(%arg0: i32, %arg1: i32) -> (i32, i32) {
    %c0_i32 = arith.constant 0 : i32
    %c0_i32_0 = arith.constant 0 : i32
    %c0_i32_1 = arith.constant 0 : i32
    return %c0_i32, %c0_i32_0 : i32, i32
  }
  func.func @transform_4(%arg0: i32, %arg1: i32) -> (i32, i32) {
    %c0_i32 = arith.constant 0 : i32
    %c0_i32_0 = arith.constant 0 : i32
    %c0_i32_1 = arith.constant 0 : i32
    return %c0_i32, %c0_i32_0 : i32, i32
  }
  func.func @transform_5(%arg0: i32, %arg1: i32) -> (i32, i32, i32, i32) {
    %c0_i32 = arith.constant 0 : i32
    %c0_i32_0 = arith.constant 0 : i32
    %c0_i32_1 = arith.constant 0 : i32
    return %arg0, %arg1, %c0_i32, %c0_i32_0 : i32, i32, i32, i32
  }
}

</mosaic_0001>

<bundles_post_ra>
// kernel: tpu_custom_call.1
= control target key start
LH: loop header
LB: loop body
LE: loop exit
PB: predicated region body
PF: predicated region fallthrough
CT: control target
= control target key end

     0   :  { %s3603_s18 = smov 0   ;;  %s3605_s19 = smov 0   ;;  %s6163_s0 = inlined_call_operand.vmem [shape: f32[4,12,20,4], index: 0, kind: input, shape index: {}]   ;;  %s6164_s1 = inlined_call_operand.vmem [shape: bf16[36,4], index: 1, kind: input, shape index: {}]   ;;  %s6165_s2 = inlined_call_operand.vmem [shape: f32[1,4], index: 2, kind: input, shape index: {}]   ;;  %s6166_s3 = inlined_call_operand.vmem [shape: bf16[36,4], index: 3, kind: input, shape index: {}]   ;;  %s6167_s4 = inlined_call_operand.vmem [shape: f32[1,4], index: 4, kind: input, shape index: {}]   ;;  %s6168_s5 = inlined_call_operand.vmem [shape: f32[2,16,16,4], index: 5, kind: output, shape index: {}]  }
   0x1   :  { %s3607_s20 = smov 0   ;;  %s3609_s21 = smov 0  }
   0x2   :  { %s3611_s22 = smov 0  }
   0x3 LB: > { %s24_s23 = sadd.s32 1, %s3555_s20  ;;  %s27_s24 = sadd.s32 1, %s3559_s21  ;;  %s3563_s22 = sphi %s3611_s22, %s15_s22   ;;  %s3559_s21 = sphi %s3609_s21, %s6649_s21   ;;  %s3555_s20 = sphi %s3607_s20, %s6648_s20   ;;  %s3551_s19 = sphi %s3605_s19, %s6647_s19   ;;  %s3547_s18 = sphi %s3603_s18, %s6646_s18  }
   0x4   : > { %p25_p0 = scmp.ge.s32.totalorder %s24_s23, 2  ;;  %p3066_p1 = scmp.ge.s32.totalorder %s3563_s22, 1 }
   0x5   : > { %p209_p2 = scmp.lt.s32.totalorder %s3563_s22, 5 }
   0x6   : > { %s6651_s23 = smov (%p25_p0, %s24_s23), 0  ;;  %s6653_s24 = smov (!%p25_p0, %s27_s24), %s3559_s21 }
   0x7   : > { %p210_p3 = pnand %p3066_p1, %p209_p2  ;;  %p29_p4 = scmp.ge.s32.totalorder %s6653_s24, 2 }
   0x9   : > { %s6655_s24 = smov (%p29_p4, %s6653_s24), 0  ;;  %213 = sbr.rel (%p210_p3) target bundleno = 1358 (0x54e), region = 40 }
   0xe   : > { %s3067_s25 = sshll.u32 %s3551_s19, 1  ;;  %vm331_vm0 = vcmask 1046528   ;;  %s3565_s6 = smov 4   ;;  %vm472_vm1 = vcmask 1045504   ;;  %vm1733_vm2 = vcmask 1041408   ;;  %vm1179_vm3 = vcmask 31744  }
   0xf   : > { %s245_s26 = sadd.s32 %s3547_s18, %s3067_s25  ;;  %s3566_s7 = smov 8   ;;  %vm1210_vm4 = vcmask 64512   ;;  %vm1241_vm5 = vcmask 97280   ;;  %vm1272_vm6 = vcmask 130048   ;;  %vm1303_vm7 = vcmask 162816  }
  0x10   : > { %p246_p5 = scmp.lt.s32.totalorder %s245_s26, 3  ;;  %s3567_s8 = smov 12   ;;  %vm1334_vm8 = vcmask 195584   ;;  %vm1365_vm9 = vcmask 228352   ;;  %vm1396_vm10 = vcmask 261120   ;;  %vm6241_vm11 = vcmask 293888  }
  0x11   : > { %s3568_s9 = smov 16   ;;  %s3569_s10 = smov 20  }
  0x12   : > { %s6657_s26 = smov (!%p246_p5, %s245_s26), 3  ;;  %s3570_s11 = smov 24  }
  0x13   : > { %s3124_s27 = smul.u32 288, %s6657_s26  ;;  %s3571_s12 = smov 28  }
  0x14   : > { %s3572_s13 = smov 32   ;;  %p1931_p6 = scmp.gt.s32.totalorder %s3547_s18, 0 }
  0x15   : > { %s3642_s30 = scalar_lea.vmem %s6163_s0, %s3124_s27  ;;  %p1941_p7 = scmp.lt.s32.totalorder %s3547_s18, 1 }
  0x16   : > { %v3645_v0 = vld [vmem:[%s3642_s30 + $0x28] sm:$0xf]  ;;  %v3648_v1 = vld [vmem:[%s3642_s30 + $0x10] sm:$0xf]  ;;  %v3651_v2 = vld [vmem:[%s3642_s30] sm:$0xff]  ;;  %p254_p8 = scmp.lt.s32.totalorder %s3551_s19, 1 }
  0x17   : > { %v3654_v3 = vrot.slane %v3645_v0, 1  ;;  %v335_v4 = vrot.slane %v3648_v1, 1  ;;  %v3658_v5 = vld [vmem:[%s3642_s30 + $0x8] sm:$0xff]  ;;  %v332_v6 = vrot.slane %v3651_v2, 1  ;;  %v3662_v7 = vld [vmem:[%s3642_s30 + $0x20] sm:$0xff]  ;;  %v3665_v8 = vld [vmem:[%s3642_s30 + $0x18] sm:$0xff] }
  0x18   : > { %v333_v9 = vrot.slane %v3658_v5, 1  ;;  %v338_v11 = vrot.slane %v3662_v7, 1  ;;  %v337_v12 = vrot.slane %v3665_v8, 1  ;;  %v3683_v15 = vld [vmem:[%s3642_s30 + $0x40] sm:$0xf]  ;;  %v3686_v16 = vld [vmem:[%s3642_s30 + $0x38] sm:$0xff] }
  0x19   : > { %392 = vrot.lane.b32.xlu2 %v3654_v3, %s3565_s6  ;;  %386 = vrot.lane.b32.xlu1 %v335_v4, %s3565_s6  ;;  %v3694_v18 = vld [vmem:[%s3642_s30 + $0x30] sm:$0xff]  ;;  %v3697_v19 = vrot.slane %v3683_v15, 1  ;;  %v343_v20 = vrot.slane %v3686_v16, 1  ;;  %v3707_v23 = vld [vmem:[%s3642_s30 + $0x58] sm:$0xf]  ;;  %s6659_s19 = smov (!%p254_p8, %s3551_s19), 1 }
  0x1a   : > { %v334_v10 = vsel %vm331_vm0, %v332_v6, %v333_v9  ;;  %v3677_v13 = vsel %vm331_vm0, %v338_v11, %v3654_v3  ;;  %v3680_v14 = vsel %vm331_vm0, %v337_v12, %v338_v11  ;;  %v336_v17 = vsel %vm331_vm0, %v333_v9, %v335_v4  ;;  %v3710_v24 = vld [vmem:[%s3642_s30 + $0x50] sm:$0xff]  ;;  %v3720_v26 = vld [vmem:[%s3642_s30 + $0x48] sm:$0xff]  ;;  %v3747_v34 = vld [vmem:[%s3642_s30 + $0x60] sm:$0xff]  ;;  %s1932_s29 = scalar_select %p1931_p6, 1, 0 }
  0x1b   : > { %382 = vrot.lane.b32.xlu0 %v334_v10, %s3565_s6  ;;  %v342_v21 = vrot.slane %v3694_v18, 1  ;;  %v3704_v22 = vsel %vm331_vm0, %v343_v20, %v3697_v19  ;;  %v3723_v27 = vrot.slane %v3707_v23, 1  ;;  %v348_v28 = vrot.slane %v3710_v24, 1  ;;  %v3734_v31 = vld [vmem:[%s3642_s30 + $0x70] sm:$0xf]  ;;  %v3737_v32 = vld [vmem:[%s3642_s30 + $0x68] sm:$0xff] }
  0x1c   : > { %v347_v29 = vrot.slane %v3720_v26, 1  ;;  %v3750_v35 = vrot.slane %v3734_v31, 1  ;;  %v353_v36 = vrot.slane %v3737_v32, 1  ;;  %v352_v37 = vrot.slane %v3747_v34, 1  ;;  %v3761_v39 = vld [vmem:[%s3642_s30 + $0x88] sm:$0xf] }
  0x1d   : > { %v3713_v25 = vsel %vm331_vm0, %v342_v21, %v343_v20  ;;  %v3731_v30 = vsel %vm331_vm0, %v348_v28, %v3723_v27  ;;  %v3764_v40 = vld [vmem:[%s3642_s30 + $0x80] sm:$0xff]  ;;  %v3774_v42 = vld [vmem:[%s3642_s30 + $0x78] sm:$0xff]  ;;  %v3777_v43 = vrot.slane %v3761_v39, 1  ;;  %v3801_v50 = vld [vmem:[%s3642_s30 + $0x90] sm:$0xff]  ;;  %s3071_s14 = sshll.u32 %s6659_s19, 5 }
  0x1e   : > { %v3740_v33 = vsel %vm331_vm0, %v347_v29, %v348_v28  ;;  %v3758_v38 = vsel %vm331_vm0, %v353_v36, %v3750_v35  ;;  %v3767_v41 = vsel %vm331_vm0, %v352_v37, %v353_v36  ;;  %v358_v44 = vrot.slane %v3764_v40, 1  ;;  %v3788_v47 = vld [vmem:[%s3642_s30 + $0xa0] sm:$0xf]  ;;  %v3791_v48 = vld [vmem:[%s3642_s30 + $0x98] sm:$0xff]  ;;  %v3818_v56 = vld [vmem:[%s3642_s30 + $0xb0] sm:$0xff] }
  0x1f   : > { %v357_v45 = vrot.slane %v3774_v42, 1  ;;  %v3804_v51 = vrot.slane %v3788_v47, 1  ;;  %v363_v52 = vrot.slane %v3791_v48, 1  ;;  %v362_v53 = vrot.slane %v3801_v50, 1  ;;  %v3815_v55 = vld [vmem:[%s3642_s30 + $0xb8] sm:$0xf] }
  0x20   : > { %v3785_v46 = vsel %vm331_vm0, %v358_v44, %v3777_v43  ;;  %v3828_v58 = vld [vmem:[%s3642_s30 + $0xa8] sm:$0xff]  ;;  %v3831_v59 = vrot.slane %v3815_v55, 1  ;;  %v368_v60 = vrot.slane %v3818_v56, 1  ;;  %v3842_v63 = vld [vmem:[%s3642_s30 + $0xd0] sm:$0xf]  ;;  %v3855_v9 = vld [vmem:[%s3642_s30 + $0xc0] sm:$0xff] }
  0x21   : > { %390 = vrot.lane.b32.xlu2 %v3677_v13, %s3565_s6  ;;  %388 = vrot.lane.b32.xlu1 %v3680_v14, %s3565_s6  ;;  %v3794_v49 = vsel %vm331_vm0, %v357_v45, %v358_v44  ;;  %v3812_v54 = vsel %vm331_vm0, %v363_v52, %v3804_v51  ;;  %v3821_v57 = vsel %vm331_vm0, %v362_v53, %v363_v52  ;;  %v367_v61 = vrot.slane %v3828_v58, 1  ;;  %v3845_v4 = vld [vmem:[%s3642_s30 + $0xc8] sm:$0xff]  ;;  %v3872_v21 = vld [vmem:[%s3642_s30 + $0xe0] sm:$0xff] }
  0x22   : > { %6242 = vst [vmem:[#allocation2_spill] sm:$0xff] %v3831_v59  ;;  %v3839_v62 = vsel %vm331_vm0, %v368_v60, %v3831_v59  ;;  %v3858_v10 = vrot.slane %v3842_v63, 1  ;;  %v373_v11 = vrot.slane %v3845_v4, 1  ;;  %v372_v12 = vrot.slane %v3855_v9, 1  ;;  %v3869_v20 = vld [vmem:[%s3642_s30 + $0xe8] sm:$0xf] }
  0x23   : > { %384 = vrot.lane.b32.xlu0 %v336_v17, %s3565_s6  ;;  %6243 = vst [vmem:[#allocation3_spill] sm:$0xff] %v3839_v62  ;;  %v3848_v6 = vsel %vm331_vm0, %v367_v61, %v368_v60  ;;  %v3882_v29 = vld [vmem:[%s3642_s30 + $0xd8] sm:$0xff]  ;;  %v3885_v36 = vrot.slane %v3869_v20, 1  ;;  %v378_v37 = vrot.slane %v3872_v21, 1  ;;  %v476_v53 = vrot.slane %v3648_v1, 2 }
  0x24   : > { %6244 = vst [vmem:[#allocation4_spill] sm:$0xff] %v3858_v10  ;;  %v3866_v17 = vsel %vm331_vm0, %v373_v11, %v3858_v10  ;;  %v3875_v28 = vsel %vm331_vm0, %v372_v12, %v373_v11  ;;  %v377_v44 = vrot.slane %v3882_v29, 1  ;;  %v474_v60 = vrot.slane %v3658_v5, 2 }
  0x25   : > { %6245 = vst [vmem:[#allocation5_spill] sm:$0xff] %v3866_v17  ;;  %v3893_v45 = vsel %vm331_vm0, %v378_v37, %v3885_v36  ;;  %v473_v61 = vrot.slane %v3651_v2, 2  ;;  %v479_v1 = vrot.slane %v3662_v7, 2  ;;  %v478_v5 = vrot.slane %v3665_v8, 2 }
  0x26   : > { %6246 = vst [vmem:[#allocation6_spill] sm:$0xff] %v3875_v28  ;;  %v3896_v52 = vsel %vm331_vm0, %v377_v44, %v378_v37  ;;  %v477_v11 = vsel %vm472_vm1, %v474_v60, %v476_v53  ;;  %v3912_v37 = vrot.slane %v3645_v0, 2 }
  0x27   : > { %6247 = vst [vmem:[#allocation7_spill] sm:$0xff] %v3885_v36  ;;  %v475_v12 = vsel %vm472_vm1, %v473_v61, %v474_v60  ;;  %v3922_v44 = vsel %vm472_vm1, %v478_v5, %v479_v1  ;;  %v484_v60 = vrot.slane %v3686_v16, 2  ;;  %v3949_v5 = vrot.slane %v3707_v23, 2 }
  0x28   : > { %6248 = vst [vmem:[#allocation8_spill] sm:$0xff] %v3893_v45  ;;  %v3919_v2 = vsel %vm472_vm1, %v479_v1, %v3912_v37 }
  0x29   : > { %398 = vrot.lane.b32.xlu2 %v3697_v19, %s3565_s6  ;;  %396 = vrot.lane.b32.xlu1 %v3704_v22, %s3565_s6  ;;  %6249 = vst [vmem:[#allocation9_spill] sm:$0xff] %v3896_v52 }
  0x2a   : > { %6250 = vst [vmem:[#allocation10_spill] sm:$0xff] %v3919_v2 }
  0x2b   : > { %394 = vrot.lane.b32.xlu0 %v3713_v25, %s3565_s6  ;;  %6251 = vst [vmem:[#allocation11_spill] sm:$0xff] %v3922_v44 }
  0x2c   : > { %6256 = vst [vmem:[#allocation16_spill] sm:$0xff] %v3949_v5 }
  0x31   : > { %404 = vrot.lane.b32.xlu2 %v3723_v27, %s3565_s6  ;;  %402 = vrot.lane.b32.xlu1 %v3731_v30, %s3565_s6 }
  0x33   : > { %400 = vrot.lane.b32.xlu0 %v3740_v33, %s3565_s6 }
  0x39   : > { %410 = vrot.lane.b32.xlu2 %v3750_v35, %s3565_s6  ;;  %408 = vrot.lane.b32.xlu1 %v3758_v38, %s3565_s6 }
  0x3b   : > { %406 = vrot.lane.b32.xlu0 %v3767_v41, %s3565_s6 }
  0x41   : > { %416 = vrot.lane.b32.xlu2 %v3777_v43, %s3565_s6  ;;  %414 = vrot.lane.b32.xlu1 %v3785_v46, %s3565_s6 }
  0x43   : > { %412 = vrot.lane.b32.xlu0 %v3794_v49, %s3565_s6 }
  0x49   : > { %422 = vrot.lane.b32.xlu2 %v3804_v51, %s3565_s6  ;;  %420 = vrot.lane.b32.xlu1 %v3812_v54, %s3565_s6 }
  0x4b   : > { %418 = vrot.lane.b32.xlu0 %v3821_v57, %s3565_s6 }
  0x51   : > { %428 = vrot.lane.b32.xlu2 %v3831_v59, %s3565_s6  ;;  %426 = vrot.lane.b32.xlu1 %v3839_v62, %s3565_s6 }
  0x53   : > { %424 = vrot.lane.b32.xlu0 %v3848_v6, %s3565_s6 }
  0x59   : > { %434 = vrot.lane.b32.xlu2 %v3858_v10, %s3565_s6  ;;  %432 = vrot.lane.b32.xlu1 %v3866_v17, %s3565_s6 }
  0x5b   : > { %430 = vrot.lane.b32.xlu0 %v3875_v28, %s3565_s6 }
  0x61   : > { %440 = vrot.lane.b32.xlu2 %v3885_v36, %s3565_s6  ;;  %438 = vrot.lane.b32.xlu1 %v3893_v45, %s3565_s6 }
  0x63   : > { %436 = vrot.lane.b32.xlu0 %v3896_v52, %s3565_s6 }
  0x69   : > { %527 = vrot.lane.b32.xlu2 %v476_v53, %s3566_s7  ;;  %525 = vrot.lane.b32.xlu1 %v477_v11, %s3566_s7  ;;  %v3929_v53 = vrot.slane %v3683_v15, 2  ;;  %v483_v11 = vrot.slane %v3694_v18, 2 }
  0x6b   : > { %523 = vrot.lane.b32.xlu0 %v475_v12, %s3566_s7  ;;  %6252 = vst [vmem:[#allocation12_spill] sm:$0xff] %v3929_v53  ;;  %v3939_v12 = vsel %vm472_vm1, %v484_v60, %v3929_v53  ;;  %v3942_v1 = vsel %vm472_vm1, %v483_v11, %v484_v60 }
  0x6c   : > { %6254 = vst [vmem:[#allocation14_spill] sm:$0xff] %v3939_v12 }
  0x6d   : > { %6255 = vst [vmem:[#allocation15_spill] sm:$0xff] %v3942_v1 }
  0x71   : > { %533 = vrot.lane.b32.xlu2 %v3912_v37, %s3566_s7  ;;  %531 = vrot.lane.b32.xlu1 %v3919_v2, %s3566_s7  ;;  %v488_v2 = vrot.slane %v3720_v26, 2 }
  0x73   : > { %529 = vrot.lane.b32.xlu0 %v3922_v44, %s3566_s7  ;;  %v3934_v61 = vpop.permute.xlu2 %392 }
  0x74   : > { %6253 = vst [vmem:[#allocation13_spill] sm:$0xff] %v3934_v61  ;;  %v489_v61 = vrot.slane %v3710_v24, 2 }
  0x76   : > { %v3959_v60 = vsel %vm472_vm1, %v489_v61, %v3949_v5  ;;  %v3962_v11 = vsel %vm472_vm1, %v488_v2, %v489_v61 }
  0x77   : > { %6258 = vst [vmem:[#allocation18_spill] sm:$0xff] %v3959_v60 }
  0x78   : > { %6259 = vst [vmem:[#allocation19_spill] sm:$0xff] %v3962_v11 }
  0x79   : > { %539 = vrot.lane.b32.xlu2 %v3929_v53, %s3566_s7  ;;  %537 = vrot.lane.b32.xlu1 %v3939_v12, %s3566_s7  ;;  %v3969_v12 = vrot.slane %v3734_v31, 2  ;;  %v493_v53 = vrot.slane %v3747_v34, 2 }
  0x7b   : > { %535 = vrot.lane.b32.xlu0 %v3942_v1, %s3566_s7  ;;  %v3954_v44 = vpop.permute.xlu2 %390  ;;  %6260 = vst [vmem:[#allocation20_spill] sm:$0xff] %v3969_v12 }
  0x7c   : > { %6257 = vst [vmem:[#allocation17_spill] sm:$0xff] %v3954_v44  ;;  %v494_v44 = vrot.slane %v3737_v32, 2 }
  0x7e   : > { %v3979_v2 = vsel %vm472_vm1, %v494_v44, %v3969_v12  ;;  %v3982_v61 = vsel %vm472_vm1, %v493_v53, %v494_v44  ;;  %v498_v44 = vrot.slane %v3774_v42, 2 }
  0x7f   : > { %6262 = vst [vmem:[#allocation22_spill] sm:$0xff] %v3979_v2 }
  0x80   : > { %6263 = vst [vmem:[#allocation23_spill] sm:$0xff] %v3982_v61 }
  0x81   : > { %545 = vrot.lane.b32.xlu2 %v3949_v5, %s3566_s7  ;;  %543 = vrot.lane.b32.xlu1 %v3959_v60, %s3566_s7  ;;  %v3989_v60 = vrot.slane %v3761_v39, 2 }
  0x83   : > { %541 = vrot.lane.b32.xlu0 %v3962_v11, %s3566_s7  ;;  %v3974_v1 = vpop.permute.xlu2 %398  ;;  %6264 = vst [vmem:[#allocation24_spill] sm:$0xff] %v3989_v60 }
  0x84   : > { %6261 = vst [vmem:[#allocation21_spill] sm:$0xff] %v3974_v1  ;;  %v499_v1 = vrot.slane %v3764_v40, 2 }
  0x89   : > { %551 = vrot.lane.b32.xlu2 %v3969_v12, %s3566_s7  ;;  %549 = vrot.lane.b32.xlu1 %v3979_v2, %s3566_s7  ;;  %v4003_v12 = vsel %vm472_vm1, %v499_v1, %v3989_v60  ;;  %v4006_v2 = vsel %vm472_vm1, %v498_v44, %v499_v1  ;;  %v503_v1 = vrot.slane %v3801_v50, 2 }
  0x8a   : > { %6268 = vst [vmem:[#allocation28_spill] sm:$0xff] %v4003_v12 }
  0x8b   : > { %547 = vrot.lane.b32.xlu0 %v3982_v61, %s3566_s7  ;;  %v3994_v11 = vpop.permute.xlu2 %404  ;;  %v3996_v5 = vpop.permute.xlu1 %386  ;;  %6269 = vst [vmem:[#allocation29_spill] sm:$0xff] %v4006_v2 }
  0x8c   : > { %6265 = vst [vmem:[#allocation25_spill] sm:$0xff] %v3994_v11  ;;  %v4013_v11 = vrot.slane %v3788_v47, 2 }
  0x8d   : > { %6266 = vst [vmem:[#allocation26_spill] sm:$0xff] %v3996_v5  ;;  %v3999_v53 = vpop.permute.xlu0 %382  ;;  %v504_v5 = vrot.slane %v3791_v48, 2 }
  0x8e   : > { %6267 = vst [vmem:[#allocation27_spill] sm:$0xff] %v3999_v53 }
  0x8f   : > { %6270 = vst [vmem:[#allocation30_spill] sm:$0xff] %v4013_v11 }
  0x91   : > { %557 = vrot.lane.b32.xlu2 %v3989_v60, %s3566_s7  ;;  %555 = vrot.lane.b32.xlu1 %v4003_v12, %s3566_s7  ;;  %v4027_v60 = vsel %vm472_vm1, %v504_v5, %v4013_v11  ;;  %v4030_v12 = vsel %vm472_vm1, %v503_v1, %v504_v5  ;;  %v508_v5 = vrot.slane %v3828_v58, 2 }
  0x92   : > { %6274 = vst [vmem:[#allocation34_spill] sm:$0xff] %v4027_v60 }
  0x93   : > { %553 = vrot.lane.b32.xlu0 %v4006_v2, %s3566_s7  ;;  %v4018_v53 = vpop.permute.xlu2 %410  ;;  %v4020_v61 = vpop.permute.xlu1 %388  ;;  %6275 = vst [vmem:[#allocation35_spill] sm:$0xff] %v4030_v12 }
  0x94   : > { %6271 = vst [vmem:[#allocation31_spill] sm:$0xff] %v4018_v53  ;;  %v4037_v53 = vrot.slane %v3815_v55, 2 }
  0x95   : > { %6272 = vst [vmem:[#allocation32_spill] sm:$0xff] %v4020_v61  ;;  %v4023_v44 = vpop.permute.xlu0 %384  ;;  %v509_v61 = vrot.slane %v3818_v56, 2 }
  0x96   : > { %6273 = vst [vmem:[#allocation33_spill] sm:$0xff] %v4023_v44 }
  0x97   : > { %6276 = vst [vmem:[#allocation36_spill] sm:$0xff] %v4037_v53 }
  0x99   : > { %563 = vrot.lane.b32.xlu2 %v4013_v11, %s3566_s7  ;;  %561 = vrot.lane.b32.xlu1 %v4027_v60, %s3566_s7  ;;  %v4051_v11 = vsel %vm472_vm1, %v509_v61, %v4037_v53  ;;  %v4054_v60 = vsel %vm472_vm1, %v508_v5, %v509_v61  ;;  %v513_v61 = vrot.slane %v3855_v9, 2 }
  0x9a   : > { %6280 = vst [vmem:[#allocation40_spill] sm:$0xff] %v4051_v11 }
  0x9b   : > { %559 = vrot.lane.b32.xlu0 %v4030_v12, %s3566_s7  ;;  %v4042_v44 = vpop.permute.xlu2 %416  ;;  %v4044_v2 = vpop.permute.xlu1 %396  ;;  %6281 = vst [vmem:[#allocation41_spill] sm:$0xff] %v4054_v60 }
  0x9c   : > { %6277 = vst [vmem:[#allocation37_spill] sm:$0xff] %v4042_v44  ;;  %v4061_v44 = vrot.slane %v3842_v63, 2 }
  0x9d   : > { %6278 = vst [vmem:[#allocation38_spill] sm:$0xff] %v4044_v2  ;;  %v4047_v1 = vpop.permute.xlu0 %394  ;;  %v514_v2 = vrot.slane %v3845_v4, 2 }
  0x9e   : > { %6279 = vst [vmem:[#allocation39_spill] sm:$0xff] %v4047_v1 }
  0x9f   : > { %6282 = vst [vmem:[#allocation42_spill] sm:$0xff] %v4061_v44 }
  0xa1   : > { %569 = vrot.lane.b32.xlu2 %v4037_v53, %s3566_s7  ;;  %567 = vrot.lane.b32.xlu1 %v4051_v11, %s3566_s7  ;;  %v4075_v53 = vsel %vm472_vm1, %v514_v2, %v4061_v44  ;;  %v4078_v11 = vsel %vm472_vm1, %v513_v61, %v514_v2  ;;  %v518_v2 = vrot.slane %v3882_v29, 2 }
  0xa2   : > { %6286 = vst [vmem:[#allocation46_spill] sm:$0xff] %v4075_v53 }
  0xa3   : > { %565 = vrot.lane.b32.xlu0 %v4054_v60, %s3566_s7  ;;  %v4066_v1 = vpop.permute.xlu2 %422  ;;  %v4068_v12 = vpop.permute.xlu1 %402  ;;  %6287 = vst [vmem:[#allocation47_spill] sm:$0xff] %v4078_v11 }
  0xa4   : > { %6283 = vst [vmem:[#allocation43_spill] sm:$0xff] %v4066_v1  ;;  %v4085_v1 = vrot.slane %v3869_v20, 2 }
  0xa5   : > { %6284 = vst [vmem:[#allocation44_spill] sm:$0xff] %v4068_v12  ;;  %v4071_v5 = vpop.permute.xlu0 %400  ;;  %v519_v12 = vrot.slane %v3872_v21, 2 }
  0xa6   : > { %6285 = vst [vmem:[#allocation45_spill] sm:$0xff] %v4071_v5 }
  0xa7   : > { %6288 = vst [vmem:[#allocation48_spill] sm:$0xff] %v4085_v1 }
  0xa9   : > { %575 = vrot.lane.b32.xlu2 %v4061_v44, %s3566_s7  ;;  %573 = vrot.lane.b32.xlu1 %v4075_v53, %s3566_s7  ;;  %v4099_v44 = vsel %vm472_vm1, %v519_v12, %v4085_v1  ;;  %v4102_v53 = vsel %vm472_vm1, %v518_v2, %v519_v12 }
  0xaa   : > { %6292 = vst [vmem:[#allocation52_spill] sm:$0xff] %v4099_v44 }
  0xab   : > { %571 = vrot.lane.b32.xlu0 %v4078_v11, %s3566_s7  ;;  %v4090_v5 = vpop.permute.xlu2 %428  ;;  %v4092_v60 = vpop.permute.xlu1 %408  ;;  %6293 = vst [vmem:[#allocation53_spill] sm:$0xff] %v4102_v53 }
  0xac   : > { %6289 = vst [vmem:[#allocation49_spill] sm:$0xff] %v4090_v5 }
  0xad   : > { %6290 = vst [vmem:[#allocation50_spill] sm:$0xff] %v4092_v60  ;;  %v4095_v61 = vpop.permute.xlu0 %406 }
  0xae   : > { %6291 = vst [vmem:[#allocation51_spill] sm:$0xff] %v4095_v61 }
  0xb1   : > { %581 = vrot.lane.b32.xlu2 %v4085_v1, %s3566_s7  ;;  %579 = vrot.lane.b32.xlu1 %v4099_v44, %s3566_s7 }
  0xb3   : > { %577 = vrot.lane.b32.xlu0 %v4102_v53, %s3566_s7  ;;  %v4110_v5 = vpop.permute.xlu2 %434  ;;  %v4112_v60 = vpop.permute.xlu1 %414 }
  0xb4   : > { %6294 = vst [vmem:[#allocation54_spill] sm:$0xff] %v4110_v5 }
  0xb5   : > { %6295 = vst [vmem:[#allocation55_spill] sm:$0xff] %v4112_v60  ;;  %v4114_v61 = vpop.permute.xlu0 %412 }
  0xb6   : > { %6296 = vst [vmem:[#allocation56_spill] sm:$0xff] %v4114_v61 }
  0xb9   : > { %620 = vrot.lane.b32.xlu2 %v3645_v0, %s3567_s8  ;;  %618 = vrot.lane.b32.xlu1 %v3662_v7, %s3567_s8 }
  0xbb   : > { %616 = vrot.lane.b32.xlu0 %v3665_v8, %s3567_s8  ;;  %v4122_v12 = vpop.permute.xlu2 %440  ;;  %v4124_v2 = vpop.permute.xlu1 %420 }
  0xbc   : > { %6297 = vst [vmem:[#allocation57_spill] sm:$0xff] %v4122_v12 }
  0xbd   : > { %6298 = vst [vmem:[#allocation58_spill] sm:$0xff] %v4124_v2  ;;  %v4126_v53 = vpop.permute.xlu0 %418 }
  0xbe   : > { %6299 = vst [vmem:[#allocation59_spill] sm:$0xff] %v4126_v53 }
  0xc1   : > { %626 = vrot.lane.b32.xlu2 %v3683_v15, %s3567_s8  ;;  %624 = vrot.lane.b32.xlu1 %v3686_v16, %s3567_s8 }
  0xc3   : > { %622 = vrot.lane.b32.xlu0 %v3694_v18, %s3567_s8  ;;  %v4134_v0 = vpop.permute.xlu2 %527  ;;  %v4136_v7 = vpop.permute.xlu1 %426 }
  0xc4   : > { %6300 = vst [vmem:[#allocation60_spill] sm:$0xff] %v4134_v0 }
  0xc5   : > { %6301 = vst [vmem:[#allocation61_spill] sm:$0xff] %v4136_v7  ;;  %v4138_v8 = vpop.permute.xlu0 %424 }
  0xc6   : > { %6302 = vst [vmem:[#allocation62_spill] sm:$0xff] %v4138_v8 }
  0xc9   : > { %632 = vrot.lane.b32.xlu2 %v3707_v23, %s3567_s8  ;;  %630 = vrot.lane.b32.xlu1 %v3710_v24, %s3567_s8 }
  0xcb   : > { %628 = vrot.lane.b32.xlu0 %v3720_v26, %s3567_s8  ;;  %v4146_v12 = vpop.permute.xlu2 %533  ;;  %v4148_v5 = vpop.permute.xlu1 %432 }
  0xcc   : > { %6303 = vst [vmem:[#allocation63_spill] sm:$0xff] %v4146_v12 }
  0xcd   : > { %6304 = vst [vmem:[#allocation64_spill] sm:$0xff] %v4148_v5  ;;  %v4150_v2 = vpop.permute.xlu0 %430 }
  0xce   : > { %6305 = vst [vmem:[#allocation65_spill] sm:$0xff] %v4150_v2 }
  0xd1   : > { %638 = vrot.lane.b32.xlu2 %v3734_v31, %s3567_s8  ;;  %636 = vrot.lane.b32.xlu1 %v3737_v32, %s3567_s8 }
  0xd3   : > { %634 = vrot.lane.b32.xlu0 %v3747_v34, %s3567_s8  ;;  %v4158_v7 = vpop.permute.xlu2 %539  ;;  %v4160_v8 = vpop.permute.xlu1 %438 }
  0xd4   : > { %6306 = vst [vmem:[#allocation66_spill] sm:$0xff] %v4158_v7 }
  0xd5   : > { %6307 = vst [vmem:[#allocation67_spill] sm:$0xff] %v4160_v8  ;;  %v4162_v53 = vpop.permute.xlu0 %436 }
  0xd6   : > { %6308 = vst [vmem:[#allocation68_spill] sm:$0xff] %v4162_v53 }
  0xd9   : > { %644 = vrot.lane.b32.xlu2 %v3761_v39, %s3567_s8  ;;  %642 = vrot.lane.b32.xlu1 %v3764_v40, %s3567_s8 }
  0xdb   : > { %640 = vrot.lane.b32.xlu0 %v3774_v42, %s3567_s8  ;;  %v4170_v5 = vpop.permute.xlu2 %545  ;;  %v4172_v2 = vpop.permute.xlu1 %525 }
  0xdc   : > { %6309 = vst [vmem:[#allocation69_spill] sm:$0xff] %v4170_v5 }
  0xdd   : > { %6310 = vst [vmem:[#allocation70_spill] sm:$0xff] %v4172_v2  ;;  %v4174_v60 = vpop.permute.xlu0 %523 }
  0xde   : > { %6311 = vst [vmem:[#allocation71_spill] sm:$0xff] %v4174_v60 }
  0xe1   : > { %650 = vrot.lane.b32.xlu2 %v3788_v47, %s3567_s8  ;;  %648 = vrot.lane.b32.xlu1 %v3791_v48, %s3567_s8 }
  0xe3   : > { %646 = vrot.lane.b32.xlu0 %v3801_v50, %s3567_s8  ;;  %v4182_v8 = vpop.permute.xlu2 %551  ;;  %v4184_v53 = vpop.permute.xlu1 %531 }
  0xe4   : > { %6312 = vst [vmem:[#allocation72_spill] sm:$0xff] %v4182_v8 }
  0xe5   : > { %6313 = vst [vmem:[#allocation73_spill] sm:$0xff] %v4184_v53  ;;  %v4186_v61 = vpop.permute.xlu0 %529 }
  0xe6   : > { %6314 = vst [vmem:[#allocation74_spill] sm:$0xff] %v4186_v61 }
  0xe9   : > { %656 = vrot.lane.b32.xlu2 %v3815_v55, %s3567_s8  ;;  %654 = vrot.lane.b32.xlu1 %v3818_v56, %s3567_s8 }
  0xeb   : > { %652 = vrot.lane.b32.xlu0 %v3828_v58, %s3567_s8  ;;  %v4194_v5 = vpop.permute.xlu2 %557  ;;  %v4196_v7 = vpop.permute.xlu1 %537 }
  0xec   : > { %6315 = vst [vmem:[#allocation75_spill] sm:$0xff] %v4194_v5 }
  0xed   : > { %6316 = vst [vmem:[#allocation76_spill] sm:$0xff] %v4196_v7  ;;  %v4198_v8 = vpop.permute.xlu0 %535 }
  0xee   : > { %6317 = vst [vmem:[#allocation77_spill] sm:$0xff] %v4198_v8 }
  0xf1   : > { %662 = vrot.lane.b32.xlu2 %v3842_v63, %s3567_s8  ;;  %660 = vrot.lane.b32.xlu1 %v3845_v4, %s3567_s8 }
  0xf3   : > { %658 = vrot.lane.b32.xlu0 %v3855_v9, %s3567_s8  ;;  %v4206_v12 = vpop.permute.xlu2 %563  ;;  %v4208_v53 = vpop.permute.xlu1 %543 }
  0xf4   : > { %6318 = vst [vmem:[#allocation78_spill] sm:$0xff] %v4206_v12  ;;  %v4225_v12 = vld [vmem:[%s3642_s30 + $0x100] sm:$0xf] }
  0xf5   : > { %6319 = vst [vmem:[#allocation79_spill] sm:$0xff] %v4208_v53  ;;  %v4210_v5 = vpop.permute.xlu0 %541  ;;  %v4228_v53 = vld [vmem:[%s3642_s30 + $0xf8] sm:$0xff] }
  0xf6   : > { %6320 = vst [vmem:[#allocation80_spill] sm:$0xff] %v4210_v5  ;;  %v4231_v5 = vld [vmem:[%s3642_s30 + $0xf0] sm:$0xff] }
  0xf9   : > { %668 = vrot.lane.b32.xlu2 %v3869_v20, %s3567_s8  ;;  %666 = vrot.lane.b32.xlu1 %v3872_v21, %s3567_s8 }
  0xfb   : > { %664 = vrot.lane.b32.xlu0 %v3882_v29, %s3567_s8  ;;  %v4218_v8 = vpop.permute.xlu2 %569  ;;  %v4220_v7 = vpop.permute.xlu1 %549 }
  0xfc   : > { %6321 = vst [vmem:[#allocation81_spill] sm:$0xff] %v4218_v8 }
  0xfd   : > { %6322 = vst [vmem:[#allocation82_spill] sm:$0xff] %v4220_v7  ;;  %v4222_v0 = vpop.permute.xlu0 %547 }
  0xfe   : > { %6323 = vst [vmem:[#allocation83_spill] sm:$0xff] %v4222_v0 }
 0x101   : > { %674 = vrot.lane.b32.xlu2 %v4225_v12, %s3567_s8  ;;  %672 = vrot.lane.b32.xlu1 %v4228_v53, %s3567_s8 }
 0x103   : > { %670 = vrot.lane.b32.xlu0 %v4231_v5, %s3567_s8  ;;  %v4239_v8 = vpop.permute.xlu2 %575  ;;  %v4241_v7 = vpop.permute.xlu1 %555 }
 0x104   : > { %6324 = vst [vmem:[#allocation84_spill] sm:$0xff] %v4239_v8 }
 0x105   : > { %6325 = vst [vmem:[#allocation85_spill] sm:$0xff] %v4241_v7  ;;  %v4243_v0 = vpop.permute.xlu0 %553 }
 0x106   : > { %6326 = vst [vmem:[#allocation86_spill] sm:$0xff] %v4243_v0 }
 0x109   : > { %715 = vrot.lane.b32.xlu2 %v3654_v3, %s3568_s9  ;;  %713 = vrot.lane.b32.xlu1 %v3677_v13, %s3568_s9 }
 0x10b   : > { %711 = vrot.lane.b32.xlu0 %v3680_v14, %s3568_s9  ;;  %v4251_v61 = vpop.permute.xlu2 %581  ;;  %v4253_v60 = vpop.permute.xlu1 %561 }
 0x10c   : > { %6327 = vst [vmem:[#allocation87_spill] sm:$0xff] %v4251_v61 }
 0x10d   : > { %6328 = vst [vmem:[#allocation88_spill] sm:$0xff] %v4253_v60  ;;  %v4255_v2 = vpop.permute.xlu0 %559 }
 0x10e   : > { %6329 = vst [vmem:[#allocation89_spill] sm:$0xff] %v4255_v2 }
 0x111   : > { %721 = vrot.lane.b32.xlu2 %v3697_v19, %s3568_s9  ;;  %719 = vrot.lane.b32.xlu1 %v3704_v22, %s3568_s9 }
 0x113   : > { %717 = vrot.lane.b32.xlu0 %v3713_v25, %s3568_s9  ;;  %v4263_v3 = vpop.permute.xlu2 %620  ;;  %v4265_v13 = vpop.permute.xlu1 %567 }
 0x114   : > { %6330 = vst [vmem:[#allocation90_spill] sm:$0xff] %v4263_v3 }
 0x115   : > { %6331 = vst [vmem:[#allocation91_spill] sm:$0xff] %v4265_v13  ;;  %v4267_v14 = vpop.permute.xlu0 %565 }
 0x116   : > { %6332 = vst [vmem:[#allocation92_spill] sm:$0xff] %v4267_v14 }
 0x119   : > { %727 = vrot.lane.b32.xlu2 %v3723_v27, %s3568_s9  ;;  %725 = vrot.lane.b32.xlu1 %v3731_v30, %s3568_s9 }
 0x11b   : > { %723 = vrot.lane.b32.xlu0 %v3740_v33, %s3568_s9  ;;  %v4275_v61 = vpop.permute.xlu2 %626  ;;  %v4277_v8 = vpop.permute.xlu1 %573 }
 0x11c   : > { %6333 = vst [vmem:[#allocation93_spill] sm:$0xff] %v4275_v61 }
 0x11d   : > { %6334 = vst [vmem:[#allocation94_spill] sm:$0xff] %v4277_v8  ;;  %v4279_v60 = vpop.permute.xlu0 %571 }
 0x11e   : > { %6335 = vst [vmem:[#allocation95_spill] sm:$0xff] %v4279_v60 }
 0x121   : > { %733 = vrot.lane.b32.xlu2 %v3750_v35, %s3568_s9  ;;  %731 = vrot.lane.b32.xlu1 %v3758_v38, %s3568_s9 }
 0x123   : > { %729 = vrot.lane.b32.xlu0 %v3767_v41, %s3568_s9  ;;  %v4287_v13 = vpop.permute.xlu2 %632  ;;  %v4289_v14 = vpop.permute.xlu1 %579 }
 0x124   : > { %6336 = vst [vmem:[#allocation96_spill] sm:$0xff] %v4287_v13 }
 0x125   : > { %6337 = vst [vmem:[#allocation97_spill] sm:$0xff] %v4289_v14  ;;  %v4291_v2 = vpop.permute.xlu0 %577 }
 0x126   : > { %6338 = vst [vmem:[#allocation98_spill] sm:$0xff] %v4291_v2 }
 0x129   : > { %739 = vrot.lane.b32.xlu2 %v3777_v43, %s3568_s9  ;;  %737 = vrot.lane.b32.xlu1 %v3785_v46, %s3568_s9 }
 0x12b   : > { %735 = vrot.lane.b32.xlu0 %v3794_v49, %s3568_s9  ;;  %v4299_v8 = vpop.permute.xlu2 %638  ;;  %v4301_v60 = vpop.permute.xlu1 %618 }
 0x12c   : > { %6339 = vst [vmem:[#allocation99_spill] sm:$0xff] %v4299_v8 }
 0x12d   : > { %6340 = vst [vmem:[#allocation100_spill] sm:$0xff] %v4301_v60  ;;  %v4303_v7 = vpop.permute.xlu0 %616 }
 0x12e   : > { %6341 = vst [vmem:[#allocation101_spill] sm:$0xff] %v4303_v7 }
 0x131   : > { %745 = vrot.lane.b32.xlu2 %v3804_v51, %s3568_s9  ;;  %743 = vrot.lane.b32.xlu1 %v3812_v54, %s3568_s9 }
 0x133   : > { %741 = vrot.lane.b32.xlu0 %v3821_v57, %s3568_s9  ;;  %v4311_v14 = vpop.permute.xlu2 %644  ;;  %v4313_v2 = vpop.permute.xlu1 %624 }
 0x134   : > { %6342 = vst [vmem:[#allocation102_spill] sm:$0xff] %v4311_v14 }
 0x135   : > { %6343 = vst [vmem:[#allocation103_spill] sm:$0xff] %v4313_v2  ;;  %v4315_v0 = vpop.permute.xlu0 %622 }
 0x136   : > { %6344 = vst [vmem:[#allocation104_spill] sm:$0xff] %v4315_v0 }
 0x139   : > { %751 = vrot.lane.b32.xlu2 %v3831_v59, %s3568_s9  ;;  %749 = vrot.lane.b32.xlu1 %v3839_v62, %s3568_s9 }
 0x13b   : > { %747 = vrot.lane.b32.xlu0 %v3848_v6, %s3568_s9  ;;  %v4323_v8 = vpop.permute.xlu2 %650  ;;  %v4325_v13 = vpop.permute.xlu1 %630 }
 0x13c   : > { %6345 = vst [vmem:[#allocation105_spill] sm:$0xff] %v4323_v8  ;;  %v4346_v8 = vrot.slane %v4225_v12, 1 }
 0x13d   : > { %6346 = vst [vmem:[#allocation106_spill] sm:$0xff] %v4325_v13  ;;  %v4327_v61 = vpop.permute.xlu0 %628 }
 0x13e   : > { %6347 = vst [vmem:[#allocation107_spill] sm:$0xff] %v4327_v61  ;;  %v707_v61 = vrot.slane %v4228_v53, 1 }
 0x13f   : > { %6351 = vst [vmem:[#allocation111_spill] sm:$0xff] %v4346_v8 }
 0x140   : > { %v4360_v0 = vsel %vm331_vm0, %v707_v61, %v4346_v8 }
 0x141   : > { %757 = vrot.lane.b32.xlu2 %v3858_v10, %s3568_s9  ;;  %755 = vrot.lane.b32.xlu1 %v3866_v17, %s3568_s9  ;;  %6355 = vst [vmem:[#allocation115_spill] sm:$0xff] %v4360_v0 }
 0x143   : > { %753 = vrot.lane.b32.xlu0 %v3875_v28, %s3568_s9  ;;  %v4335_v14 = vpop.permute.xlu2 %656  ;;  %v4337_v2 = vpop.permute.xlu1 %636 }
 0x144   : > { %6348 = vst [vmem:[#allocation108_spill] sm:$0xff] %v4335_v14 }
 0x145   : > { %6349 = vst [vmem:[#allocation109_spill] sm:$0xff] %v4337_v2  ;;  %v4339_v3 = vpop.permute.xlu0 %634  ;;  %v706_v2 = vrot.slane %v4231_v5, 1 }
 0x146   : > { %6350 = vst [vmem:[#allocation110_spill] sm:$0xff] %v4339_v3 }
 0x147   : > { %v4363_v7 = vsel %vm331_vm0, %v706_v2, %v707_v61  ;;  %v6360_v61 = vld [vmem:[#allocation10_spill] sm:$0xff]  ;;  %v6361_v2 = vld [vmem:[#allocation11_spill] sm:$0xff] }
 0x148   : > { %6356 = vst [vmem:[#allocation116_spill] sm:$0xff] %v4363_v7 }
 0x149   : > { %763 = vrot.lane.b32.xlu2 %v3885_v36, %s3568_s9  ;;  %761 = vrot.lane.b32.xlu1 %v3893_v45, %s3568_s9 }
 0x14b   : > { %759 = vrot.lane.b32.xlu0 %v3896_v52, %s3568_s9  ;;  %v4351_v13 = vpop.permute.xlu2 %662  ;;  %v4353_v14 = vpop.permute.xlu1 %642 }
 0x14c   : > { %6352 = vst [vmem:[#allocation112_spill] sm:$0xff] %v4351_v13 }
 0x14d   : > { %6353 = vst [vmem:[#allocation113_spill] sm:$0xff] %v4353_v14  ;;  %v4356_v3 = vpop.permute.xlu0 %640 }
 0x14e   : > { %6354 = vst [vmem:[#allocation114_spill] sm:$0xff] %v4356_v3 }
 0x151   : > { %769 = vrot.lane.b32.xlu2 %v4346_v8, %s3568_s9  ;;  %767 = vrot.lane.b32.xlu1 %v4360_v0, %s3568_s9 }
 0x153   : > { %765 = vrot.lane.b32.xlu0 %v4363_v7, %s3568_s9  ;;  %v4371_v13 = vpop.permute.xlu2 %668  ;;  %v4373_v14 = vpop.permute.xlu1 %648 }
 0x154   : > { %6357 = vst [vmem:[#allocation117_spill] sm:$0xff] %v4371_v13  ;;  %v6365_v13 = vld [vmem:[#allocation12_spill] sm:$0xff] }
 0x155   : > { %6358 = vst [vmem:[#allocation118_spill] sm:$0xff] %v4373_v14  ;;  %v4375_v3 = vpop.permute.xlu0 %646  ;;  %v6366_v14 = vld [vmem:[#allocation14_spill] sm:$0xff] }
 0x156   : > { %6359 = vst [vmem:[#allocation119_spill] sm:$0xff] %v4375_v3 }
 0x159   : > { %810 = vrot.lane.b32.xlu2 %v3912_v37, %s3569_s10  ;;  %808 = vrot.lane.b32.xlu1 %v6360_v61, %s3569_s10  ;;  %v6367_v37 = vld [vmem:[#allocation15_spill] sm:$0xff] }
 0x15b   : > { %806 = vrot.lane.b32.xlu0 %v6361_v2, %s3569_s10  ;;  %v4383_v8 = vpop.permute.xlu2 %674  ;;  %v4385_v60 = vpop.permute.xlu1 %654 }
 0x15c   : > { %6362 = vst [vmem:[#allocation10_spill] sm:$0xff] %v4383_v8  ;;  %v6371_v8 = vld [vmem:[#allocation16_spill] sm:$0xff] }
 0x15d   : > { %6363 = vst [vmem:[#allocation11_spill] sm:$0xff] %v4385_v60  ;;  %v4387_v7 = vpop.permute.xlu0 %652  ;;  %v6372_v60 = vld [vmem:[#allocation18_spill] sm:$0xff] }
 0x15e   : > { %6364 = vst [vmem:[#allocation120_spill] sm:$0xff] %v4387_v7  ;;  %v6373_v7 = vld [vmem:[#allocation19_spill] sm:$0xff] }
 0x161   : > { %816 = vrot.lane.b32.xlu2 %v6365_v13, %s3569_s10  ;;  %814 = vrot.lane.b32.xlu1 %v6366_v14, %s3569_s10 }
 0x163   : > { %812 = vrot.lane.b32.xlu0 %v6367_v37, %s3569_s10  ;;  %v4395_v3 = vpop.permute.xlu2 %715  ;;  %v4397_v61 = vpop.permute.xlu1 %660 }
 0x164   : > { %6368 = vst [vmem:[#allocation12_spill] sm:$0xff] %v4395_v3  ;;  %v6377_v3 = vld [vmem:[#allocation20_spill] sm:$0xff] }
 0x165   : > { %6369 = vst [vmem:[#allocation121_spill] sm:$0xff] %v4397_v61  ;;  %v4399_v2 = vpop.permute.xlu0 %658  ;;  %v6378_v61 = vld [vmem:[#allocation22_spill] sm:$0xff] }
 0x166   : > { %6370 = vst [vmem:[#allocation122_spill] sm:$0xff] %v4399_v2  ;;  %v6379_v2 = vld [vmem:[#allocation23_spill] sm:$0xff] }
 0x169   : > { %822 = vrot.lane.b32.xlu2 %v6371_v8, %s3569_s10  ;;  %820 = vrot.lane.b32.xlu1 %v6372_v60, %s3569_s10 }
 0x16b   : > { %818 = vrot.lane.b32.xlu0 %v6373_v7, %s3569_s10  ;;  %v4407_v0 = vpop.permute.xlu2 %721  ;;  %v4409_v36 = vpop.permute.xlu1 %666 }
 0x16c   : > { %6374 = vst [vmem:[#allocation16_spill] sm:$0xff] %v4407_v0  ;;  %v6383_v0 = vld [vmem:[#allocation24_spill] sm:$0xff] }
 0x16d   : > { %6375 = vst [vmem:[#allocation123_spill] sm:$0xff] %v4409_v36  ;;  %v4411_v45 = vpop.permute.xlu0 %664  ;;  %v6384_v36 = vld [vmem:[#allocation28_spill] sm:$0xff] }
 0x16e   : > { %6376 = vst [vmem:[#allocation124_spill] sm:$0xff] %v4411_v45  ;;  %v6385_v45 = vld [vmem:[#allocation29_spill] sm:$0xff] }
 0x171   : > { %828 = vrot.lane.b32.xlu2 %v6377_v3, %s3569_s10  ;;  %826 = vrot.lane.b32.xlu1 %v6378_v61, %s3569_s10 }
 0x173   : > { %824 = vrot.lane.b32.xlu0 %v6379_v2, %s3569_s10  ;;  %v4419_v10 = vpop.permute.xlu2 %727  ;;  %v4421_v52 = vpop.permute.xlu1 %672 }
 0x174   : > { %6380 = vst [vmem:[#allocation125_spill] sm:$0xff] %v4419_v10  ;;  %v6389_v10 = vld [vmem:[#allocation30_spill] sm:$0xff] }
 0x175   : > { %6381 = vst [vmem:[#allocation126_spill] sm:$0xff] %v4421_v52  ;;  %v4423_v17 = vpop.permute.xlu0 %670  ;;  %v6390_v52 = vld [vmem:[#allocation34_spill] sm:$0xff] }
 0x176   : > { %6382 = vst [vmem:[#allocation127_spill] sm:$0xff] %v4423_v17  ;;  %v6391_v17 = vld [vmem:[#allocation35_spill] sm:$0xff] }
 0x179   : > { %834 = vrot.lane.b32.xlu2 %v6383_v0, %s3569_s10  ;;  %832 = vrot.lane.b32.xlu1 %v6384_v36, %s3569_s10 }
 0x17b   : > { %830 = vrot.lane.b32.xlu0 %v6385_v45, %s3569_s10  ;;  %v4431_v59 = vpop.permute.xlu2 %733  ;;  %v4433_v28 = vpop.permute.xlu1 %713 }
 0x17c   : > { %6386 = vst [vmem:[#allocation128_spill] sm:$0xff] %v4431_v59  ;;  %v6395_v59 = vld [vmem:[#allocation36_spill] sm:$0xff] }
 0x17d   : > { %6387 = vst [vmem:[#allocation129_spill] sm:$0xff] %v4433_v28  ;;  %v4435_v62 = vpop.permute.xlu0 %711  ;;  %v6397_v28 = vld [vmem:[#allocation41_spill] sm:$0xff] }
 0x17e   : > { %6388 = vst [vmem:[#allocation130_spill] sm:$0xff] %v4435_v62  ;;  %v6396_v62 = vld [vmem:[#allocation40_spill] sm:$0xff] }
 0x181   : > { %840 = vrot.lane.b32.xlu2 %v6389_v10, %s3569_s10  ;;  %838 = vrot.lane.b32.xlu1 %v6390_v52, %s3569_s10 }
 0x183   : > { %836 = vrot.lane.b32.xlu0 %v6391_v17, %s3569_s10  ;;  %v4443_v0 = vpop.permute.xlu2 %739  ;;  %v4445_v3 = vpop.permute.xlu1 %719 }
 0x184   : > { %6392 = vst [vmem:[#allocation131_spill] sm:$0xff] %v4443_v0  ;;  %v6401_v0 = vld [vmem:[#allocation42_spill] sm:$0xff] }
 0x185   : > { %6393 = vst [vmem:[#allocation132_spill] sm:$0xff] %v4445_v3  ;;  %v4447_v45 = vpop.permute.xlu0 %717  ;;  %v6402_v3 = vld [vmem:[#allocation46_spill] sm:$0xff] }
 0x186   : > { %6394 = vst [vmem:[#allocation133_spill] sm:$0xff] %v4447_v45 }
 0x189   : > { %846 = vrot.lane.b32.xlu2 %v6395_v59, %s3569_s10  ;;  %844 = vrot.lane.b32.xlu1 %v6396_v62, %s3569_s10 }
 0x18b   : > { %842 = vrot.lane.b32.xlu0 %v6397_v28, %s3569_s10  ;;  %v4455_v10 = vpop.permute.xlu2 %745  ;;  %v4457_v52 = vpop.permute.xlu1 %725 }
 0x18c   : > { %6398 = vst [vmem:[#allocation134_spill] sm:$0xff] %v4455_v10  ;;  %v802_v10 = vrot.slane %v4228_v53, 2 }
 0x18d   : > { %6399 = vst [vmem:[#allocation135_spill] sm:$0xff] %v4457_v52  ;;  %v4459_v17 = vpop.permute.xlu0 %723  ;;  %v6407_v52 = vld [vmem:[#allocation53_spill] sm:$0xff] }
 0x18e   : > { %6400 = vst [vmem:[#allocation136_spill] sm:$0xff] %v4459_v17  ;;  %v4479_v17 = vrot.slane %v4225_v12, 2 }
 0x190   : > { %6406 = vst [vmem:[#allocation140_spill] sm:$0xff] %v4479_v17 }
 0x191   : > { %852 = vrot.lane.b32.xlu2 %v6401_v0, %s3569_s10  ;;  %850 = vrot.lane.b32.xlu1 %v6402_v3, %s3569_s10 }
 0x193   : > { %848 = vrot.lane.b32.xlu0 %v4078_v11, %s3569_s10  ;;  %v4467_v45 = vpop.permute.xlu2 %751  ;;  %v4469_v59 = vpop.permute.xlu1 %731 }
 0x194   : > { %6403 = vst [vmem:[#allocation137_spill] sm:$0xff] %v4467_v45 }
 0x195   : > { %6404 = vst [vmem:[#allocation138_spill] sm:$0xff] %v4469_v59  ;;  %v4471_v62 = vpop.permute.xlu0 %729  ;;  %v801_v59 = vrot.slane %v4231_v5, 2 }
 0x196   : > { %6405 = vst [vmem:[#allocation139_spill] sm:$0xff] %v4471_v62 }
 0x199   : > { %858 = vrot.lane.b32.xlu2 %v4085_v1, %s3569_s10  ;;  %856 = vrot.lane.b32.xlu1 %v4099_v44, %s3569_s10  ;;  %v4492_v1 = vsel %vm472_vm1, %v802_v10, %v4479_v17  ;;  %v4495_v44 = vsel %vm472_vm1, %v801_v59, %v802_v10 }
 0x19b   : > { %854 = vrot.lane.b32.xlu0 %v6407_v52, %s3569_s10  ;;  %v4483_v0 = vpop.permute.xlu2 %757  ;;  %v4485_v45 = vpop.permute.xlu1 %737 }
 0x19c   : > { %6408 = vst [vmem:[#allocation141_spill] sm:$0xff] %v4483_v0 }
 0x19d   : > { %6409 = vst [vmem:[#allocation142_spill] sm:$0xff] %v4485_v45  ;;  %v4488_v62 = vpop.permute.xlu0 %735 }
 0x19e   : > { %6410 = vst [vmem:[#allocation143_spill] sm:$0xff] %v4488_v62 }
 0x1a1   : > { %864 = vrot.lane.b32.xlu2 %v4479_v17, %s3569_s10  ;;  %862 = vrot.lane.b32.xlu1 %v4492_v1, %s3569_s10 }
 0x1a3   : > { %860 = vrot.lane.b32.xlu0 %v4495_v44, %s3569_s10  ;;  %v4503_v0 = vpop.permute.xlu2 %763  ;;  %v4505_v45 = vpop.permute.xlu1 %743 }
 0x1a4   : > { %6411 = vst [vmem:[#allocation144_spill] sm:$0xff] %v4503_v0  ;;  %v4621_v0 = vld [vmem:[%s3642_s30 + $0x110] sm:$0xff] }
 0x1a5   : > { %v4507_v62 = vpop.permute.xlu0 %741 }
 0x1a9   : > { %903 = vrot.lane.b32.xlu2 %v3683_v15, %s3570_s11  ;;  %901 = vrot.lane.b32.xlu1 %v3686_v16, %s3570_s11 }
 0x1ab   : > { %899 = vrot.lane.b32.xlu0 %v3694_v18, %s3570_s11  ;;  %v4515_v59 = vpop.permute.xlu2 %769  ;;  %v4517_v10 = vpop.permute.xlu1 %749 }
 0x1ac   : > { %6412 = vst [vmem:[#allocation145_spill] sm:$0xff] %v4515_v59  ;;  %v4618_v59 = vld [vmem:[%s3642_s30 + $0x118] sm:$0xf] }
 0x1ad   : > { %6413 = vst [vmem:[#allocation146_spill] sm:$0xff] %v4517_v10  ;;  %v4519_v17 = vpop.permute.xlu0 %747 }
 0x1ae   : > { %6414 = vst [vmem:[#allocation147_spill] sm:$0xff] %v4519_v17  ;;  %v6474_v17 = vld [vmem:[#allocation71_spill] sm:$0xff] }
 0x1b1   : > { %909 = vrot.lane.b32.xlu2 %v3707_v23, %s3570_s11  ;;  %907 = vrot.lane.b32.xlu1 %v3710_v24, %s3570_s11 }
 0x1b3   : > { %905 = vrot.lane.b32.xlu0 %v3720_v26, %s3570_s11  ;;  %v4527_v15 = vpop.permute.xlu2 %810  ;;  %v4529_v16 = vpop.permute.xlu1 %755 }
 0x1b4   : > { %6415 = vst [vmem:[#allocation148_spill] sm:$0xff] %v4529_v16  ;;  %v6456_v16 = vld [vmem:[#allocation36_spill] sm:$0xff] }
 0x1b5   : > { %v4531_v18 = vpop.permute.xlu0 %753 }
 0x1b6   : > { %6416 = vst [vmem:[#allocation149_spill] sm:$0xff] %v4531_v18  ;;  %v1085_v18 = vrot.slane %v4621_v0, 2 }
 0x1b9   : > { %915 = vrot.lane.b32.xlu2 %v3734_v31, %s3570_s11  ;;  %913 = vrot.lane.b32.xlu1 %v3737_v32, %s3570_s11 }
 0x1bb   : > { %911 = vrot.lane.b32.xlu0 %v3747_v34, %s3570_s11  ;;  %v4539_v23 = vpop.permute.xlu2 %816  ;;  %v4541_v24 = vpop.permute.xlu1 %761 }
 0x1bc   : > { %6417 = vst [vmem:[#allocation150_spill] sm:$0xff] %v4541_v24 }
 0x1bd   : > { %v4543_v26 = vpop.permute.xlu0 %759 }
 0x1be   : > { %6418 = vst [vmem:[#allocation151_spill] sm:$0xff] %v4543_v26 }
 0x1c1   : > { %921 = vrot.lane.b32.xlu2 %v3761_v39, %s3570_s11  ;;  %919 = vrot.lane.b32.xlu1 %v3764_v40, %s3570_s11 }
 0x1c3   : > { %917 = vrot.lane.b32.xlu0 %v3774_v42, %s3570_s11  ;;  %v4551_v31 = vpop.permute.xlu2 %822  ;;  %v4553_v32 = vpop.permute.xlu1 %767 }
 0x1c4   : > { %6419 = vst [vmem:[#allocation152_spill] sm:$0xff] %v4553_v32  ;;  %v4624_v32 = vld [vmem:[%s3642_s30 + $0x108] sm:$0xff] }
 0x1c5   : > { %v4555_v34 = vpop.permute.xlu0 %765 }
 0x1c6   : > { %6420 = vst [vmem:[#allocation153_spill] sm:$0xff] %v4555_v34 }
 0x1c9   : > { %927 = vrot.lane.b32.xlu2 %v3788_v47, %s3570_s11  ;;  %925 = vrot.lane.b32.xlu1 %v3791_v48, %s3570_s11 }
 0x1cb   : > { %923 = vrot.lane.b32.xlu0 %v3801_v50, %s3570_s11  ;;  %v4563_v39 = vpop.permute.xlu2 %828  ;;  %v4565_v40 = vpop.permute.xlu1 %808 }
 0x1cd   : > { %v4567_v42 = vpop.permute.xlu0 %806 }
 0x1d1   : > { %933 = vrot.lane.b32.xlu2 %v3815_v55, %s3570_s11  ;;  %931 = vrot.lane.b32.xlu1 %v3818_v56, %s3570_s11 }
 0x1d3   : > { %929 = vrot.lane.b32.xlu0 %v3828_v58, %s3570_s11  ;;  %v4575_v47 = vpop.permute.xlu2 %834  ;;  %v4577_v48 = vpop.permute.xlu1 %814 }
 0x1d5   : > { %v4579_v50 = vpop.permute.xlu0 %812 }
 0x1d9   : > { %939 = vrot.lane.b32.xlu2 %v3842_v63, %s3570_s11  ;;  %937 = vrot.lane.b32.xlu1 %v3845_v4, %s3570_s11 }
 0x1db   : > { %935 = vrot.lane.b32.xlu0 %v3855_v9, %s3570_s11  ;;  %v4587_v55 = vpop.permute.xlu2 %840  ;;  %v4589_v56 = vpop.permute.xlu1 %820 }
 0x1dc   : > { %6421 = vst [vmem:[#allocation154_spill] sm:$0xff] %v4587_v55  ;;  %v6471_v55 = vld [vmem:[#allocation70_spill] sm:$0xff] }
 0x1dd   : > { %v4591_v58 = vpop.permute.xlu0 %818 }
 0x1e1   : > { %945 = vrot.lane.b32.xlu2 %v3869_v20, %s3570_s11  ;;  %943 = vrot.lane.b32.xlu1 %v3872_v21, %s3570_s11 }
 0x1e3   : > { %941 = vrot.lane.b32.xlu0 %v3882_v29, %s3570_s11  ;;  %v4599_v63 = vpop.permute.xlu2 %846  ;;  %v4601_v4 = vpop.permute.xlu1 %826 }
 0x1e4   : > { %6422 = vst [vmem:[#allocation155_spill] sm:$0xff] %v4599_v63  ;;  %v6460_v63 = vld [vmem:[#allocation4_spill] sm:$0xff] }
 0x1e5   : > { %v4603_v9 = vpop.permute.xlu0 %824 }
 0x1e9   : > { %951 = vrot.lane.b32.xlu2 %v4225_v12, %s3570_s11  ;;  %949 = vrot.lane.b32.xlu1 %v4228_v53, %s3570_s11 }
 0x1eb   : > { %947 = vrot.lane.b32.xlu0 %v4231_v5, %s3570_s11  ;;  %v4611_v20 = vpop.permute.xlu2 %852  ;;  %v4613_v21 = vpop.permute.xlu1 %832 }
 0x1ec   : > { %6423 = vst [vmem:[#allocation156_spill] sm:$0xff] %v4611_v20  ;;  %v6451_v20 = vld [vmem:[#allocation6_spill] sm:$0xff] }
 0x1ed   : > { %v4615_v29 = vpop.permute.xlu0 %830 }
 0x1f1   : > { %957 = vrot.lane.b32.xlu2 %v4618_v59, %s3570_s11  ;;  %955 = vrot.lane.b32.xlu1 %v4621_v0, %s3570_s11 }
 0x1f3   : > { %953 = vrot.lane.b32.xlu0 %v4624_v32, %s3570_s11  ;;  %v4632_v53 = vpop.permute.xlu2 %858  ;;  %v4634_v5 = vpop.permute.xlu1 %838 }
 0x1f4   : > { %6424 = vst [vmem:[#allocation157_spill] sm:$0xff] %v4632_v53 }
 0x1f5   : > { %6425 = vst [vmem:[#allocation158_spill] sm:$0xff] %v4634_v5  ;;  %v4636_v12 = vpop.permute.xlu0 %836  ;;  %v6475_v5 = vld [vmem:[#allocation129_spill] sm:$0xff] }
 0x1f9   : > { %998 = vrot.lane.b32.xlu2 %v3697_v19, %s3571_s12  ;;  %996 = vrot.lane.b32.xlu1 %v3704_v22, %s3571_s12 }
 0x1fb   : > { %994 = vrot.lane.b32.xlu0 %v3713_v25, %s3571_s12  ;;  %v4644_v34 = vpop.permute.xlu2 %864  ;;  %v4646_v24 = vpop.permute.xlu1 %844 }
 0x1fc   : > { %6426 = vst [vmem:[#allocation159_spill] sm:$0xff] %v4644_v34  ;;  %v6437_v34 = vld [vmem:[#allocation20_spill] sm:$0xff] }
 0x1fd   : > { %6427 = vst [vmem:[#allocation160_spill] sm:$0xff] %v4646_v24  ;;  %v4648_v26 = vpop.permute.xlu0 %842 }
 0x1fe   : > { %6428 = vst [vmem:[#allocation161_spill] sm:$0xff] %v4648_v26  ;;  %v6473_v26 = vld [vmem:[#allocation100_spill] sm:$0xff] }
 0x201   : > { %1004 = vrot.lane.b32.xlu2 %v3723_v27, %s3571_s12  ;;  %1002 = vrot.lane.b32.xlu1 %v3731_v30, %s3571_s12 }
 0x203   : > { %1000 = vrot.lane.b32.xlu0 %v3740_v33, %s3571_s12  ;;  %v4656_v19 = vpop.permute.xlu2 %903  ;;  %v4658_v22 = vpop.permute.xlu1 %850 }
 0x204   : > { %6429 = vst [vmem:[#allocation162_spill] sm:$0xff] %v4658_v22 }
 0x205   : > { %v4660_v25 = vpop.permute.xlu0 %848 }
 0x206   : > { %6430 = vst [vmem:[#allocation163_spill] sm:$0xff] %v4660_v25 }
 0x209   : > { %1010 = vrot.lane.b32.xlu2 %v3750_v35, %s3571_s12  ;;  %1008 = vrot.lane.b32.xlu1 %v3758_v38, %s3571_s12 }
 0x20b   : > { %1006 = vrot.lane.b32.xlu0 %v3767_v41, %s3571_s12  ;;  %v4668_v27 = vpop.permute.xlu2 %909  ;;  %v4670_v30 = vpop.permute.xlu1 %856 }
 0x20c   : > { %6431 = vst [vmem:[#allocation164_spill] sm:$0xff] %v4670_v30 }
 0x20d   : > { %v4672_v33 = vpop.permute.xlu0 %854 }
 0x20e   : > { %6432 = vst [vmem:[#allocation165_spill] sm:$0xff] %v4672_v33  ;;  %v6445_v33 = vld [vmem:[#allocation3_spill] sm:$0xff] }
 0x211   : > { %1016 = vrot.lane.b32.xlu2 %v3777_v43, %s3571_s12  ;;  %1014 = vrot.lane.b32.xlu1 %v3785_v46, %s3571_s12 }
 0x213   : > { %1012 = vrot.lane.b32.xlu0 %v3794_v49, %s3571_s12  ;;  %v4680_v35 = vpop.permute.xlu2 %915  ;;  %v4682_v38 = vpop.permute.xlu1 %862 }
 0x214   : > { %6433 = vst [vmem:[#allocation166_spill] sm:$0xff] %v4682_v38  ;;  %v6440_v38 = vld [vmem:[#allocation34_spill] sm:$0xff] }
 0x215   : > { %v4684_v41 = vpop.permute.xlu0 %860 }
 0x216   : > { %6434 = vst [vmem:[#allocation167_spill] sm:$0xff] %v4684_v41  ;;  %v6441_v41 = vld [vmem:[#allocation24_spill] sm:$0xff] }
 0x219   : > { %1018 = vrot.lane.b32.xlu2 %v3821_v57, %s3571_s12  ;;  %1091 = vrot.lane.b32.xlu1 %v6366_v14, %s3572_s13 }
 0x21b   : > { %1089 = vrot.lane.b32.xlu0 %v6367_v37, %s3572_s13  ;;  %v4692_v43 = vpop.permute.xlu2 %921  ;;  %v4694_v46 = vpop.permute.xlu1 %901 }
 0x21d   : > { %v4696_v49 = vpop.permute.xlu0 %899 }
 0x221   : > { %1095 = vrot.lane.b32.xlu2 %v6373_v7, %s3572_s13  ;;  %1022 = vrot.lane.b32.xlu1 %v3804_v51, %s3571_s12 }
 0x223   : > { %1020 = vrot.lane.b32.xlu0 %v3812_v54, %s3571_s12  ;;  %v4704_v57 = vpop.permute.xlu2 %927  ;;  %v4706_v14 = vpop.permute.xlu1 %907 }
 0x225   : > { %v4708_v37 = vpop.permute.xlu0 %905 }
 0x229   : > { %1024 = vrot.lane.b32.xlu2 %v3848_v6, %s3571_s12  ;;  %1093 = vrot.lane.b32.xlu1 %v6365_v13, %s3572_s13 }
 0x22b   : > { %1097 = vrot.lane.b32.xlu0 %v6372_v60, %s3572_s13  ;;  %v4716_v7 = vpop.permute.xlu2 %933  ;;  %v4718_v51 = vpop.permute.xlu1 %913 }
 0x22c   : > { %6435 = vst [vmem:[#allocation168_spill] sm:$0xff] %v4716_v7 }
 0x22d   : > { %v4720_v54 = vpop.permute.xlu0 %911 }
 0x231   : > { %1099 = vrot.lane.b32.xlu2 %v6371_v8, %s3572_s13  ;;  %1103 = vrot.lane.b32.xlu1 %v6378_v61, %s3572_s13  ;;  %v6438_v8 = vld [vmem:[#allocation29_spill] sm:$0xff] }
 0x233   : > { %1101 = vrot.lane.b32.xlu0 %v6379_v2, %s3572_s13  ;;  %v4728_v6 = vpop.permute.xlu2 %939  ;;  %v4730_v13 = vpop.permute.xlu1 %919 }
 0x234   : > { %6436 = vst [vmem:[#allocation169_spill] sm:$0xff] %v4728_v6  ;;  %v990_v6 = vrot.slane %v4621_v0, 1 }
 0x235   : > { %v4732_v60 = vpop.permute.xlu0 %917 }
 0x239   : > { %1109 = vrot.lane.b32.xlu2 %v6384_v36, %s3572_s13  ;;  %1105 = vrot.lane.b32.xlu1 %v6437_v34, %s3572_s13  ;;  %v6442_v36 = vld [vmem:[#allocation35_spill] sm:$0xff] }
 0x23b   : > { %1107 = vrot.lane.b32.xlu0 %v6438_v8, %s3572_s13  ;;  %v4740_v53 = vpop.permute.xlu2 %945  ;;  %v4742_v61 = vpop.permute.xlu1 %925 }
 0x23c   : > { %6439 = vst [vmem:[#allocation20_spill] sm:$0xff] %v4740_v53  ;;  %v6446_v53 = vld [vmem:[#allocation30_spill] sm:$0xff] }
 0x23d   : > { %v4744_v2 = vpop.permute.xlu0 %923 }
 0x241   : > { %1115 = vrot.lane.b32.xlu2 %v6440_v38, %s3572_s13  ;;  %1111 = vrot.lane.b32.xlu1 %v6441_v41, %s3572_s13 }
 0x243   : > { %1113 = vrot.lane.b32.xlu0 %v6442_v36, %s3572_s13  ;;  %v4752_v30 = vpop.permute.xlu2 %951  ;;  %v4754_v34 = vpop.permute.xlu1 %931 }
 0x244   : > { %6443 = vst [vmem:[#allocation24_spill] sm:$0xff] %v4752_v30  ;;  %v6450_v30 = vld [vmem:[#allocation40_spill] sm:$0xff] }
 0x245   : > { %6444 = vst [vmem:[#allocation170_spill] sm:$0xff] %v4754_v34  ;;  %v4756_v8 = vpop.permute.xlu0 %929 }
 0x249   : > { %1026 = vrot.lane.b32.xlu2 %v6445_v33, %s3571_s12  ;;  %1117 = vrot.lane.b32.xlu1 %v6446_v53, %s3572_s13  ;;  %v6452_v33 = vld [vmem:[#allocation2_spill] sm:$0xff] }
 0x24b   : > { %1119 = vrot.lane.b32.xlu0 %v6397_v28, %s3572_s13  ;;  %v4764_v38 = vpop.permute.xlu2 %957  ;;  %v4766_v41 = vpop.permute.xlu1 %937 }
 0x24c   : > { %6447 = vst [vmem:[#allocation3_spill] sm:$0xff] %v4764_v38  ;;  %v6455_v38 = vld [vmem:[#allocation5_spill] sm:$0xff] }
 0x24d   : > { %6448 = vst [vmem:[#allocation30_spill] sm:$0xff] %v4766_v41  ;;  %v4768_v36 = vpop.permute.xlu0 %935 }
 0x24e   : > { %6449 = vst [vmem:[#allocation171_spill] sm:$0xff] %v4768_v36 }
 0x251   : > { %1121 = vrot.lane.b32.xlu2 %v6450_v30, %s3572_s13  ;;  %1030 = vrot.lane.b32.xlu1 %v6451_v20, %s3571_s12  ;;  %v6237_v30 = vrot.slane %v4618_v59, 1 }
 0x253   : > { %1028 = vrot.lane.b32.xlu0 %v6452_v33, %s3571_s12  ;;  %v4776_v22 = vpop.permute.xlu2 %998  ;;  %v4778_v53 = vpop.permute.xlu1 %943 }
 0x254   : > { %6453 = vst [vmem:[#allocation6_spill] sm:$0xff] %v4778_v53  ;;  %v989_v53 = vrot.slane %v4624_v32, 1 }
 0x255   : > { %v4780_v28 = vpop.permute.xlu0 %941 }
 0x256   : > { %6454 = vst [vmem:[#allocation2_spill] sm:$0xff] %v4780_v28 }
 0x259   : > { %1032 = vrot.lane.b32.xlu2 %v6455_v38, %s3571_s12  ;;  %1123 = vrot.lane.b32.xlu1 %v6456_v16, %s3572_s13  ;;  %v993_v38 = vsel %vm331_vm0, %v990_v6, %v6237_v30  ;;  %v6459_v16 = vld [vmem:[#allocation9_spill] sm:$0xff]  ;;  %v1084_v30 = vrot.slane %v4624_v32, 2 }
 0x25b   : > { %1125 = vrot.lane.b32.xlu0 %v4078_v11, %s3572_s13  ;;  %v4790_v20 = vpop.permute.xlu2 %1004  ;;  %v4792_v33 = vpop.permute.xlu1 %949  ;;  %v991_v11 = vsel %vm331_vm0, %v989_v53, %v990_v6  ;;  %v1086_v6 = vsel %vm472_vm1, %v1084_v30, %v1085_v18  ;;  %v6464_v53 = vld [vmem:[#allocation42_spill] sm:$0xff] }
 0x25c   : > { %6457 = vst [vmem:[#allocation5_spill] sm:$0xff] %v4792_v33 }
 0x25d   : > { %v4795_v28 = vpop.permute.xlu0 %947 }
 0x25e   : > { %6458 = vst [vmem:[#allocation36_spill] sm:$0xff] %v4795_v28  ;;  %v6240_v28 = vrot.slane %v4618_v59, 2 }
 0x261   : > { %1036 = vrot.lane.b32.xlu2 %v6459_v16, %s3571_s12  ;;  %1034 = vrot.lane.b32.xlu1 %v6460_v63, %s3571_s12  ;;  %v6463_v16 = vld [vmem:[#allocation8_spill] sm:$0xff]  ;;  %v1088_v63 = vsel %vm472_vm1, %v1085_v18, %v6240_v28 }
 0x262   : > { %v6467_v18 = vld [vmem:[#allocation52_spill] sm:$0xff] }
 0x263   : > { %1127 = vrot.lane.b32.xlu0 %v6402_v3, %s3572_s13  ;;  %v4807_v33 = vpop.permute.xlu1 %955  ;;  %v4809_v25 = vpop.permute.xlu2 %1010 }
 0x264   : > { %6461 = vst [vmem:[#allocation9_spill] sm:$0xff] %v4807_v33  ;;  %v6466_v33 = vld [vmem:[#allocation7_spill] sm:$0xff] }
 0x265   : > { %v4814_v41 = vpop.permute.xlu0 %953 }
 0x266   : > { %6462 = vst [vmem:[#allocation4_spill] sm:$0xff] %v4814_v41 }
 0x269   : > { %1038 = vrot.lane.b32.xlu2 %v6463_v16, %s3571_s12  ;;  %1131 = vrot.lane.b32.xlu1 %v6407_v52, %s3572_s13  ;;  %v1676_v16 = vld [vmem:[%s6164_s1 + $0x10] sm:$0x3]  ;;  %v6465_v52 = vld [vmem:[#allocation48_spill] sm:$0xff] }
 0x26a   : > { %v1690_v28 = vunpack.c.l.b16 %v1676_v16 }
 0x26b   : > { %1129 = vrot.lane.b32.xlu0 %v6464_v53, %s3572_s13  ;;  %v997_v0 = vpop.permute.xlu1 %996  ;;  %v4828_v32 = vpop.permute.xlu2 %1016 }
 0x26c   : > { %v1693_v53 = vpack.c.b16 %v1690_v28, %v1690_v28  ;;  %v6469_v28 = vld [vmem:[#allocation116_spill] sm:$0xff] }
 0x26d   : > { %v4826_v3 = vpop.permute.xlu0 %994 }
 0x26e   : > { %v1735_v24 = vsel %vm1733_vm2, %v1693_v53, 0 }
 0x26f   : > { %1742 = vmatpush.bf16.msra.mxu0 %v1735_v24  ;;  %3115 = vmatpush.bf16.msra.mxu2 %v1735_v24 }
 0x270   : > { %3116 = vmatpush.bf16.msra.mxu3 %v1735_v24  ;;  %v3111_v24 = vld [vmem:[%s6164_s1] sm:$0xff] }
 0x271   : > { %1135 = vrot.lane.b32.xlu2 %v6465_v52, %s3572_s13  ;;  %1040 = vrot.lane.b32.xlu1 %v6466_v33, %s3571_s12  ;;  %v3112_v52 = vld [vmem:[%s6164_s1 + $0x8] sm:$0xff]  ;;  %v6468_v33 = vld [vmem:[#allocation115_spill] sm:$0xff] }
 0x273   : > { %1133 = vrot.lane.b32.xlu0 %v6467_v18, %s3572_s13  ;;  %v4839_v30 = vpop.permute.xlu1 %1002  ;;  %v4844_v10 = vpop.permute.xlu2 %1018  ;;  %1743 = vmatpush.bf16.msra.mxu0 %v3112_v52 }
 0x274   : > { %3117 = vmatpush.bf16.msra.mxu2 %v3112_v52  ;;  %3118 = vmatpush.bf16.msra.mxu3 %v3112_v52  ;;  %v3495_v52 = vld [vmem:[%s3642_s30 + $0x8] sm:$0xff] }
 0x275   : > { %v4841_v41 = vpop.permute.xlu0 %1000 }
 0x277   : > { %1744 = vmatpush.bf16.msra.mxu0 %v3111_v24 }
 0x278   : > { %3119 = vmatpush.bf16.msra.mxu2 %v3111_v24  ;;  %3120 = vmatpush.bf16.msra.mxu3 %v3111_v24 }
 0x279   : > { %1137 = vrot.lane.b32.xlu2 %v4495_v44, %s3572_s13  ;;  %1044 = vrot.lane.b32.xlu1 %v6468_v33, %s3571_s12 }
 0x27b   : > { %1042 = vrot.lane.b32.xlu0 %v6469_v28, %s3571_s12  ;;  %v4855_v16 = vpop.permute.xlu1 %1008  ;;  %v1096_v44 = vpop.permute.xlu2 %1095  ;;  %v6470_v28 = vld [vmem:[#allocation33_spill] sm:$0xff] }
 0x27c   : > { %v1181_v18 = vsel %vm1179_vm3, %v3495_v52, %v6470_v28  ;;  %v6476_v28 = vld [vmem:[#allocation101_spill] sm:$0xff] }
 0x27d   : > { %v4860_v53 = vpop.permute.xlu0 %1006  ;;  %v1212_v24 = vsel %vm1210_vm4, %v1181_v18, %v6471_v55 }
 0x281   : > { %1050 = vrot.lane.b32.xlu2 %v993_v38, %s3571_s12  ;;  %1048 = vrot.lane.b32.xlu1 %v991_v11, %s3571_s12  ;;  %v3496_v38 = vld [vmem:[%s3642_s30] sm:$0xff]  ;;  %v6472_v11 = vld [vmem:[#allocation27_spill] sm:$0xff] }
 0x282   : > { %v1180_v36 = vsel %vm1179_vm3, %v3496_v38, %v6472_v11  ;;  %v6477_v38 = vld [vmem:[#allocation111_spill] sm:$0xff]  ;;  %v6479_v11 = vld [vmem:[#allocation32_spill] sm:$0xff] }
 0x283   : > { %1139 = vrot.lane.b32.xlu0 %v4492_v1, %s3572_s13  ;;  %v4866_v33 = vpop.permute.xlu1 %1014  ;;  %v1243_v1 = vsel %vm1241_vm5, %v1212_v24, %v6473_v26  ;;  %v1211_v34 = vsel %vm1210_vm4, %v1180_v36, %v6474_v17  ;;  %v6478_v26 = vld [vmem:[#allocation130_spill] sm:$0xff]  ;;  %v3497_v24 = vld [vmem:[%s3642_s30 + $0x18] sm:$0xff] }
 0x284   : > { %v1274_v52 = vsel %vm1272_vm6, %v1243_v1, %v6475_v5  ;;  %v1242_v55 = vsel %vm1241_vm5, %v1211_v34, %v6476_v28 }
 0x285   : > { %v4871_v7 = vpop.permute.xlu0 %1012  ;;  %v1305_v18 = vsel %vm1303_vm7, %v1274_v52, %v4565_v40  ;;  %v1273_v17 = vsel %vm1272_vm6, %v1242_v55, %v6478_v26  ;;  %v4904_v52 = vpop.permute.xlu2 %1024 }
 0x286   : > { %v1336_v36 = vsel %vm1334_vm8, %v1305_v18, %v4694_v46  ;;  %v1304_v5 = vsel %vm1303_vm7, %v1273_v17, %v4567_v42  ;;  %v6480_v18 = vld [vmem:[#allocation74_spill] sm:$0xff]  ;;  %v6481_v17 = vld [vmem:[#allocation104_spill] sm:$0xff] }
 0x287   : > { %v1367_v34 = vsel %vm1365_vm9, %v1336_v36, %v997_v0  ;;  %v1335_v1 = vsel %vm1334_vm8, %v1304_v5, %v4696_v49  ;;  %v6482_v5 = vld [vmem:[#allocation133_spill] sm:$0xff] }
 0x288   : > { %v1366_v42 = vsel %vm1365_vm9, %v1335_v1, %v4826_v3 }
 0x289   : > { %1046 = vrot.lane.b32.xlu2 %v6477_v38, %s3571_s12  ;;  %1145 = vrot.lane.b32.xlu1 %v1088_v63, %s3572_s13  ;;  %v1183_v63 = vsel %vm1179_vm3, %v3497_v24, %v6479_v11  ;;  %v6483_v11 = vrot.slane %v4618_v59, 1 }
 0x28a   : > { %v1214_v38 = vsel %vm1210_vm4, %v1183_v63, %v6480_v18  ;;  %v6484_v63 = vrot.slane %v4618_v59, 2  ;;  %v3498_v59 = vld [vmem:[%s3642_s30 + $0x10] sm:$0xf]  ;;  %v3499_v18 = vld [vmem:[%s3642_s30 + $0x20] sm:$0xff] }
 0x28b   : > { %1143 = vrot.lane.b32.xlu0 %v1086_v6, %s3572_s13  ;;  %v1092_v40 = vpop.permute.xlu1 %1091  ;;  %v1245_v49 = vsel %vm1241_vm5, %v1214_v38, %v6481_v17 }
 0x28c   : > { %v1398_v46 = vsel %vm1396_vm10, %v1367_v34, %v1092_v40  ;;  %v1276_v34 = vsel %vm1272_vm6, %v1245_v49, %v6482_v5  ;;  %v6490_v5 = vld [vmem:[#allocation90_spill] sm:$0xff] }
 0x28d   : > { %v1460_v28 = vrot.slane %v1398_v46, 2  ;;  %v1461_v0 = vrot.slane %v1398_v46, 4  ;;  %v1462_v55 = vrot.slane %v1398_v46, 6  ;;  %1525 = vst [vmem:[#allocation1 + $0x20] ss:$4 sm:$0xff] %v1398_v46  ;;  %v1090_v6 = vpop.permute.xlu0 %1089  ;;  %v1307_v40 = vsel %vm1303_vm7, %v1276_v34, %v4579_v50  ;;  %v6485_v50 = vld [vmem:[#allocation140_spill] sm:$0xff] }
 0x28e   : > { %v1397_v26 = vsel %vm1396_vm10, %v1366_v42, %v1090_v6  ;;  %v1338_v1 = vsel %vm1334_vm8, %v1307_v40, %v4708_v37  ;;  %v4938_v6 = vpop.permute.xlu2 %1099  ;;  %v6491_v40 = vld [vmem:[#allocation103_spill] sm:$0xff] }
 0x28f   : > { %1527 = vst [vmem:[#allocation1 + $0x21] ss:$4 sm:$0xff] %v1460_v28  ;;  %v1457_v36 = vrot.slane %v1397_v26, 2  ;;  %v1458_v3 = vrot.slane %v1397_v26, 4  ;;  %v1459_v24 = vrot.slane %v1397_v26, 6  ;;  %v1369_v46 = vsel %vm1365_vm9, %v1338_v1, %v4841_v41  ;;  %v6487_v41 = vld [vmem:[#allocation17_spill] sm:$0xff] }
 0x290   : > { %1529 = vst [vmem:[#allocation1 + $0x22] ss:$4 sm:$0xff] %v1461_v0  ;;  %v1400_v28 = vsel %vm1396_vm10, %v1369_v46, %v1096_v44  ;;  %v1184_v38 = vsel %vm1179_vm3, %v3499_v18, %v6487_v41  ;;  %v6493_v1 = vld [vmem:[#allocation132_spill] sm:$0xff] }
 0x291   : > { %1531 = vst [vmem:[#allocation1 + $0x23] ss:$4 sm:$0xff] %v1462_v55  ;;  %1052 = vrot.lane.b32.xlu1 %v6483_v11, %s3571_s12  ;;  %1147 = vrot.lane.b32.xlu2 %v6484_v63, %s3572_s13  ;;  %v6486_v55 = vld [vmem:[#allocation26_spill] sm:$0xff]  ;;  %v1465_v49 = vrot.slane %v1400_v28, 6  ;;  %v6492_v11 = vld [vmem:[#allocation12_spill] sm:$0xff] }
 0x292   : > { %1517 = vst [vmem:[#allocation1] ss:$4 sm:$0xff] %v1397_v26  ;;  %v1182_v37 = vsel %vm1179_vm3, %v3498_v59, %v6486_v55  ;;  %v6488_v26 = vld [vmem:[#allocation60_spill] sm:$0xff] }
 0x293   : > { %1519 = vst [vmem:[#allocation1 + $0x1] ss:$4 sm:$0xff] %v1457_v36  ;;  %1141 = vrot.lane.b32.xlu0 %v6485_v50, %s3572_s13  ;;  %v4930_v42 = vpop.permute.xlu1 %1022  ;;  %v1213_v17 = vsel %vm1210_vm4, %v1182_v37, %v6488_v26  ;;  %v6489_v36 = vld [vmem:[#allocation73_spill] sm:$0xff] }
 0x294   : > { %1521 = vst [vmem:[#allocation1 + $0x2] ss:$4 sm:$0xff] %v1458_v3  ;;  %v1215_v44 = vsel %vm1210_vm4, %v1184_v38, %v6489_v36  ;;  %v1244_v34 = vsel %vm1241_vm5, %v1213_v17, %v6490_v5  ;;  %v1463_v38 = vrot.slane %v1400_v28, 2  ;;  %v1464_v17 = vrot.slane %v1400_v28, 4  ;;  %v3500_v36 = vld [vmem:[%s3642_s30 + $0x38] sm:$0xff]  ;;  %v3501_v5 = vld [vmem:[%s3642_s30 + $0x30] sm:$0xff] }
 0x295   : > { %1523 = vst [vmem:[#allocation1 + $0x3] ss:$4 sm:$0xff] %v1459_v24  ;;  %v4933_v0 = vpop.permute.xlu0 %1020  ;;  %v1246_v24 = vsel %vm1241_vm5, %v1215_v44, %v6491_v40  ;;  %v1275_v63 = vsel %vm1272_vm6, %v1244_v34, %v6492_v11  ;;  %v6494_v44 = vld [vmem:[#allocation38_spill] sm:$0xff]  ;;  %v6495_v34 = vld [vmem:[#allocation39_spill] sm:$0xff] }
 0x296   : > { %v1277_v46 = vsel %vm1272_vm6, %v1246_v24, %v6493_v1  ;;  %v1306_v50 = vsel %vm1303_vm7, %v1275_v63, %v4527_v15  ;;  %v1186_v40 = vsel %vm1179_vm3, %v3501_v5, %v6495_v34  ;;  %v6496_v24 = vld [vmem:[#allocation76_spill] sm:$0xff]  ;;  %v3502_v11 = vld [vmem:[%s3642_s30 + $0x28] sm:$0xf]  ;;  %v6497_v63 = vld [vmem:[#allocation13_spill] sm:$0xff] }
 0x297   : > { %v1308_v59 = vsel %vm1303_vm7, %v1277_v46, %v4577_v48  ;;  %v1337_v55 = vsel %vm1334_vm8, %v1306_v50, %v4656_v19  ;;  %v1185_v1 = vsel %vm1179_vm3, %v3502_v11, %v6497_v63  ;;  %v6498_v46 = vld [vmem:[#allocation77_spill] sm:$0xff] }
 0x298   : > { %v1533_v3 = vld.sshfl [vmem:[#allocation1 + $0x20] sm:$0xff pattern:$0x73625140]  ;;  %v1339_v18 = vsel %vm1334_vm8, %v1308_v59, %v4706_v14  ;;  %v1368_v41 = vsel %vm1365_vm9, %v1337_v55, %v4776_v22  ;;  %v1187_v14 = vsel %vm1179_vm3, %v3500_v36, %v6494_v44  ;;  %v1217_v50 = vsel %vm1210_vm4, %v1186_v40, %v6498_v46  ;;  %v6499_v59 = vld [vmem:[#allocation106_spill] sm:$0xff]  ;;  %v6504_v36 = vld [vmem:[#allocation136_spill] sm:$0xff] }
 0x299   : > { %1538 = vst [vmem:[#allocation1 + $0x20] ss:$4 sm:$0xff] %v1465_v49  ;;  %v1370_v15 = vsel %vm1365_vm9, %v1339_v18, %v4839_v30  ;;  %v1218_v30 = vsel %vm1210_vm4, %v1187_v14, %v6496_v24  ;;  %v6500_v18 = vld [vmem:[#allocation63_spill] sm:$0xff] }
 0x29a   : > { %v1249_v55 = vsel %vm1241_vm5, %v1218_v30, %v6499_v59 }
 0x29b   : > { %v1094_v37 = vpop.permute.xlu1 %1093 }
 0x29c   : > { %v1532_v26 = vld.sshfl [vmem:[#allocation1] sm:$0xff pattern:$0x73625140]  ;;  %v1399_v19 = vsel %vm1396_vm10, %v1368_v41, %v1094_v37  ;;  %v4985_v37 = vpop.permute.xlu2 %1109  ;;  %v1216_v41 = vsel %vm1210_vm4, %v1185_v1, %v6500_v18 }
 0x29d   : > { %1535 = vst [vmem:[#allocation1 + $0x1] ss:$4 sm:$0xff] %v1400_v28  ;;  %v1660_v48 = vpack.c.bf16 %v1533_v3, %v1532_v26  ;;  %v1098_v49 = vpop.permute.xlu0 %1097 }
 0x29e   : > { %1536 = vst [vmem:[#allocation1 + $0x2] ss:$4 sm:$0xff] %v1463_v38  ;;  %v1401_v22 = vsel %vm1396_vm10, %v1370_v15, %v1098_v49  ;;  %v6501_v38 = vld [vmem:[#allocation107_spill] sm:$0xff] }
 0x29f   : > { %1537 = vst [vmem:[#allocation1 + $0x3] ss:$4 sm:$0xff] %v1464_v17  ;;  %3081 = vmatmul.msk.bf16.vlgmr.msra.gmra.mxu0 %vm6241_vm11, %v1660_v48  ;;  %v1466_v28 = vrot.slane %v1401_v22, 2  ;;  %v1467_v3 = vrot.slane %v1401_v22, 4  ;;  %v1248_v26 = vsel %vm1241_vm5, %v1217_v50, %v6501_v38  ;;  %v6502_v15 = vld [vmem:[#allocation135_spill] sm:$0xff]  ;;  %v6503_v48 = vld [vmem:[#allocation93_spill] sm:$0xff] }
 0x2a0   : > { %1534 = vst [vmem:[#allocation1] ss:$4 sm:$0xff] %v1399_v19  ;;  %v1280_v17 = vsel %vm1272_vm6, %v1249_v55, %v6502_v15  ;;  %v1247_v49 = vsel %vm1241_vm5, %v1216_v41, %v6503_v48  ;;  %v1279_v44 = vsel %vm1272_vm6, %v1248_v26, %v6504_v36  ;;  %v6505_v19 = vld [vmem:[#allocation16_spill] sm:$0xff]  ;;  %v3503_v41 = vld [vmem:[%s3642_s30 + $0x48] sm:$0xff]  ;;  %v6506_v38 = vld [vmem:[#allocation45_spill] sm:$0xff] }
 0x2a1   : > { %1539 = vst [vmem:[#allocation1 + $0x21] ss:$4 sm:$0xff] %v1401_v22  ;;  %v1311_v14 = vsel %vm1303_vm7, %v1280_v17, %v4589_v56  ;;  %v1278_v5 = vsel %vm1272_vm6, %v1247_v49, %v6505_v19  ;;  %v1310_v34 = vsel %vm1303_vm7, %v1279_v44, %v4591_v58  ;;  %v6508_v17 = vld [vmem:[#allocation110_spill] sm:$0xff]  ;;  %v3504_v49 = vld [vmem:[%s3642_s30 + $0x50] sm:$0xff]  ;;  %v6509_v36 = vld [vmem:[#allocation44_spill] sm:$0xff] }
 0x2a2   : > { %1541 = vst [vmem:[#allocation1 + $0x23] ss:$4 sm:$0xff] %v1467_v3  ;;  %v1342_v40 = vsel %vm1334_vm8, %v1311_v14, %v4718_v51  ;;  %v1309_v30 = vsel %vm1303_vm7, %v1278_v5, %v4539_v23  ;;  %v1341_v11 = vsel %vm1334_vm8, %v1310_v34, %v4720_v54  ;;  %v1190_v44 = vsel %vm1179_vm3, %v3504_v49, %v6509_v36  ;;  %v6510_v14 = vld [vmem:[#allocation139_spill] sm:$0xff]  ;;  %v3505_v5 = vld [vmem:[%s3642_s30 + $0x40] sm:$0xf] }
 0x2a3   : > { %1540 = vst [vmem:[#allocation1 + $0x22] ss:$4 sm:$0xff] %v1466_v28  ;;  %v1104_v24 = vpop.permute.xlu1 %1103  ;;  %v1373_v56 = vsel %vm1365_vm9, %v1342_v40, %v4855_v16  ;;  %v1340_v3 = vsel %vm1334_vm8, %v1309_v30, %v4668_v27  ;;  %v1372_v58 = vsel %vm1365_vm9, %v1341_v11, %v4860_v53  ;;  %v1468_v16 = vrot.slane %v1401_v22, 6  ;;  %v6507_v22 = vld [vmem:[#allocation80_spill] sm:$0xff]  ;;  %v6511_v34 = vld [vmem:[#allocation21_spill] sm:$0xff]  ;;  %v6518_v49 = vld [vmem:[#allocation51_spill] sm:$0xff] }
 0x2a4   : > { %v1404_v63 = vsel %vm1396_vm10, %v1373_v56, %v1104_v24  ;;  %v1371_v28 = vsel %vm1365_vm9, %v1340_v3, %v4790_v20  ;;  %v5021_v50 = vpop.permute.xlu2 %1115  ;;  %v1188_v40 = vsel %vm1179_vm3, %v3505_v5, %v6511_v34  ;;  %v6512_v24 = vld [vmem:[#allocation79_spill] sm:$0xff]  ;;  %v6513_v56 = vld [vmem:[#allocation66_spill] sm:$0xff]  ;;  %v3507_v34 = vld [vmem:[%s3642_s30 + $0x58] sm:$0xf] }
 0x2a5   : > { %v1102_v51 = vpop.permute.xlu0 %1101  ;;  %v1402_v54 = vsel %vm1396_vm10, %v1371_v28, %v4938_v6  ;;  %v1472_v46 = vrot.slane %v1404_v63, 2  ;;  %v1189_v6 = vsel %vm1179_vm3, %v3503_v41, %v6506_v38  ;;  %v1221_v30 = vsel %vm1210_vm4, %v1190_v44, %v6512_v24  ;;  %v6519_v44 = vld [vmem:[#allocation83_spill] sm:$0xff] }
 0x2a6   : > { %v1403_v23 = vsel %vm1396_vm10, %v1372_v58, %v1102_v51  ;;  %v1220_v26 = vsel %vm1210_vm4, %v1189_v6, %v6507_v22  ;;  %v1219_v3 = vsel %vm1210_vm4, %v1188_v40, %v6513_v56  ;;  %v6514_v58 = vld [vmem:[#allocation109_spill] sm:$0xff] }
 0x2a7   : > { %v1542_v1 = vld.sshfl [vmem:[#allocation1] sm:$0xff pattern:$0x73625140]  ;;  %v1469_v27 = vrot.slane %v1403_v23, 2  ;;  %v1470_v59 = vrot.slane %v1403_v23, 4  ;;  %v1471_v20 = vrot.slane %v1403_v23, 6  ;;  %v1251_v48 = vsel %vm1241_vm5, %v1220_v26, %v6508_v17 }
 0x2a8   : > { %1545 = vst [vmem:[#allocation1 + $0x1] ss:$4 sm:$0xff] %v1402_v54  ;;  %v1282_v19 = vsel %vm1272_vm6, %v1251_v48, %v6510_v14  ;;  %v1252_v51 = vsel %vm1241_vm5, %v1221_v30, %v6514_v58  ;;  %v6520_v14 = vld [vmem:[#allocation114_spill] sm:$0xff]  ;;  %v6522_v40 = vld [vmem:[#allocation25_spill] sm:$0xff] }
 0x2a9   : > { %1544 = vst [vmem:[#allocation1] ss:$4 sm:$0xff] %v1468_v16  ;;  %v1313_v11 = vsel %vm1303_vm7, %v1282_v19, %v4603_v9  ;;  %v6521_v19 = vld [vmem:[#allocation143_spill] sm:$0xff]  ;;  %v1191_v24 = vsel %vm1179_vm3, %v3507_v34, %v6522_v40 }
 0x2aa   : > { %v1543_v53 = vld.sshfl [vmem:[#allocation1 + $0x20] sm:$0xff pattern:$0x73625140]  ;;  %1546 = vst [vmem:[#allocation1 + $0x2] ss:$4 sm:$0xff] %v1403_v23  ;;  %v1344_v28 = vsel %vm1334_vm8, %v1313_v11, %v4732_v60  ;;  %v6515_v23 = vld [vmem:[#allocation96_spill] sm:$0xff] }
 0x2ab   : > { %1550 = vst [vmem:[#allocation1 + $0x22] ss:$4 sm:$0xff] %v1404_v63  ;;  %v1661_v55 = vpack.c.bf16 %v1543_v53, %v1542_v1  ;;  %v1106_v18 = vpop.permute.xlu1 %1105  ;;  %v1250_v54 = vsel %vm1241_vm5, %v1219_v3, %v6515_v23  ;;  %v6516_v1 = vld [vmem:[#allocation138_spill] sm:$0xff]  ;;  %v6523_v11 = vld [vmem:[#allocation69_spill] sm:$0xff]  ;;  %v3510_v34 = vld [vmem:[%s3642_s30 + $0x70] sm:$0xf] }
 0x2ac   : > { %1551 = vst [vmem:[#allocation1 + $0x23] ss:$4 sm:$0xff] %v1472_v46  ;;  %v1283_v16 = vsel %vm1272_vm6, %v1252_v51, %v6516_v1  ;;  %v1375_v46 = vsel %vm1365_vm9, %v1344_v28, %v4871_v7  ;;  %v5064_v38 = vpop.permute.xlu2 %1026  ;;  %v1474_v7 = vrot.slane %v1404_v63, 6  ;;  %v1222_v56 = vsel %vm1210_vm4, %v1191_v24, %v6523_v11  ;;  %v6524_v28 = vld [vmem:[#allocation99_spill] sm:$0xff] }
 0x2ad   : > { %1547 = vst [vmem:[#allocation1 + $0x3] ss:$4 sm:$0xff] %v1469_v27  ;;  %v1108_v15 = vpop.permute.xlu0 %1107  ;;  %v6517_v27 = vld [vmem:[#allocation125_spill] sm:$0xff]  ;;  %v1314_v53 = vsel %vm1303_vm7, %v1283_v16, %v4601_v4  ;;  %v1253_v23 = vsel %vm1241_vm5, %v1222_v56, %v6524_v28  ;;  %v6525_v16 = vld [vmem:[#allocation128_spill] sm:$0xff]  ;;  %v6535_v56 = vld [vmem:[#allocation102_spill] sm:$0xff] }
 0x2ae   : > { %1548 = vst [vmem:[#allocation1 + $0x20] ss:$4 sm:$0xff] %v1470_v59  ;;  %v1281_v9 = vsel %vm1272_vm6, %v1250_v54, %v6517_v27  ;;  %v1473_v59 = vrot.slane %v1404_v63, 4  ;;  %v1345_v41 = vsel %vm1334_vm8, %v1314_v53, %v4730_v13  ;;  %v3511_v28 = vld [vmem:[%s3642_s30 + $0x80] sm:$0xff] }
 0x2af   : > { %1549 = vst [vmem:[#allocation1 + $0x21] ss:$4 sm:$0xff] %v1471_v20  ;;  %3082 = vmatmul.msk.bf16.gmra.mxu0 %vm6241_vm11, %v1661_v55  ;;  %v1406_v20 = vsel %vm1396_vm10, %v1375_v46, %v1108_v15  ;;  %v1312_v60 = vsel %vm1303_vm7, %v1281_v9, %v4551_v31  ;;  %v1376_v4 = vsel %vm1365_vm9, %v1345_v41, %v4866_v33 }
 0x2b0   : > { %v1343_v22 = vsel %vm1334_vm8, %v1312_v60, %v4680_v35  ;;  %v1407_v31 = vsel %vm1396_vm10, %v1376_v4, %v4985_v37  ;;  %v1475_v17 = vrot.slane %v1406_v20, 2  ;;  %v1476_v48 = vrot.slane %v1406_v20, 4  ;;  %v3506_v35 = vld [vmem:[%s3642_s30 + $0x60] sm:$0xff] }
 0x2b1   : > { %v1374_v15 = vsel %vm1365_vm9, %v1343_v22, %v4809_v25  ;;  %v1192_v33 = vsel %vm1179_vm3, %v3506_v35, %v6518_v49  ;;  %v1477_v36 = vrot.slane %v1406_v20, 6  ;;  %v1478_v46 = vrot.slane %v1407_v31, 2  ;;  %v6528_v4 = vld [vmem:[#allocation113_spill] sm:$0xff]  ;;  %v6530_v35 = vld [vmem:[#allocation142_spill] sm:$0xff] }
 0x2b2   : > { %v1405_v63 = vsel %vm1396_vm10, %v1374_v15, %v1106_v18  ;;  %v1223_v25 = vsel %vm1210_vm4, %v1192_v33, %v6519_v44  ;;  %v1479_v9 = vrot.slane %v1407_v31, 4  ;;  %v1480_v41 = vrot.slane %v1407_v31, 6  ;;  %v6531_v33 = vld [vmem:[#allocation86_spill] sm:$0xff] }
 0x2b3   : > { %v1112_v55 = vpop.permute.xlu1 %1111  ;;  %v1254_v37 = vsel %vm1241_vm5, %v1223_v25, %v6520_v14  ;;  %v6532_v25 = vld [vmem:[#allocation119_spill] sm:$0xff] }
 0x2b4   : > { %v1552_v6 = vld.sshfl [vmem:[#allocation1] sm:$0xff pattern:$0x73625140]  ;;  %v1285_v5 = vsel %vm1272_vm6, %v1254_v37, %v6521_v19  ;;  %v5099_v1 = vpop.permute.xlu2 %1121 }
 0x2b5   : > { %1554 = vst [vmem:[#allocation1] ss:$4 sm:$0xff] %v1473_v59  ;;  %v1114_v26 = vpop.permute.xlu0 %1113  ;;  %v1316_v30 = vsel %vm1303_vm7, %v1285_v5, %v4615_v29  ;;  %v1284_v29 = vsel %vm1272_vm6, %v1253_v23, %v6525_v16  ;;  %v3508_v59 = vld [vmem:[%s3642_s30 + $0x68] sm:$0xff] }
 0x2b6   : > { %v1553_v13 = vld.sshfl [vmem:[#allocation1 + $0x20] sm:$0xff pattern:$0x73625140]  ;;  %1555 = vst [vmem:[#allocation1 + $0x1] ss:$4 sm:$0xff] %v1474_v7  ;;  %v1347_v3 = vsel %vm1334_vm8, %v1316_v30, %v4744_v2  ;;  %v1315_v2 = vsel %vm1303_vm7, %v1284_v29, %v4563_v39  ;;  %v6527_v7 = vld [vmem:[#allocation82_spill] sm:$0xff] }
 0x2b7   : > { %1561 = vst [vmem:[#allocation1 + $0x23] ss:$4 sm:$0xff] %v1407_v31  ;;  %v1662_v58 = vpack.c.bf16 %v1553_v13, %v1552_v6  ;;  %v1378_v54 = vsel %vm1365_vm9, %v1347_v3, %v4844_v10  ;;  %v1346_v60 = vsel %vm1334_vm8, %v1315_v2, %v4692_v43  ;;  %v3509_v43 = vld [vmem:[%s3642_s30 + $0x78] sm:$0xff] }
 0x2b8   : > { %1556 = vst [vmem:[#allocation1 + $0x2] ss:$4 sm:$0xff] %v1405_v63  ;;  %v1409_v27 = vsel %vm1396_vm10, %v1378_v54, %v1114_v26  ;;  %v1377_v22 = vsel %vm1365_vm9, %v1346_v60, %v4828_v32  ;;  %v6529_v31 = vld [vmem:[#allocation56_spill] sm:$0xff] }
 0x2b9   : > { %1557 = vst [vmem:[#allocation1 + $0x3] ss:$4 sm:$0xff] %v1406_v20  ;;  %v6526_v20 = vld [vmem:[#allocation50_spill] sm:$0xff]  ;;  %v1481_v39 = vrot.slane %v1409_v27, 2  ;;  %v1408_v13 = vsel %vm1396_vm10, %v1377_v22, %v1112_v55  ;;  %v1483_v49 = vrot.slane %v1409_v27, 6 }
 0x2ba   : > { %1558 = vst [vmem:[#allocation1 + $0x20] ss:$4 sm:$0xff] %v1475_v17  ;;  %v1193_v10 = vsel %vm1179_vm3, %v3508_v59, %v6526_v20  ;;  %v1482_v17 = vrot.slane %v1409_v27, 4  ;;  %v6539_v59 = vld [vmem:[#allocation118_spill] sm:$0xff] }
 0x2bb   : > { %1559 = vst [vmem:[#allocation1 + $0x21] ss:$4 sm:$0xff] %v1476_v48  ;;  %v5084_v18 = vpop.permute.xlu1 %1117  ;;  %v1224_v6 = vsel %vm1210_vm4, %v1193_v10, %v6527_v7  ;;  %v1195_v48 = vsel %vm1179_vm3, %v3509_v43, %v6529_v31  ;;  %v6540_v22 = vld [vmem:[#allocation158_spill] sm:$0xff] }
 0x2bc   : > { %1560 = vst [vmem:[#allocation1 + $0x22] ss:$4 sm:$0xff] %v1477_v36  ;;  %v1255_v26 = vsel %vm1241_vm5, %v1224_v6, %v6528_v4  ;;  %v1226_v36 = vsel %vm1210_vm4, %v1195_v48, %v6531_v33  ;;  %v5149_v11 = vpop.permute.xlu2 %1032  ;;  %v6544_v48 = vld [vmem:[#allocation37_spill] sm:$0xff] }
 0x2bd   : > { %v1120_v51 = vpop.permute.xlu0 %1119  ;;  %v1286_v32 = vsel %vm1272_vm6, %v1255_v26, %v6530_v35  ;;  %v1257_v14 = vsel %vm1241_vm5, %v1226_v36, %v6532_v25  ;;  %v6541_v26 = vld [vmem:[#allocation59_spill] sm:$0xff] }
 0x2be   : > { %v1317_v44 = vsel %vm1303_vm7, %v1286_v32, %v4613_v21  ;;  %v1288_v19 = vsel %vm1272_vm6, %v1257_v14, %v4507_v62  ;;  %v6533_v21 = vld [vmem:[#allocation31_spill] sm:$0xff]  ;;  %v6545_v32 = vld [vmem:[#allocation120_spill] sm:$0xff] }
 0x2bf   : > { %3083 = vmatmul.msk.bf16.gmra.mxu0 %vm6241_vm11, %v1662_v58  ;;  %v1348_v37 = vsel %vm1334_vm8, %v1317_v44, %v4742_v61  ;;  %v1194_v40 = vsel %vm1179_vm3, %v3510_v34, %v6533_v21  ;;  %v1319_v24 = vsel %vm1303_vm7, %v1288_v19, %v4636_v12  ;;  %v6534_v61 = vld [vmem:[#allocation72_spill] sm:$0xff]  ;;  %v6536_v12 = vld [vmem:[#allocation55_spill] sm:$0xff]  ;;  %v6548_v19 = vld [vmem:[#allocation105_spill] sm:$0xff] }
 0x2c0   : > { %v5107_v53 = vld.sshfl [vmem:[#allocation1] sm:$0xff pattern:$0x73625140]  ;;  %v1379_v5 = vsel %vm1365_vm9, %v1348_v37, %v4933_v0  ;;  %v1225_v62 = vsel %vm1210_vm4, %v1194_v40, %v6534_v61  ;;  %v1350_v0 = vsel %vm1334_vm8, %v1319_v24, %v4756_v8  ;;  %v1196_v23 = vsel %vm1179_vm3, %v3511_v28, %v6536_v12  ;;  %v6546_v44 = vld [vmem:[#allocation75_spill] sm:$0xff]  ;;  %v3514_v28 = vld [vmem:[%s3642_s30 + $0x98] sm:$0xff] }
 0x2c1   : > { %1564 = vst [vmem:[#allocation1] ss:$4 sm:$0xff] %v1478_v46  ;;  %v1410_v30 = vsel %vm1396_vm10, %v1379_v5, %v5021_v50  ;;  %v1256_v3 = vsel %vm1241_vm5, %v1225_v62, %v6535_v56  ;;  %v1381_v58 = vsel %vm1365_vm9, %v1350_v0, %v4904_v52  ;;  %v6537_v50 = vld [vmem:[#allocation131_spill] sm:$0xff]  ;;  %v6549_v34 = vld [vmem:[#allocation161_spill] sm:$0xff]  ;;  %v6552_v0 = vld [vmem:[#allocation154_spill] sm:$0xff] }
 0x2c2   : > { %1565 = vst [vmem:[#allocation1 + $0x1] ss:$4 sm:$0xff] %v1479_v9  ;;  %v1287_v54 = vsel %vm1272_vm6, %v1256_v3, %v6537_v50  ;;  %v1484_v16 = vrot.slane %v1410_v30, 2  ;;  %v5167_v46 = vsel %vm1396_vm10, %v1381_v58, %v1120_v51  ;;  %v1485_v9 = vrot.slane %v1410_v30, 4  ;;  %v6551_v24 = vld [vmem:[#allocation171_spill] sm:$0xff]  ;;  %v6553_v12 = vld [vmem:[#allocation58_spill] sm:$0xff] }
 0x2c3   : > { %v1563_v15 = vld.sshfl [vmem:[#allocation1 + $0x20] sm:$0xff pattern:$0x73625140]  ;;  %1566 = vst [vmem:[#allocation1 + $0x2] ss:$4 sm:$0xff] %v1480_v41  ;;  %v5121_v63 = vpop.permute.xlu1 %1030  ;;  %v1318_v52 = vsel %vm1303_vm7, %v1287_v54, %v4575_v47  ;;  %v1486_v60 = vrot.slane %v1410_v30, 6 }
 0x2c4   : > { %1567 = vst [vmem:[#allocation1 + $0x3] ss:$4 sm:$0xff] %v1408_v13  ;;  %v1349_v10 = vsel %vm1334_vm8, %v1318_v52, %v4704_v57  ;;  %v1663_v51 = vpack.c.bf16 %v1563_v15, %v5107_v53  ;;  %v1487_v6 = vrot.slane %v5167_v46, 2  ;;  %v1488_v4 = vrot.slane %v5167_v46, 4  ;;  %v6542_v15 = vld [vmem:[#allocation170_spill] sm:$0xff]  ;;  %v5208_v36 = vpop.permute.xlu2 %1036  ;;  %v6554_v50 = vld [vmem:[#allocation168_spill] sm:$0xff] }
 0x2c5   : > { %1568 = vst [vmem:[#allocation1 + $0x20] ss:$4 sm:$0xff] %v1409_v27  ;;  %v5132_v55 = vpop.permute.xlu0 %1028  ;;  %v6538_v27 = vld [vmem:[#allocation85_spill] sm:$0xff]  ;;  %v1380_v47 = vsel %vm1365_vm9, %v1349_v10, %v4930_v42 }
 0x2c6   : > { %1569 = vst [vmem:[#allocation1 + $0x21] ss:$4 sm:$0xff] %v1481_v39  ;;  %v1227_v2 = vsel %vm1210_vm4, %v1196_v23, %v6538_v27  ;;  %v1411_v53 = vsel %vm1396_vm10, %v1380_v47, %v5084_v18  ;;  %v3513_v18 = vld [vmem:[%s3642_s30 + $0x88] sm:$0xf]  ;;  %v1199_v23 = vsel %vm1179_vm3, %v3514_v28, %v6553_v12  ;;  %v6571_v28 = vld [vmem:[#allocation61_spill] sm:$0xff] }
 0x2c7   : > { %1570 = vst [vmem:[#allocation1 + $0x22] ss:$4 sm:$0xff] %v1482_v17  ;;  %v1258_v20 = vsel %vm1241_vm5, %v1227_v2, %v6539_v59  ;;  %v6543_v17 = vld [vmem:[#allocation89_spill] sm:$0xff]  ;;  %v1197_v35 = vsel %vm1179_vm3, %v3513_v18, %v6544_v48  ;;  %v6555_v2 = vld [vmem:[#allocation88_spill] sm:$0xff]  ;;  %v6556_v59 = vld [vmem:[#allocation11_spill] sm:$0xff] }
 0x2c8   : > { %1571 = vst [vmem:[#allocation1 + $0x23] ss:$4 sm:$0xff] %v1483_v49  ;;  %v1289_v7 = vsel %vm1272_vm6, %v1258_v20, %v4505_v45  ;;  %v3512_v45 = vld [vmem:[%s3642_s30 + $0x90] sm:$0xff]  ;;  %v1228_v25 = vsel %vm1210_vm4, %v1197_v35, %v6546_v44  ;;  %v1230_v52 = vsel %vm1210_vm4, %v1199_v23, %v6555_v2  ;;  %v6565_v44 = vld [vmem:[#allocation108_spill] sm:$0xff]  ;;  %v6572_v23 = vld [vmem:[#allocation169_spill] sm:$0xff] }
 0x2c9   : > { %v1320_v39 = vsel %vm1303_vm7, %v1289_v7, %v6540_v22  ;;  %v1198_v42 = vsel %vm1179_vm3, %v3512_v45, %v6541_v26  ;;  %v1259_v5 = vsel %vm1241_vm5, %v1228_v25, %v6548_v19  ;;  %v1261_v20 = vsel %vm1241_vm5, %v1230_v52, %v6556_v59  ;;  %v6561_v18 = vld [vmem:[#allocation43_spill] sm:$0xff] }
 0x2ca   : > { %v1351_v13 = vsel %vm1334_vm8, %v1320_v39, %v6542_v15  ;;  %v1229_v43 = vsel %vm1210_vm4, %v1198_v42, %v6543_v17  ;;  %v6559_v39 = vld [vmem:[#allocation30_spill] sm:$0xff]  ;;  %v6574_v52 = vld [vmem:[#allocation91_spill] sm:$0xff] }
 0x2cb   : > { %v5164_v29 = vld.sshfl [vmem:[#allocation1] sm:$0xff pattern:$0x73625140]  ;;  %v1124_v8 = vpop.permute.xlu1 %1123  ;;  %v1382_v31 = vsel %vm1365_vm9, %v1351_v13, %v5064_v38  ;;  %v1260_v49 = vsel %vm1241_vm5, %v1229_v43, %v6545_v32  ;;  %v6547_v38 = vld [vmem:[#allocation147_spill] sm:$0xff]  ;;  %v3515_v42 = vld [vmem:[%s3642_s30 + $0xa8] sm:$0xff] }
 0x2cc   : > { %1574 = vst [vmem:[#allocation1] ss:$4 sm:$0xff] %v1410_v30  ;;  %v1413_v33 = vsel %vm1396_vm10, %v1382_v31, %v5099_v1  ;;  %v1291_v14 = vsel %vm1272_vm6, %v1260_v49, %v6547_v38  ;;  %v6550_v1 = vld [vmem:[#allocation134_spill] sm:$0xff]  ;;  %v3516_v31 = vld [vmem:[%s3642_s30 + $0xa0] sm:$0xf] }
 0x2cd   : > { %1575 = vst [vmem:[#allocation1 + $0x1] ss:$4 sm:$0xff] %v1484_v16  ;;  %v1126_v41 = vpop.permute.xlu0 %1125  ;;  %v1322_v21 = vsel %vm1303_vm7, %v1291_v14, %v6549_v34  ;;  %v1290_v40 = vsel %vm1272_vm6, %v1259_v5, %v6550_v1  ;;  %v1491_v61 = vrot.slane %v1413_v33, 4  ;;  %v1490_v16 = vrot.slane %v1413_v33, 2  ;;  %v6560_v15 = vld [vmem:[#allocation62_spill] sm:$0xff]  ;;  %v6566_v38 = vld [vmem:[#allocation149_spill] sm:$0xff] }
 0x2ce   : > { %1576 = vst [vmem:[#allocation1 + $0x2] ss:$4 sm:$0xff] %v1485_v9  ;;  %v1353_v30 = vsel %vm1334_vm8, %v1322_v21, %v6551_v24  ;;  %v1321_v56 = vsel %vm1303_vm7, %v1290_v40, %v6552_v0  ;;  %v1489_v9 = vrot.slane %v5167_v46, 6  ;;  %v1492_v10 = vrot.slane %v1413_v33, 6  ;;  %v6564_v49 = vld [vmem:[#allocation122_spill] sm:$0xff]  ;;  %v6567_v34 = vld [vmem:[#allocation137_spill] sm:$0xff] }
 0x2cf   : > { %1577 = vst [vmem:[#allocation1 + $0x3] ss:$4 sm:$0xff] %v1486_v60  ;;  %v5185_v57 = vld.sshfl [vmem:[#allocation1 + $0x20] sm:$0xff pattern:$0x73625140]  ;;  %3084 = vmatmul.msk.bf16.gmra.mxu0 %vm6241_vm11, %v1663_v51  ;;  %v1384_v58 = vsel %vm1365_vm9, %v1353_v30, %v5121_v63  ;;  %v1352_v54 = vsel %vm1334_vm8, %v1321_v56, %v6554_v50  ;;  %v6557_v51 = vld [vmem:[#allocation146_spill] sm:$0xff]  ;;  %v1201_v13 = vsel %vm1179_vm3, %v3515_v42, %v6560_v15 }
 0x2d0   : > { %1578 = vst [vmem:[#allocation1 + $0x20] ss:$4 sm:$0xff] %v1411_v53  ;;  %v1415_v27 = vsel %vm1396_vm10, %v1384_v58, %v1126_v41  ;;  %v1383_v63 = vsel %vm1365_vm9, %v1352_v54, %v5132_v55  ;;  %v1292_v7 = vsel %vm1272_vm6, %v1261_v20, %v6557_v51  ;;  %v1664_v45 = vpack.c.bf16 %v5185_v57, %v5164_v29  ;;  %v6563_v29 = vld [vmem:[#allocation78_spill] sm:$0xff]  ;;  %v6568_v1 = vld [vmem:[#allocation163_spill] sm:$0xff]  ;;  %v6576_v51 = vld [vmem:[#allocation121_spill] sm:$0xff] }
 0x2d1   : > { %1579 = vst [vmem:[#allocation1 + $0x21] ss:$4 sm:$0xff] %v5167_v46  ;;  %v1414_v60 = vsel %vm1396_vm10, %v1383_v63, %v1124_v8  ;;  %v1493_v47 = vrot.slane %v1415_v27, 2  ;;  %v1494_v17 = vrot.slane %v1415_v27, 4  ;;  %v1200_v48 = vsel %vm1179_vm3, %v3516_v31, %v6561_v18  ;;  %v6569_v30 = vld [vmem:[#allocation155_spill] sm:$0xff]  ;;  %v6581_v42 = vld [vmem:[#allocation162_spill] sm:$0xff] }
 0x2d2   : > { %1580 = vst [vmem:[#allocation1 + $0x22] ss:$4 sm:$0xff] %v1487_v6  ;;  %v6558_v6 = vld [vmem:[#allocation160_spill] sm:$0xff]  ;;  %v1495_v32 = vrot.slane %v1415_v27, 6  ;;  %v1231_v57 = vsel %vm1210_vm4, %v1200_v48, %v6563_v29  ;;  %v3517_v58 = vld [vmem:[%s3642_s30 + $0xb0] sm:$0xff] }
 0x2d3   : > { %1581 = vst [vmem:[#allocation1 + $0x23] ss:$4 sm:$0xff] %v1488_v4  ;;  %v5214_v37 = vpop.permute.xlu1 %1034  ;;  %v1323_v46 = vsel %vm1303_vm7, %v1292_v7, %v6558_v6  ;;  %v5248_v4 = vpop.permute.xlu2 %1038  ;;  %v1262_v25 = vsel %vm1241_vm5, %v1231_v57, %v6565_v44  ;;  %v1202_v12 = vsel %vm1179_vm3, %v3517_v58, %v6571_v28  ;;  %v6577_v6 = vld [vmem:[#allocation112_spill] sm:$0xff]  ;;  %v6584_v48 = vld [vmem:[#allocation95_spill] sm:$0xff]  ;;  %v6591_v28 = vld [vmem:[#allocation94_spill] sm:$0xff] }
 0x2d4   : > { %v1354_v53 = vsel %vm1334_vm8, %v1323_v46, %v6559_v39  ;;  %v1293_v21 = vsel %vm1272_vm6, %v1262_v25, %v6567_v34  ;;  %v3519_v39 = vld [vmem:[%s3642_s30 + $0xc0] sm:$0xff] }
 0x2d5   : > { %v1128_v62 = vpop.permute.xlu0 %1127  ;;  %v1385_v8 = vsel %vm1365_vm9, %v1354_v53, %v5149_v11  ;;  %v6562_v11 = vld [vmem:[#allocation92_spill] sm:$0xff] }
 0x2d6   : > { %v1582_v3 = vld.sshfl [vmem:[#allocation1] sm:$0xff pattern:$0x73625140]  ;;  %v1416_v43 = vsel %vm1396_vm10, %v1385_v8, %v1128_v62  ;;  %v1232_v35 = vsel %vm1210_vm4, %v1201_v13, %v6562_v11  ;;  %v6570_v62 = vld [vmem:[#allocation2_spill] sm:$0xff]  ;;  %v6582_v13 = vld [vmem:[#allocation156_spill] sm:$0xff] }
 0x2d7   : > { %1587 = vst [vmem:[#allocation1 + $0x3] ss:$4 sm:$0xff] %v1491_v61  ;;  %v1496_v5 = vrot.slane %v1416_v43, 2  ;;  %v1497_v24 = vrot.slane %v1416_v43, 4  ;;  %v1324_v61 = vsel %vm1303_vm7, %v1293_v21, %v6569_v30  ;;  %v1498_v56 = vrot.slane %v1416_v43, 6  ;;  %v6580_v8 = vld [vmem:[#allocation141_spill] sm:$0xff] }
 0x2d8   : > { %1585 = vst [vmem:[#allocation1 + $0x1] ss:$4 sm:$0xff] %v1413_v33  ;;  %v1263_v33 = vsel %vm1241_vm5, %v1232_v35, %v6564_v49  ;;  %v1355_v50 = vsel %vm1334_vm8, %v1324_v61, %v6572_v23  ;;  %v6585_v35 = vld [vmem:[#allocation20_spill] sm:$0xff]  ;;  %v6588_v21 = vld [vmem:[#allocation165_spill] sm:$0xff] }
 0x2d9   : > { %1586 = vst [vmem:[#allocation1 + $0x2] ss:$4 sm:$0xff] %v1490_v16  ;;  %v1294_v14 = vsel %vm1272_vm6, %v1263_v33, %v6566_v38  ;;  %v3518_v16 = vld [vmem:[%s3642_s30 + $0xb8] sm:$0xf]  ;;  %v1386_v59 = vsel %vm1365_vm9, %v1355_v50, %v5214_v37 }
 0x2da   : > { %v1583_v41 = vld.sshfl [vmem:[#allocation1 + $0x20] sm:$0xff pattern:$0x73625140]  ;;  %1584 = vst [vmem:[#allocation1] ss:$4 sm:$0xff] %v1489_v9  ;;  %v1325_v40 = vsel %vm1303_vm7, %v1294_v14, %v6568_v1  ;;  %v1233_v9 = vsel %vm1210_vm4, %v1202_v12, %v6574_v52  ;;  %v6586_v49 = vld [vmem:[#allocation124_spill] sm:$0xff] }
 0x2db   : > { %1588 = vst [vmem:[#allocation1 + $0x20] ss:$4 sm:$0xff] %v1492_v10  ;;  %v1665_v55 = vpack.c.bf16 %v1583_v41, %v1582_v3  ;;  %v1132_v22 = vpop.permute.xlu1 %1131  ;;  %v1356_v0 = vsel %vm1334_vm8, %v1325_v40, %v6570_v62  ;;  %v1264_v7 = vsel %vm1241_vm5, %v1233_v9, %v6576_v51  ;;  %v1136_v41 = vpop.permute.xlu2 %1135  ;;  %v6589_v40 = vld [vmem:[#allocation36_spill] sm:$0xff]  ;;  %v3520_v62 = vld [vmem:[%s3642_s30 + $0xc8] sm:$0xff] }
 0x2dc   : > { %1589 = vst [vmem:[#allocation1 + $0x21] ss:$4 sm:$0xff] %v1414_v60  ;;  %v1387_v54 = vsel %vm1365_vm9, %v1356_v0, %v5208_v36  ;;  %v6575_v60 = vld [vmem:[#allocation81_spill] sm:$0xff]  ;;  %v6590_v0 = vld [vmem:[#allocation64_spill] sm:$0xff] }
 0x2dd   : > { %3086 = vmatmul.msk.bf16.vlgmr.msra.gmra.mxu2 %vm6241_vm11, %v1665_v55  ;;  %1590 = vst [vmem:[#allocation1 + $0x22] ss:$4 sm:$0xff] %v1415_v27  ;;  %v1130_v26 = vpop.permute.xlu0 %1129  ;;  %v6573_v27 = vld [vmem:[#allocation49_spill] sm:$0xff]  ;;  %v1418_v20 = vsel %vm1396_vm10, %v1387_v54, %v1132_v22  ;;  %v6578_v55 = vld [vmem:[#allocation148_spill] sm:$0xff] }
 0x2de   : > { %1591 = vst [vmem:[#allocation1 + $0x23] ss:$4 sm:$0xff] %v1493_v47  ;;  %v1203_v2 = vsel %vm1179_vm3, %v3518_v16, %v6573_v27  ;;  %v1417_v47 = vsel %vm1396_vm10, %v1386_v59, %v1130_v26  ;;  %v1295_v37 = vsel %vm1272_vm6, %v1264_v7, %v6578_v55  ;;  %v6579_v22 = vld [vmem:[#allocation65_spill] sm:$0xff]  ;;  %v1499_v18 = vrot.slane %v1418_v20, 2  ;;  %v6592_v16 = vld [vmem:[#allocation123_spill] sm:$0xff] }
 0x2df   : > { %3085 = vmatmul.msk.bf16.gmra.mxu0 %vm6241_vm11, %v1664_v45  ;;  %v1234_v36 = vsel %vm1210_vm4, %v1203_v2, %v6575_v60  ;;  %v1204_v53 = vsel %vm1179_vm3, %v3519_v39, %v6579_v22  ;;  %v1326_v15 = vsel %vm1303_vm7, %v1295_v37, %v6581_v42  ;;  %v1500_v57 = vrot.slane %v1418_v20, 4  ;;  %v6593_v2 = vld [vmem:[#allocation150_spill] sm:$0xff] }
 0x2e0   : > { %v1265_v46 = vsel %vm1241_vm5, %v1234_v36, %v6577_v6  ;;  %v1235_v11 = vsel %vm1210_vm4, %v1204_v53, %v6584_v48  ;;  %v1501_v44 = vrot.slane %v1418_v20, 6  ;;  %v3521_v6 = vld [vmem:[%s3642_s30 + $0xd8] sm:$0xff]  ;;  %v6597_v22 = vld [vmem:[#allocation98_spill] sm:$0xff]  ;;  %v6601_v48 = vld [vmem:[#allocation97_spill] sm:$0xff] }
 0x2e1   : > { %v1592_v19 = vld.sshfl [vmem:[#allocation1] sm:$0xff pattern:$0x73625140]  ;;  %v1296_v45 = vsel %vm1272_vm6, %v1265_v46, %v6580_v8  ;;  %v1266_v33 = vsel %vm1241_vm5, %v1235_v11, %v6586_v49  ;;  %v6596_v46 = vld [vmem:[#allocation68_spill] sm:$0xff]  ;;  %v6598_v8 = vld [vmem:[#allocation127_spill] sm:$0xff] }
 0x2e2   : > { %1594 = vst [vmem:[#allocation1] ss:$4 sm:$0xff] %v1494_v17  ;;  %v1327_v26 = vsel %vm1303_vm7, %v1296_v45, %v6582_v13  ;;  %v6583_v17 = vld [vmem:[#allocation6_spill] sm:$0xff]  ;;  %v1207_v55 = vsel %vm1179_vm3, %v3521_v6, %v6596_v46  ;;  %v6599_v13 = vld [vmem:[#allocation67_spill] sm:$0xff]  ;;  %v6614_v46 = vld [vmem:[#allocation57_spill] sm:$0xff] }
 0x2e3   : > { %1595 = vst [vmem:[#allocation1 + $0x1] ss:$4 sm:$0xff] %v1495_v32  ;;  %v1041_v3 = vpop.permute.xlu1 %1040  ;;  %v1358_v32 = vsel %vm1334_vm8, %v1327_v26, %v6585_v35  ;;  %v1138_v23 = vpop.permute.xlu2 %1137  ;;  %v1238_v53 = vsel %vm1210_vm4, %v1207_v55, %v6597_v22  ;;  %v6602_v35 = vld [vmem:[#allocation167_spill] sm:$0xff]  ;;  %v3524_v6 = vld [vmem:[%s3642_s30 + $0xe8] sm:$0xf] }
 0x2e4   : > { %1596 = vst [vmem:[#allocation1 + $0x2] ss:$4 sm:$0xff] %v1416_v43  ;;  %v1357_v43 = vsel %vm1334_vm8, %v1326_v15, %v6583_v17  ;;  %v1389_v25 = vsel %vm1365_vm9, %v1358_v32, %v1041_v3  ;;  %v1269_v45 = vsel %vm1241_vm5, %v1238_v53, %v6598_v8  ;;  %v3522_v15 = vld [vmem:[%s3642_s30 + $0xe0] sm:$0xff]  ;;  %v1209_v55 = vsel %vm1179_vm3, %v3524_v6, %v6614_v46  ;;  %v6616_v8 = vld [vmem:[#allocation10_spill] sm:$0xff] }
 0x2e5   : > { %v1593_v63 = vld.sshfl [vmem:[#allocation1 + $0x20] sm:$0xff pattern:$0x73625140]  ;;  %1597 = vst [vmem:[#allocation1 + $0x3] ss:$4 sm:$0xff] %v1496_v5  ;;  %v1134_v10 = vpop.permute.xlu0 %1133  ;;  %v1388_v29 = vsel %vm1365_vm9, %v1357_v43, %v5248_v4  ;;  %v1420_v30 = vsel %vm1396_vm10, %v1389_v25, %v1136_v41  ;;  %v1208_v26 = vsel %vm1179_vm3, %v3522_v15, %v6599_v13  ;;  %v6604_v25 = vld [vmem:[#allocation4_spill] sm:$0xff] }
 0x2e6   : > { %1598 = vst [vmem:[#allocation1 + $0x20] ss:$4 sm:$0xff] %v1497_v24  ;;  %v1666_v31 = vpack.c.bf16 %v1593_v63, %v1592_v19  ;;  %v1419_v38 = vsel %vm1396_vm10, %v1388_v29, %v1134_v10  ;;  %v6587_v19 = vld [vmem:[#allocation151_spill] sm:$0xff]  ;;  %v6594_v63 = vld [vmem:[#allocation164_spill] sm:$0xff]  ;;  %v6600_v17 = vld [vmem:[#allocation153_spill] sm:$0xff]  ;;  %v1239_v11 = vsel %vm1210_vm4, %v1208_v26, %v6601_v48 }
 0x2e7   : > { %1599 = vst [vmem:[#allocation1 + $0x21] ss:$4 sm:$0xff] %v1498_v56  ;;  %v1297_v5 = vsel %vm1272_vm6, %v1266_v33, %v6587_v19  ;;  %v1502_v61 = vrot.slane %v1419_v38, 2  ;;  %v1205_v56 = vsel %vm1179_vm3, %v3520_v62, %v6590_v0  ;;  %v1503_v3 = vrot.slane %v1419_v38, 4  ;;  %v6603_v33 = vld [vmem:[#allocation126_spill] sm:$0xff]  ;;  %v6618_v26 = vld [vmem:[#allocation159_spill] sm:$0xff] }
 0x2e8   : > { %1601 = vst [vmem:[#allocation1 + $0x23] ss:$4 sm:$0xff] %v1418_v20  ;;  %v1328_v1 = vsel %vm1303_vm7, %v1297_v5, %v6588_v21  ;;  %v1236_v12 = vsel %vm1210_vm4, %v1205_v56, %v6591_v28  ;;  %v1504_v54 = vrot.slane %v1419_v38, 6  ;;  %v6595_v20 = vld [vmem:[#allocation5_spill] sm:$0xff]  ;;  %v1300_v43 = vsel %vm1272_vm6, %v1269_v45, %v6600_v17  ;;  %v3523_v0 = vld [vmem:[%s3642_s30 + $0xd0] sm:$0xf] }
 0x2e9   : > { %1600 = vst [vmem:[#allocation1 + $0x22] ss:$4 sm:$0xff] %v1417_v47  ;;  %v1359_v24 = vsel %vm1334_vm8, %v1328_v1, %v6589_v40  ;;  %v1267_v27 = vsel %vm1241_vm5, %v1236_v12, %v6592_v16  ;;  %v1331_v32 = vsel %vm1303_vm7, %v1300_v43, %v6602_v35  ;;  %v6608_v56 = vld [vmem:[#allocation54_spill] sm:$0xff]  ;;  %v6609_v12 = vld [vmem:[#allocation84_spill] sm:$0xff]  ;;  %v6619_v43 = vld [vmem:[#allocation3_spill] sm:$0xff] }
 0x2ea   : > { %v1298_v52 = vsel %vm1272_vm6, %v1267_v27, %v6593_v2  ;;  %v6611_v27 = vld [vmem:[#allocation144_spill] sm:$0xff]  ;;  %s1942_s30 = scalar_select %p1941_p7, 1, 0 }
 0x2eb   : > { %v1045_v14 = vpop.permute.xlu1 %1044  ;;  %v1329_v59 = vsel %vm1303_vm7, %v1298_v52, %v6594_v63  ;;  %v6612_v63 = vld [vmem:[#allocation157_spill] sm:$0xff] }
 0x2ec   : > { %v1602_v34 = vld.sshfl [vmem:[#allocation1] sm:$0xff pattern:$0x73625140]  ;;  %v1360_v10 = vsel %vm1334_vm8, %v1329_v59, %v6595_v20 }
 0x2ed   : > { %3087 = vmatmul.msk.bf16.gmra.mxu2 %vm6241_vm11, %v1666_v31  ;;  %1604 = vst [vmem:[#allocation1] ss:$4 sm:$0xff] %v1499_v18  ;;  %v1043_v4 = vpop.permute.xlu0 %1042  ;;  %v1391_v36 = vsel %vm1365_vm9, %v1360_v10, %v1045_v14  ;;  %v1051_v31 = vpop.permute.xlu2 %1050  ;;  %v6605_v14 = vld [vmem:[#allocation152_spill] sm:$0xff] }
 0x2ee   : > { %1605 = vst [vmem:[#allocation1 + $0x1] ss:$4 sm:$0xff] %v1500_v57  ;;  %v1390_v58 = vsel %vm1365_vm9, %v1359_v24, %v1043_v4  ;;  %v6607_v24 = vld [vmem:[#allocation9_spill] sm:$0xff] }
 0x2ef   : > { %1606 = vst [vmem:[#allocation1 + $0x2] ss:$4 sm:$0xff] %v1501_v44  ;;  %v1421_v9 = vsel %vm1396_vm10, %v1390_v58, %v1138_v23  ;;  %v1270_v44 = vsel %vm1241_vm5, %v1239_v11, %v6603_v33 }
 0x2f0   : > { %v1603_v50 = vld.sshfl [vmem:[#allocation1 + $0x20] sm:$0xff pattern:$0x73625140]  ;;  %1607 = vst [vmem:[#allocation1 + $0x3] ss:$4 sm:$0xff] %v1419_v38  ;;  %v1505_v51 = vrot.slane %v1421_v9, 2  ;;  %v1362_v38 = vsel %vm1334_vm8, %v1331_v32, %v6604_v25  ;;  %v1301_v19 = vsel %vm1272_vm6, %v1270_v44, %v6605_v14 }
 0x2f1   : > { %1611 = vst [vmem:[#allocation1 + $0x23] ss:$4 sm:$0xff] %v1420_v30  ;;  %v1506_v41 = vrot.slane %v1421_v9, 4  ;;  %v1507_v39 = vrot.slane %v1421_v9, 6  ;;  %v1667_v57 = vpack.c.bf16 %v1603_v50, %v1602_v34  ;;  %v6606_v34 = vld [vmem:[#allocation166_spill] sm:$0xff] }
 0x2f2   : > { %1608 = vst [vmem:[#allocation1 + $0x20] ss:$4 sm:$0xff] %v1502_v61  ;;  %v1332_v1 = vsel %vm1303_vm7, %v1301_v19, %v6606_v34 }
 0x2f3   : > { %1609 = vst [vmem:[#allocation1 + $0x21] ss:$4 sm:$0xff] %v1503_v3  ;;  %v1049_v60 = vpop.permute.xlu1 %1048  ;;  %v1363_v30 = vsel %vm1334_vm8, %v1332_v1, %v6607_v24  ;;  %v1206_v3 = vsel %vm1179_vm3, %v3523_v0, %v6608_v56 }
 0x2f4   : > { %1610 = vst [vmem:[#allocation1 + $0x22] ss:$4 sm:$0xff] %v1504_v54  ;;  %v1393_v5 = vsel %vm1365_vm9, %v1362_v38, %v1049_v60  ;;  %v1394_v61 = vsel %vm1365_vm9, %v1363_v30, %v1051_v31  ;;  %v1237_v23 = vsel %vm1210_vm4, %v1206_v3, %v6609_v12  ;;  %v6610_v54 = vld [vmem:[#allocation117_spill] sm:$0xff]  ;;  %v6613_v60 = vld [vmem:[#allocation24_spill] sm:$0xff]  ;;  %v1933_v3 = vstv %s1932_s29 }
 0x2f5   : > { %v1140_v7 = vpop.permute.xlu0 %1139  ;;  %v1268_v16 = vsel %vm1241_vm5, %v1237_v23, %v6610_v54  ;;  %v1047_v52 = vpop.permute.xlu2 %1046  ;;  %vm1934_vm13 = vcmp.eq.s32.totalorder %v1933_v3, 1 }
 0x2f6   : > { %v1422_v47 = vsel %vm1396_vm10, %v1391_v36, %v1140_v7  ;;  %v1299_v2 = vsel %vm1272_vm6, %v1268_v16, %v6611_v27 }
 0x2f7   : > { %v5354_v37 = vld.sshfl [vmem:[#allocation1] sm:$0xff pattern:$0x73625140]  ;;  %v1508_v42 = vrot.slane %v1422_v47, 2  ;;  %v1509_v18 = vrot.slane %v1422_v47, 4  ;;  %v1510_v49 = vrot.slane %v1422_v47, 6  ;;  %v1330_v59 = vsel %vm1303_vm7, %v1299_v2, %v6612_v63 }
 0x2f8   : > { %1614 = vst [vmem:[#allocation1] ss:$4 sm:$0xff] %v1421_v9  ;;  %v1361_v36 = vsel %vm1334_vm8, %v1330_v59, %v6613_v60 }
 0x2f9   : > { %1615 = vst [vmem:[#allocation1 + $0x1] ss:$4 sm:$0xff] %v1505_v51 }
 0x2fa   : > { %1616 = vst [vmem:[#allocation1 + $0x2] ss:$4 sm:$0xff] %v1506_v41  ;;  %v1392_v41 = vsel %vm1365_vm9, %v1361_v36, %v1047_v52 }
 0x2fb   : > { %v1613_v29 = vld.sshfl [vmem:[#allocation1 + $0x20] sm:$0xff pattern:$0x73625140]  ;;  %1617 = vst [vmem:[#allocation1 + $0x3] ss:$4 sm:$0xff] %v1507_v39  ;;  %v1146_v4 = vpop.permute.xlu1 %1145  ;;  %v6615_v39 = vld [vmem:[#allocation87_spill] sm:$0xff] }
 0x2fc   : > { %1618 = vst [vmem:[#allocation1 + $0x20] ss:$4 sm:$0xff] %v1422_v47  ;;  %v1425_v58 = vsel %vm1396_vm10, %v1394_v61, %v1146_v4  ;;  %v1240_v22 = vsel %vm1210_vm4, %v1209_v55, %v6615_v39  ;;  %v1668_v53 = vpack.c.bf16 %v1613_v29, %v5354_v37  ;;  %v1918_v61 = vlaneseq }
 0x2fd   : > { %3088 = vmatmul.msk.bf16.gmra.mxu2 %vm6241_vm11, %v1667_v57  ;;  %1619 = vst [vmem:[#allocation1 + $0x21] ss:$4 sm:$0xff] %v1508_v42  ;;  %v1144_v21 = vpop.permute.xlu0 %1143  ;;  %v1514_v9 = vrot.slane %v1425_v58, 2  ;;  %v1515_v20 = vrot.slane %v1425_v58, 4  ;;  %v1271_v45 = vsel %vm1241_vm5, %v1240_v22, %v6616_v8  ;;  %v6617_v42 = vld [vmem:[#allocation145_spill] sm:$0xff]  ;;  %v1148_v48 = vpop.permute.xlu2 %1147  ;;  %v1516_v37 = vrot.slane %v1425_v58, 6 }
 0x2fe   : > { %1620 = vst [vmem:[#allocation1 + $0x22] ss:$4 sm:$0xff] %v1509_v18  ;;  %v1424_v40 = vsel %vm1396_vm10, %v1393_v5, %v1144_v21  ;;  %v1302_v15 = vsel %vm1272_vm6, %v1271_v45, %v6617_v42  ;;  %v5420_v57 = vld [vmem:[%s6165_s2] ss:$0 sm:$0xff]  ;;  %v5428_v56 = vshrl.u32 %v1918_v61, 7 }
 0x2ff   : > { %1621 = vst [vmem:[#allocation1 + $0x23] ss:$4 sm:$0xff] %v1510_v49  ;;  %v1511_v62 = vrot.slane %v1424_v40, 2  ;;  %v1512_v28 = vrot.slane %v1424_v40, 4  ;;  %v1513_v7 = vrot.slane %v1424_v40, 6  ;;  %v1333_v17 = vsel %vm1303_vm7, %v1302_v15, %v6618_v26 }
 0x300   : > { %v1364_v31 = vsel %vm1334_vm8, %v1333_v17, %v6619_v43  ;;  %vm1922_vm12 = vcmp.ge.s32.totalorder %v5428_v56, 1 }
 0x301   : > { %vm1935_vm15 = vmand %vm1922_vm12, %vm1934_vm13 }
 0x302   : > { %v1622_v50 = vld.sshfl [vmem:[#allocation1] sm:$0xff pattern:$0x73625140] }
 0x303   : > { %1625 = vst [vmem:[#allocation1 + $0x1] ss:$4 sm:$0xff] %v1424_v40  ;;  %v1053_v13 = vpop.permute.xlu1 %1052 }
 0x304   : > { %1626 = vst [vmem:[#allocation1 + $0x2] ss:$4 sm:$0xff] %v1511_v62  ;;  %v1395_v18 = vsel %vm1365_vm9, %v1364_v31, %v1053_v13 }
 0x305   : > { %1627 = vst [vmem:[#allocation1 + $0x3] ss:$4 sm:$0xff] %v1512_v28  ;;  %v1142_v10 = vpop.permute.xlu0 %1141  ;;  %v1426_v32 = vsel %vm1396_vm10, %v1395_v18, %v1148_v48  ;;  %v5431_v28 = vadd.s32 16, %v5428_v56 }
 0x306   : > { %v1623_v51 = vld.sshfl [vmem:[#allocation1 + $0x20] sm:$0xff pattern:$0x73625140]  ;;  %v1423_v47 = vsel %vm1396_vm10, %v1392_v41, %v1142_v10 }
 0x307   : > { %1629 = vst [vmem:[#allocation1 + $0x21] ss:$4 sm:$0xff] %v1425_v58  ;;  %v1669_v49 = vpack.c.bf16 %v1623_v51, %v1622_v50  ;;  %vm1927_vm14 = vcmp.le.s32.totalorder %v5431_v28, 16 }
 0x308   : > { %1630 = vst [vmem:[#allocation1 + $0x22] ss:$4 sm:$0xff] %v1514_v9 }
 0x309   : > { %1631 = vst [vmem:[#allocation1 + $0x23] ss:$4 sm:$0xff] %v1515_v20 }
 0x30a   : > { %1628 = vst [vmem:[#allocation1 + $0x20] ss:$4 sm:$0xff] %v1513_v7 }
 0x30b   : > { %1624 = vst [vmem:[#allocation1] ss:$4 sm:$0xff] %v1423_v47 }
 0x30d   : > { %3089 = vmatmul.msk.bf16.gmra.mxu2 %vm6241_vm11, %v1668_v53 }
 0x311   : > { %v1633_v11 = vld.sshfl [vmem:[#allocation1 + $0x20] sm:$0xff pattern:$0x73625140] }
 0x312   : > { %v1632_v35 = vld.sshfl [vmem:[#allocation1] sm:$0xff pattern:$0x73625140] }
 0x313   : > { %1634 = vst [vmem:[#allocation1] ss:$4 sm:$0xff] %v1516_v37  ;;  %v1670_v29 = vpack.c.bf16 %v1633_v11, %v1632_v35 }
 0x314   : > { %1635 = vst [vmem:[#allocation1 + $0x1] ss:$4 sm:$0xff] %v1426_v32 }
 0x315   : > { %3091 = vmatmul.msk.bf16.vlgmr.msra.gmra.mxu3 %vm6241_vm11, %v1670_v29 }
 0x31b   : > { %v1636_v38 = vld.sshfl [vmem:[#allocation1] sm:$0xff pattern:$0x73625140] }
 0x31c   : > { %v1746_v33 = vpop.f32.mrf.mxu0  ;;  %v1671_v21 = vpack.c.bf16 %v1636_v38, %v1636_v38 }
 0x31d   : > { %3090 = vmatmul.msk.bf16.gmra.mxu2 %vm6241_vm11, %v1669_v49  ;;  %v1747_v44 = vadd.f32 %v5420_v57, %v1746_v33 }
 0x31f   : > { %v1805_v25 = vmax.f32 %v1747_v44, 0.0 }
 0x321   : > { %v1851_v14 = vrot.slane %v1805_v25, 2  ;;  %v1852_v19 = vrot.slane %v1805_v25, 4  ;;  %v1853_v5 = vrot.slane %v1805_v25, 6  ;;  %1969 = vst [vmem:[#allocation1] ss:$4 sm:$0xff] %v1805_v25 }
 0x323   : > { %1971 = vst [vmem:[#allocation1 + $0x1] ss:$4 sm:$0xff] %v1851_v14 }
 0x324   : > { %1973 = vst [vmem:[#allocation1 + $0x2] ss:$4 sm:$0xff] %v1852_v19  ;;  %v1748_v34 = vpop.f32.mrf.mxu0 }
 0x325   : > { %1975 = vst [vmem:[#allocation1 + $0x3] ss:$4 sm:$0xff] %v1853_v5  ;;  %v1749_v1 = vadd.f32 %v5420_v57, %v1748_v34  ;;  %3092 = vmatmul.msk.bf16.gmra.mxu3 %vm6241_vm11, %v1671_v21  ;;  %vm1937_vm11 = vmand %vm1927_vm14, %vm1934_vm13 }
 0x327   : > { %v1806_v4 = vmax.f32 %v1749_v1, 0.0 }
 0x329   : > { %v1854_v40 = vrot.slane %v1806_v4, 2  ;;  %v1855_v24 = vrot.slane %v1806_v4, 4  ;;  %v1856_v30 = vrot.slane %v1806_v4, 6  ;;  %1977 = vst [vmem:[#allocation1 + $0x20] ss:$4 sm:$0xff] %v1806_v4 }
 0x32b   : > { %1979 = vst [vmem:[#allocation1 + $0x21] ss:$4 sm:$0xff] %v1854_v40 }
 0x32c   : > { %1981 = vst [vmem:[#allocation1 + $0x22] ss:$4 sm:$0xff] %v1855_v24  ;;  %v1751_v62 = vpop.f32.mrf.mxu0  ;;  %v1984_v12 = vld.sshfl [vmem:[#allocation1] sm:$0xff pattern:$0x73625140] }
 0x32d   : > { %1983 = vst [vmem:[#allocation1 + $0x23] ss:$4 sm:$0xff] %v1856_v30  ;;  %v1752_v0 = vadd.f32 %v5420_v57, %v1751_v62  ;;  %v5442_v63 = vsel %vm1935_vm15, %v1984_v12, 0.0 }
 0x32e   : > { %v2180_v7 = vrot.slane %v5442_v63, 1 }
 0x32f   : > { %v1807_v58 = vmax.f32 %v1752_v0, 0.0 }
 0x331   : > { %v1857_v23 = vrot.slane %v1807_v58, 2  ;;  %1986 = vst [vmem:[#allocation1] ss:$4 sm:$0xff] %v1807_v58  ;;  %v1858_v50 = vrot.slane %v1807_v58, 4  ;;  %v1859_v54 = vrot.slane %v1807_v58, 6 }
 0x334   : > { %v1985_v16 = vld.sshfl [vmem:[#allocation1 + $0x20] sm:$0xff pattern:$0x73625140]  ;;  %v1753_v27 = vpop.f32.mrf.mxu0 }
 0x335   : > { %1988 = vst [vmem:[#allocation1 + $0x20] ss:$4 sm:$0xff] %v1857_v23  ;;  %v1754_v2 = vadd.f32 %v5420_v57, %v1753_v27  ;;  %v5438_v52 = vsel %vm1934_vm13, %v1985_v16, 0.0 }
 0x336   : > { %1989 = vst [vmem:[#allocation1 + $0x21] ss:$4 sm:$0xff] %v1858_v50  ;;  %v2181_v20 = vrot.slane %v5438_v52, 1 }
 0x337   : > { %1990 = vst [vmem:[#allocation1 + $0x22] ss:$4 sm:$0xff] %v1859_v54  ;;  %v1808_v9 = vmax.f32 %v1754_v2, 0.0 }
 0x338   : > { %v1987_v59 = vld.sshfl [vmem:[#allocation1] sm:$0xff pattern:$0x73625140]  ;;  %v2182_v6 = vsel %vm331_vm0, %v2180_v7, %v2181_v20 }
 0x339   : > { %v1860_v10 = vrot.slane %v1808_v9, 2  ;;  %v1861_v60 = vrot.slane %v1808_v9, 4  ;;  %v1862_v36 = vrot.slane %v1808_v9, 6  ;;  %1991 = vst [vmem:[#allocation1 + $0x23] ss:$4 sm:$0xff] %v1808_v9  ;;  %v5445_v51 = vsel %vm1937_vm11, %v1987_v59, 0.0 }
 0x33a   : > { %v2183_v41 = vrot.slane %v5445_v51, 1 }
 0x33b   : > { %1993 = vst [vmem:[#allocation1] ss:$4 sm:$0xff] %v1860_v10 }
 0x33c   : > { %1994 = vst [vmem:[#allocation1 + $0x1] ss:$4 sm:$0xff] %v1861_v60  ;;  %v1756_v47 = vpop.f32.mrf.mxu0  ;;  %v2184_v46 = vsel %vm331_vm0, %v2181_v20, %v2183_v41 }
 0x33d   : > { %1995 = vst [vmem:[#allocation1 + $0x2] ss:$4 sm:$0xff] %v1862_v36  ;;  %v1757_v55 = vadd.f32 %v5420_v57, %v1756_v47  ;;  %v3173_v39 = vpack.i.bf16 %v2184_v46, %v2182_v6 }
 0x33f   : > { %v1809_v22 = vmax.f32 %v1757_v55, 0.0  ;;  %3174 = vrot.lane.b32.xlu0 %v3173_v39, %s3565_s6 }
 0x340   : > { %v1992_v8 = vld.sshfl [vmem:[#allocation1 + $0x20] sm:$0xff pattern:$0x73625140] }
 0x341   : > { %v1863_v53 = vrot.slane %v1809_v22, 2  ;;  %1996 = vst [vmem:[#allocation1 + $0x3] ss:$4 sm:$0xff] %v1809_v22  ;;  %v1864_v15 = vrot.slane %v1809_v22, 4  ;;  %v1865_v26 = vrot.slane %v1809_v22, 6  ;;  %v5458_v48 = vsel %vm1922_vm12, %v1992_v8, 0.0 }
 0x342   : > { %v2185_v29 = vrot.slane %v5458_v48, 1 }
 0x343   : > { %1997 = vst [vmem:[#allocation1 + $0x20] ss:$4 sm:$0xff] %v1863_v53 }
 0x344   : > { %v1758_v45 = vpop.f32.mrf.mxu0 }
 0x345   : > { %v1759_v42 = vadd.f32 %v5420_v57, %v1758_v45 }
 0x347   : > { %v1810_v13 = vmax.f32 %v1759_v42, 0.0 }
 0x348   : > { %v5454_v17 = vld.sshfl [vmem:[#allocation1] sm:$0xff pattern:$0x73625140] }
 0x349   : > { %2000 = vst [vmem:[#allocation1] ss:$4 sm:$0xff] %v1864_v15  ;;  %v1866_v43 = vrot.slane %v1810_v13, 2  ;;  %v1867_v31 = vrot.slane %v1810_v13, 4  ;;  %v1868_v18 = vrot.slane %v1810_v13, 6  ;;  %v2186_v11 = vrot.slane %v5454_v17, 1 }
 0x34a   : > { %v1999_v37 = vld.sshfl [vmem:[#allocation1 + $0x20] sm:$0xff pattern:$0x73625140]  ;;  %2001 = vst [vmem:[#allocation1 + $0x1] ss:$4 sm:$0xff] %v1865_v26 }
 0x34b   : > { %2002 = vst [vmem:[#allocation1 + $0x2] ss:$4 sm:$0xff] %v1810_v13  ;;  %v5463_v35 = vsel %vm1927_vm14, %v1999_v37, 0.0  ;;  %v2187_v44 = vsel %vm331_vm0, %v2185_v29, %v2186_v11 }
 0x34c   : > { %2003 = vst [vmem:[#allocation1 + $0x3] ss:$4 sm:$0xff] %v1866_v43  ;;  %v1761_v32 = vpop.f32.mrf.mxu0  ;;  %v2188_v49 = vrot.slane %v5463_v35, 1 }
 0x34d   : > { %2004 = vst [vmem:[#allocation1 + $0x20] ss:$4 sm:$0xff] %v1867_v31  ;;  %v1762_v33 = vadd.f32 %v5420_v57, %v1761_v32 }
 0x34e   : > { %2005 = vst [vmem:[#allocation1 + $0x21] ss:$4 sm:$0xff] %v1868_v18  ;;  %v2189_v25 = vsel %vm331_vm0, %v2186_v11, %v2188_v49 }
 0x34f   : > { %v1811_v38 = vmax.f32 %v1762_v33, 0.0  ;;  %v5470_v14 = vpack.i.bf16 %v2189_v25, %v2187_v44 }
 0x351   : > { %v1869_v19 = vrot.slane %v1811_v38, 2  ;;  %v1870_v5 = vrot.slane %v1811_v38, 4  ;;  %2006 = vst [vmem:[#allocation1 + $0x22] ss:$4 sm:$0xff] %v1811_v38  ;;  %3179 = vrot.lane.b32.xlu1 %v5470_v14, %s3565_s6  ;;  %v1871_v24 = vrot.slane %v1811_v38, 6 }
 0x353   : > { %v2008_v21 = vld.sshfl [vmem:[#allocation1] sm:$0xff pattern:$0x73625140]  ;;  %2007 = vst [vmem:[#allocation1 + $0x23] ss:$4 sm:$0xff] %v1869_v19 }
 0x354   : > { %2010 = vst [vmem:[#allocation1] ss:$4 sm:$0xff] %v1870_v5  ;;  %v1763_v34 = vpop.f32.mrf.mxu0  ;;  %v5477_v40 = vsel %vm1922_vm12, %v2008_v21, 0.0 }
 0x355   : > { %v1764_v1 = vadd.f32 %v5420_v57, %v1763_v34  ;;  %v2190_v3 = vrot.slane %v5477_v40, 1 }
 0x357   : > { %v1812_v4 = vmax.f32 %v1764_v1, 0.0 }
 0x359   : > { %v1872_v30 = vrot.slane %v1812_v4, 2  ;;  %v1873_v62 = vrot.slane %v1812_v4, 4  ;;  %v1874_v0 = vrot.slane %v1812_v4, 6 }
 0x35a   : > { %v5479_v61 = vld.sshfl [vmem:[#allocation1 + $0x20] sm:$0xff pattern:$0x73625140] }
 0x35b   : > { %v2011_v58 = vld.sshfl [vmem:[#allocation1] sm:$0xff pattern:$0x73625140]  ;;  %2012 = vst [vmem:[#allocation1 + $0x20] ss:$4 sm:$0xff] %v1871_v24  ;;  %v2191_v12 = vrot.slane %v5479_v61, 1 }
 0x35c   : > { %2013 = vst [vmem:[#allocation1 + $0x21] ss:$4 sm:$0xff] %v1812_v4  ;;  %v1766_v23 = vpop.f32.mrf.mxu0  ;;  %v5485_v50 = vsel %vm1927_vm14, %v2011_v58, 0.0 }
 0x35d   : > { %2014 = vst [vmem:[#allocation1 + $0x22] ss:$4 sm:$0xff] %v1872_v30  ;;  %v1767_v54 = vadd.f32 %v5420_v57, %v1766_v23  ;;  %v2192_v16 = vsel %vm331_vm0, %v2190_v3, %v2191_v12  ;;  %v2193_v27 = vrot.slane %v5485_v50, 1 }
 0x35e   : > { %2015 = vst [vmem:[#allocation1 + $0x23] ss:$4 sm:$0xff] %v1873_v62 }
 0x35f   : > { %2017 = vst [vmem:[#allocation1] ss:$4 sm:$0xff] %v1874_v0  ;;  %v1813_v2 = vmax.f32 %v1767_v54, 0.0  ;;  %v2194_v9 = vsel %vm331_vm0, %v2191_v12, %v2193_v27 }
 0x360   : > { %v1771_v59 = vpop.f32.mrf.mxu2  ;;  %v5491_v20 = vpack.i.bf16 %v2194_v9, %v2192_v16 }
 0x361   : > { %v1875_v10 = vrot.slane %v1813_v2, 2  ;;  %v1876_v60 = vrot.slane %v1813_v2, 4  ;;  %2018 = vst [vmem:[#allocation1 + $0x1] ss:$4 sm:$0xff] %v1813_v2  ;;  %v1877_v36 = vrot.slane %v1813_v2, 6  ;;  %v1772_v7 = vadd.f32 %v5420_v57, %v1771_v59 }
 0x362   : > { %3184 = vrot.lane.b32.xlu2 %v5491_v20, %s3565_s6 }
 0x363   : > { %2019 = vst [vmem:[#allocation1 + $0x2] ss:$4 sm:$0xff] %v1875_v10  ;;  %v1815_v46 = vmax.f32 %v1772_v7, 0.0 }
 0x364   : > { %2020 = vst [vmem:[#allocation1 + $0x3] ss:$4 sm:$0xff] %v1876_v60  ;;  %v1768_v41 = vpop.f32.mrf.mxu0 }
 0x365   : > { %v2016_v47 = vld.sshfl [vmem:[#allocation1 + $0x20] sm:$0xff pattern:$0x73625140]  ;;  %v1769_v6 = vadd.f32 %v5420_v57, %v1768_v41  ;;  %v1881_v8 = vrot.slane %v1815_v46, 2  ;;  %v1882_v15 = vrot.slane %v1815_v46, 4  ;;  %v1883_v13 = vrot.slane %v1815_v46, 6 }
 0x366   : > { %2021 = vst [vmem:[#allocation1 + $0x20] ss:$4 sm:$0xff] %v1877_v36  ;;  %v5499_v22 = vsel %vm1922_vm12, %v2016_v47, 0.0 }
 0x367   : > { %v1814_v39 = vmax.f32 %v1769_v6, 0.0  ;;  %v2195_v43 = vrot.slane %v5499_v22, 1  ;;  %v2283_v11 = vrot.slane %v5499_v22, 2 }
 0x368   : > { %v1773_v55 = vpop.f32.mrf.mxu2 }
 0x369   : > { %v1774_v31 = vadd.f32 %v5420_v57, %v1773_v55  ;;  %v1878_v18 = vrot.slane %v1814_v39, 2  ;;  %v1879_v32 = vrot.slane %v1814_v39, 4  ;;  %v1880_v25 = vrot.slane %v1814_v39, 6 }
 0x36b   : > { %v5501_v53 = vld.sshfl [vmem:[#allocation1] sm:$0xff pattern:$0x73625140]  ;;  %v1816_v34 = vmax.f32 %v1774_v31, 0.0 }
 0x36c   : > { %2024 = vst [vmem:[#allocation1] ss:$4 sm:$0xff] %v1814_v39  ;;  %v2196_v45 = vrot.slane %v5501_v53, 1  ;;  %v2284_v42 = vrot.slane %v5501_v53, 2 }
 0x36d   : > { %v2023_v26 = vld.sshfl [vmem:[#allocation1 + $0x20] sm:$0xff pattern:$0x73625140]  ;;  %2025 = vst [vmem:[#allocation1 + $0x1] ss:$4 sm:$0xff] %v1878_v18  ;;  %v1884_v4 = vrot.slane %v1816_v34, 2 }
 0x36e   : > { %2028 = vst [vmem:[#allocation1 + $0x20] ss:$4 sm:$0xff] %v1815_v46  ;;  %v2137_v37 = vsel %vm1927_vm14, %v2023_v26, 0.0  ;;  %v2197_v29 = vsel %vm331_vm0, %v2195_v43, %v2196_v45  ;;  %v2285_v38 = vsel %vm472_vm1, %v2283_v11, %v2284_v42  ;;  %v1885_v30 = vrot.slane %v1816_v34, 4 }
 0x36f   : > { %2029 = vst [vmem:[#allocation1 + $0x21] ss:$4 sm:$0xff] %v1881_v8  ;;  %v2198_v49 = vrot.slane %v2137_v37, 1  ;;  %v2286_v33 = vrot.slane %v2137_v37, 2  ;;  %v1886_v3 = vrot.slane %v1816_v34, 6 }
 0x370   : > { %2030 = vst [vmem:[#allocation1 + $0x22] ss:$4 sm:$0xff] %v1882_v15  ;;  %v1776_v44 = vpop.f32.mrf.mxu2 }
 0x371   : > { %2031 = vst [vmem:[#allocation1 + $0x23] ss:$4 sm:$0xff] %v1883_v13  ;;  %v2199_v19 = vsel %vm331_vm0, %v2196_v45, %v2198_v49  ;;  %v2287_v5 = vsel %vm472_vm1, %v2284_v42, %v2286_v33  ;;  %v1777_v24 = vadd.f32 %v5420_v57, %v1776_v44 }
 0x372   : > { %v5514_v21 = vpack.i.bf16 %v2199_v19, %v2197_v29  ;;  %2026 = vst [vmem:[#allocation1 + $0x2] ss:$4 sm:$0xff] %v1879_v32  ;;  %v5516_v1 = vpack.i.bf16 %v2287_v5, %v2285_v38 }
 0x373   : > { %2027 = vst [vmem:[#allocation1 + $0x3] ss:$4 sm:$0xff] %v1880_v25  ;;  %v1817_v58 = vmax.f32 %v1777_v24, 0.0 }
 0x374   : > { %3189 = vrot.lane.b32.xlu0 %v5514_v21, %s3565_s6 }
 0x375   : > { %v1887_v27 = vrot.slane %v1817_v58, 2  ;;  %v1888_v2 = vrot.slane %v1817_v58, 4  ;;  %v1889_v41 = vrot.slane %v1817_v58, 6 }
 0x378   : > { %v1778_v62 = vpop.f32.mrf.mxu2  ;;  %v5521_v0 = vld.sshfl [vmem:[#allocation1 + $0x20] sm:$0xff pattern:$0x73625140] }
 0x379   : > { %2036 = vst [vmem:[#allocation1 + $0x20] ss:$4 sm:$0xff] %v1884_v4  ;;  %v1779_v23 = vadd.f32 %v5420_v57, %v1778_v62  ;;  %v2201_v59 = vrot.slane %v5521_v0, 1  ;;  %v2289_v7 = vrot.slane %v5521_v0, 2 }
 0x37a   : > { %2037 = vst [vmem:[#allocation1 + $0x21] ss:$4 sm:$0xff] %v1885_v30  ;;  %v2032_v12 = vld.sshfl [vmem:[#allocation1] sm:$0xff pattern:$0x73625140] }
 0x37b   : > { %2038 = vst [vmem:[#allocation1 + $0x22] ss:$4 sm:$0xff] %v1886_v3  ;;  %v5526_v16 = vsel %vm1922_vm12, %v2032_v12, 0.0  ;;  %v1818_v9 = vmax.f32 %v1779_v23, 0.0 }
 0x37c   : > { %2034 = vst [vmem:[#allocation1] ss:$4 sm:$0xff] %v1816_v34  ;;  %v2200_v60 = vrot.slane %v5526_v16, 1  ;;  %v2288_v36 = vrot.slane %v5526_v16, 2 }
 0x37d   : > { %2039 = vst [vmem:[#allocation1 + $0x23] ss:$4 sm:$0xff] %v1817_v58  ;;  %v1890_v55 = vrot.slane %v1818_v9, 2  ;;  %v1891_v32 = vrot.slane %v1818_v9, 4  ;;  %v1892_v29 = vrot.slane %v1818_v9, 6 }
 0x37e   : > { %v2202_v45 = vsel %vm331_vm0, %v2200_v60, %v2201_v59  ;;  %v2290_v15 = vsel %vm472_vm1, %v2288_v36, %v2289_v7  ;;  %v2269_v36 = vrot.slane %v5438_v52, 2 }
 0x380   : > { %v1781_v54 = vpop.f32.mrf.mxu2 }
 0x381   : > { %v1782_v39 = vadd.f32 %v5420_v57, %v1781_v54 }
 0x383   : > { %v2035_v10 = vld.sshfl [vmem:[#allocation1] sm:$0xff pattern:$0x73625140]  ;;  %v1819_v18 = vmax.f32 %v1782_v39, 0.0 }
 0x384   : > { %v2140_v47 = vsel %vm1927_vm14, %v2035_v10, 0.0  ;;  %2041 = vst [vmem:[#allocation1] ss:$4 sm:$0xff] %v1887_v27  ;;  %v2040_v46 = vld.sshfl [vmem:[#allocation1 + $0x20] sm:$0xff pattern:$0x73625140] }
 0x385   : > { %v2203_v6 = vrot.slane %v2140_v47, 1  ;;  %2042 = vst [vmem:[#allocation1 + $0x1] ss:$4 sm:$0xff] %v1888_v2  ;;  %v2291_v8 = vrot.slane %v2140_v47, 2  ;;  %v5547_v37 = vsel %vm1922_vm12, %v2040_v46, 0.0  ;;  %v1893_v49 = vrot.slane %v1819_v18, 2 }
 0x386   : > { %2043 = vst [vmem:[#allocation1 + $0x2] ss:$4 sm:$0xff] %v1889_v41  ;;  %v2205_v44 = vrot.slane %v5547_v37, 1  ;;  %v2293_v4 = vrot.slane %v5547_v37, 2  ;;  %v1894_v30 = vrot.slane %v1819_v18, 4  ;;  %v1895_v12 = vrot.slane %v1819_v18, 6 }
 0x387   : > { %v2204_v42 = vsel %vm331_vm0, %v2201_v59, %v2203_v6  ;;  %2044 = vst [vmem:[#allocation1 + $0x3] ss:$4 sm:$0xff] %v1818_v9  ;;  %v2292_v43 = vsel %vm472_vm1, %v2289_v7, %v2291_v8  ;;  %v2271_v10 = vrot.slane %v5445_v51, 2  ;;  %v2268_v6 = vrot.slane %v5442_v63, 2 }
 0x388   : > { %v1783_v13 = vpop.f32.mrf.mxu2  ;;  %v5538_v26 = vpack.i.bf16 %v2204_v42, %v2202_v45  ;;  %2045 = vst [vmem:[#allocation1 + $0x20] ss:$4 sm:$0xff] %v1890_v55  ;;  %v5541_v31 = vpack.i.bf16 %v2292_v43, %v2290_v15 }
 0x389   : > { %v1784_v11 = vadd.f32 %v5420_v57, %v1783_v13  ;;  %v2272_v46 = vsel %vm472_vm1, %v2269_v36, %v2271_v10  ;;  %v2270_v8 = vsel %vm472_vm1, %v2268_v6, %v2269_v36 }
 0x38a   : > { %3194 = vrot.lane.b32.xlu1 %v5538_v26, %s3565_s6  ;;  %v3213_v45 = vpack.i.bf16 %v2272_v46, %v2270_v8  ;;  %v2274_v46 = vrot.slane %v5454_v17, 2 }
 0x38b   : > { %v1820_v19 = vmax.f32 %v1784_v11, 0.0 }
 0x38d   : > { %v1896_v2 = vrot.slane %v1820_v19, 2  ;;  %v1897_v7 = vrot.slane %v1820_v19, 4  ;;  %v1898_v42 = vrot.slane %v1820_v19, 6 }
 0x38e   : > { %v5550_v33 = vld.sshfl [vmem:[#allocation1] sm:$0xff pattern:$0x73625140] }
 0x38f   : > { %v2047_v25 = vld.sshfl [vmem:[#allocation1 + $0x20] sm:$0xff pattern:$0x73625140]  ;;  %v2206_v38 = vrot.slane %v5550_v33, 1  ;;  %2048 = vst [vmem:[#allocation1] ss:$4 sm:$0xff] %v1891_v32 }
 0x390   : > { %v1786_v5 = vpop.f32.mrf.mxu2  ;;  %v2143_v34 = vsel %vm1927_vm14, %v2047_v25, 0.0  ;;  %2049 = vst [vmem:[#allocation1 + $0x1] ss:$4 sm:$0xff] %v1892_v29  ;;  %v2294_v24 = vrot.slane %v5550_v33, 2 }
 0x391   : > { %v2207_v62 = vsel %vm331_vm0, %v2205_v44, %v2206_v38  ;;  %v2208_v3 = vrot.slane %v2143_v34, 1  ;;  %2050 = vst [vmem:[#allocation1 + $0x2] ss:$4 sm:$0xff] %v1819_v18  ;;  %v2296_v58 = vrot.slane %v2143_v34, 2  ;;  %v1787_v60 = vadd.f32 %v5420_v57, %v1786_v5 }
 0x392   : > { %2051 = vst [vmem:[#allocation1 + $0x3] ss:$4 sm:$0xff] %v1893_v49  ;;  %v2295_v23 = vsel %vm472_vm1, %v2293_v4, %v2294_v24 }
 0x393   : > { %v2209_v54 = vsel %vm331_vm0, %v2206_v38, %v2208_v3  ;;  %2052 = vst [vmem:[#allocation1 + $0x20] ss:$4 sm:$0xff] %v1894_v30  ;;  %v2297_v27 = vsel %vm472_vm1, %v2294_v24, %v2296_v58  ;;  %v1821_v39 = vmax.f32 %v1787_v60, 0.0 }
 0x394   : > { %v5562_v9 = vpack.i.bf16 %v2209_v54, %v2207_v62  ;;  %2053 = vst [vmem:[#allocation1 + $0x21] ss:$4 sm:$0xff] %v1895_v12  ;;  %v5564_v59 = vpack.i.bf16 %v2297_v27, %v2295_v23  ;;  %v2276_v54 = vrot.slane %v5463_v35, 2 }
 0x395   : > { %2054 = vst [vmem:[#allocation1 + $0x22] ss:$4 sm:$0xff] %v1820_v19  ;;  %v1899_v43 = vrot.slane %v1821_v39, 2  ;;  %v1900_v11 = vrot.slane %v1821_v39, 4  ;;  %v1901_v32 = vrot.slane %v1821_v39, 6 }
 0x396   : > { %3199 = vrot.lane.b32.xlu2 %v5562_v9, %s3565_s6  ;;  %2055 = vst [vmem:[#allocation1 + $0x23] ss:$4 sm:$0xff] %v1896_v2 }
 0x398   : > { %v1788_v41 = vpop.f32.mrf.mxu2  ;;  %v5571_v47 = vpop.f32.mrf.mxu3 }
 0x399   : > { %v2056_v55 = vld.sshfl [vmem:[#allocation1] sm:$0xff pattern:$0x73625140]  ;;  %v1789_v51 = vadd.f32 %v5420_v57, %v1788_v41 }
 0x39a   : > { %2058 = vst [vmem:[#allocation1] ss:$4 sm:$0xff] %v1897_v7  ;;  %v5579_v15 = vsel %vm1922_vm12, %v2056_v55, 0.0 }
 0x39b   : > { %v1822_v18 = vmax.f32 %v1789_v51, 0.0  ;;  %v2210_v49 = vrot.slane %v5579_v15, 1  ;;  %v2298_v5 = vrot.slane %v5579_v15, 2  ;;  %v2277_v51 = vsel %vm472_vm1, %v2274_v46, %v2276_v54 }
 0x39c   : > { %v5636_v54 = vpack.i.bf16 %v5479_v61, %v5477_v40 }
 0x39d   : > { %v5582_v13 = vld.sshfl [vmem:[#allocation1 + $0x20] sm:$0xff pattern:$0x73625140]  ;;  %v1902_v34 = vrot.slane %v1822_v18, 2  ;;  %v1903_v62 = vrot.slane %v1822_v18, 4  ;;  %v1904_v10 = vrot.slane %v1822_v18, 6 }
 0x39e   : > { %3214 = vrot.lane.b32.xlu2 %v3213_v45, %s3566_s7  ;;  %2060 = vst [vmem:[#allocation1 + $0x20] ss:$4 sm:$0xff] %v1898_v42  ;;  %v2211_v38 = vrot.slane %v5582_v13, 1  ;;  %v2299_v24 = vrot.slane %v5582_v13, 2 }
 0x39f   : > { %2061 = vst [vmem:[#allocation1 + $0x21] ss:$4 sm:$0xff] %v1821_v39  ;;  %v2273_v39 = vrot.slane %v5458_v48, 2 }
 0x3a0   : > { %v1791_v29 = vpop.f32.mrf.mxu2  ;;  %v5585_v44 = vpop.f32.mrf.mxu3  ;;  %2062 = vst [vmem:[#allocation1 + $0x22] ss:$4 sm:$0xff] %v1899_v43  ;;  %v2212_v58 = vsel %vm331_vm0, %v2210_v49, %v2211_v38  ;;  %v2300_v27 = vsel %vm472_vm1, %v2298_v5, %v2299_v24 }
 0x3a1   : > { %v2059_v25 = vld.sshfl [vmem:[#allocation1] sm:$0xff pattern:$0x73625140]  ;;  %2063 = vst [vmem:[#allocation1 + $0x23] ss:$4 sm:$0xff] %v1900_v11  ;;  %v1792_v3 = vadd.f32 %v5420_v57, %v1791_v29  ;;  %v2275_v45 = vsel %vm472_vm1, %v2273_v39, %v2274_v46 }
 0x3a2   : > { %v2146_v19 = vsel %vm1927_vm14, %v2059_v25, 0.0  ;;  %2065 = vst [vmem:[#allocation1] ss:$4 sm:$0xff] %v1901_v32  ;;  %v5621_v11 = vpack.i.bf16 %v2277_v51, %v2275_v45 }
 0x3a3   : > { %v2213_v4 = vrot.slane %v2146_v19, 1  ;;  %v2301_v30 = vrot.slane %v2146_v19, 2  ;;  %2066 = vst [vmem:[#allocation1 + $0x1] ss:$4 sm:$0xff] %v1822_v18  ;;  %v1823_v41 = vmax.f32 %v1792_v3, 0.0 }
 0x3a4   : > { %2067 = vst [vmem:[#allocation1 + $0x2] ss:$4 sm:$0xff] %v1902_v34 }
 0x3a5   : > { %v2214_v12 = vsel %vm331_vm0, %v2211_v38, %v2213_v4  ;;  %2068 = vst [vmem:[#allocation1 + $0x3] ss:$4 sm:$0xff] %v1903_v62  ;;  %v2302_v2 = vsel %vm472_vm1, %v2299_v24, %v2301_v30  ;;  %v1905_v8 = vrot.slane %v1823_v41, 2  ;;  %v1906_v18 = vrot.slane %v1823_v41, 4 }
 0x3a6   : > { %3229 = vrot.lane.b32.xlu2 %v5516_v1, %s3566_s7  ;;  %v5597_v23 = vpack.i.bf16 %v2214_v12, %v2212_v58  ;;  %v5606_v7 = vpack.i.bf16 %v2302_v2, %v2300_v27  ;;  %v1907_v32 = vrot.slane %v1823_v41, 6  ;;  %v1797_v62 = vadd.f32 %v5420_v57, %v5571_v47 }
 0x3a8   : > { %3204 = vrot.lane.b32.xlu0 %v5597_v23, %s3565_s6  ;;  %v1793_v60 = vpop.f32.mrf.mxu2  ;;  %v5604_v36 = vpop.f32.mrf.mxu3  ;;  %v2064_v55 = vld.sshfl [vmem:[#allocation1 + $0x20] sm:$0xff pattern:$0x73625140]  ;;  %v1825_v46 = vmax.f32 %v1797_v62, 0.0 }
 0x3a9   : > { %v1794_v6 = vadd.f32 %v5420_v57, %v1793_v60  ;;  %2069 = vst [vmem:[#allocation1 + $0x20] ss:$4 sm:$0xff] %v1904_v10  ;;  %v5617_v43 = vsel %vm1922_vm12, %v2064_v55, 0.0  ;;  %v2279_v10 = vrot.slane %v5479_v61, 2  ;;  %v2281_v60 = vrot.slane %v5485_v50, 2 }
 0x3aa   : > { %v2215_v38 = vrot.slane %v5617_v43, 1  ;;  %v2303_v30 = vrot.slane %v5617_v43, 2  ;;  %v1799_v55 = vadd.f32 %v5420_v57, %v5585_v44  ;;  %v1911_v45 = vrot.slane %v1825_v46, 2 }
 0x3ab   : > { %v1824_v35 = vmax.f32 %v1794_v6, 0.0  ;;  %v2278_v6 = vrot.slane %v5477_v40, 2  ;;  %v2282_v51 = vsel %vm472_vm1, %v2279_v10, %v2281_v60  ;;  %v1912_v44 = vrot.slane %v1825_v46, 4 }
 0x3ac   : > { %v5613_v42 = vld.sshfl [vmem:[#allocation1] sm:$0xff pattern:$0x73625140] }
 0x3ad   : > { %2072 = vst [vmem:[#allocation1] ss:$4 sm:$0xff] %v1823_v41  ;;  %v1908_v29 = vrot.slane %v1824_v35, 2  ;;  %v2216_v49 = vrot.slane %v5613_v42, 1  ;;  %v1909_v25 = vrot.slane %v1824_v35, 4  ;;  %v2304_v5 = vrot.slane %v5613_v42, 2 }
 0x3ae   : > { %3244 = vrot.lane.b32.xlu2 %v5606_v7, %s3566_s7  ;;  %2073 = vst [vmem:[#allocation1 + $0x1] ss:$4 sm:$0xff] %v1905_v8  ;;  %v1910_v34 = vrot.slane %v1824_v35, 6  ;;  %v2280_v39 = vsel %vm472_vm1, %v2278_v6, %v2279_v10 }
 0x3af   : > { %2074 = vst [vmem:[#allocation1 + $0x2] ss:$4 sm:$0xff] %v1906_v18  ;;  %v2217_v3 = vsel %vm331_vm0, %v2215_v38, %v2216_v49  ;;  %v2305_v27 = vsel %vm472_vm1, %v2303_v30, %v2304_v5  ;;  %v1826_v18 = vmax.f32 %v1799_v55, 0.0  ;;  %v1913_v38 = vrot.slane %v1825_v46, 6 }
 0x3b0   : > { %3219 = vrot.lane.b32.xlu0 %v5621_v11, %s3566_s7  ;;  %v1803_v19 = vpop.f32.mrf.mxu3  ;;  %v2071_v4 = vld.sshfl [vmem:[#allocation1 + $0x20] sm:$0xff pattern:$0x73625140]  ;;  %2075 = vst [vmem:[#allocation1 + $0x3] ss:$4 sm:$0xff] %v1907_v32  ;;  %v1802_v32 = vadd.f32 %v5420_v57, %v5604_v36 }
 0x3b1   : > { %v2149_v24 = vsel %vm1927_vm14, %v2071_v4, 0.0  ;;  %2076 = vst [vmem:[#allocation1 + $0x20] ss:$4 sm:$0xff] %v1824_v35  ;;  %v1914_v30 = vrot.slane %v1826_v18, 2  ;;  %v1915_v57 = vrot.slane %v1826_v18, 4 }
 0x3b2   : > { %v2218_v58 = vrot.slane %v2149_v24, 1  ;;  %2077 = vst [vmem:[#allocation1 + $0x21] ss:$4 sm:$0xff] %v1908_v29  ;;  %v2306_v12 = vrot.slane %v2149_v24, 2  ;;  %v3223_v29 = vpack.i.bf16 %v2282_v51, %v2280_v39  ;;  %v1827_v62 = vmax.f32 %v1802_v32, 0.0 }
 0x3b3   : > { %2078 = vst [vmem:[#allocation1 + $0x22] ss:$4 sm:$0xff] %v1909_v25  ;;  %v3253_v51 = vpack.i.bf16 %v5454_v17, %v5458_v48 }
 0x3b4   : > { %v2219_v2 = vsel %vm331_vm0, %v2216_v49, %v2218_v58  ;;  %2079 = vst [vmem:[#allocation1 + $0x23] ss:$4 sm:$0xff] %v1910_v34  ;;  %v2307_v47 = vsel %vm472_vm1, %v2304_v5, %v2306_v12  ;;  %v5664_v49 = vpack.i.bf16 %v5550_v33, %v5547_v37  ;;  %v1916_v12 = vrot.slane %v1826_v18, 6 }
 0x3b5   : > { %v5643_v41 = vpack.i.bf16 %v2219_v2, %v2217_v3  ;;  %v5650_v35 = vpack.i.bf16 %v2307_v47, %v2305_v27  ;;  %v1917_v55 = vrot.slane %v1827_v62, 2 }
 0x3b6   : > { %3259 = vrot.lane.b32.xlu2 %v5636_v54, %s3567_s8 }
 0x3b7   : > { %3209 = vrot.lane.b32.xlu1 %v5643_v41, %s3565_s6  ;;  %v2080_v50 = vld.sshfl [vmem:[#allocation1] sm:$0xff pattern:$0x73625140] }
 0x3b8   : > { %3234 = vrot.lane.b32.xlu0 %v5541_v31, %s3566_s7  ;;  %2082 = vst [vmem:[#allocation1] ss:$4 sm:$0xff] %v1825_v46  ;;  %v2150_v8 = vsel %vm1922_vm12, %v2080_v50, 0.0  ;;  %v3263_v50 = vpack.i.bf16 %v5501_v53, %v5499_v22 }
 0x3b9   : > { %v2460_v19 = vrot.slane %v2150_v8, 2  ;;  %v2407_v4 = vrot.slane %v2150_v8, 1 }
 0x3bb   : > { %v2081_v25 = vld.sshfl [vmem:[#allocation1 + $0x20] sm:$0xff pattern:$0x73625140] }
 0x3bc   : > { %v2461_v5 = vrot.slane %v2081_v25, 2  ;;  %2084 = vst [vmem:[#allocation1 + $0x20] ss:$4 sm:$0xff] %v1911_v45  ;;  %v5666_v34 = vpack.i.bf16 %v2081_v25, %v2150_v8  ;;  %v2408_v24 = vrot.slane %v2081_v25, 1  ;;  %v3268_v8 = vpack.i.bf16 %v5521_v0, %v5526_v16 }
 0x3bd   : > { %2085 = vst [vmem:[#allocation1 + $0x21] ss:$4 sm:$0xff] %v1912_v44  ;;  %v3283_v45 = vpack.i.bf16 %v5613_v42, %v5617_v43  ;;  %v5729_v44 = vpop.permute.xlu0 %3174 }
 0x3be   : > { %3274 = vrot.lane.b32.xlu2 %v5664_v49, %s3567_s8  ;;  %v2462_v36 = vsel %vm472_vm1, %v2460_v19, %v2461_v5  ;;  %2086 = vst [vmem:[#allocation1 + $0x22] ss:$4 sm:$0xff] %v1913_v38  ;;  %v2409_v58 = vsel %vm331_vm0, %v2407_v4, %v2408_v24 }
 0x3bf   : > { %3224 = vrot.lane.b32.xlu1 %v3223_v29, %s3566_s7  ;;  %v2083_v3 = vld.sshfl [vmem:[#allocation1] sm:$0xff pattern:$0x73625140]  ;;  %2087 = vst [vmem:[#allocation1 + $0x23] ss:$4 sm:$0xff] %v1826_v18  ;;  %v5716_v18 = vpop.permute.xlu2 %3184 }
 0x3c0   : > { %3249 = vrot.lane.b32.xlu0 %v5650_v35, %s3566_s7  ;;  %v2152_v27 = vsel %vm1927_vm14, %v2083_v3, 0.0  ;;  %2089 = vst [vmem:[#allocation1] ss:$4 sm:$0xff] %v1914_v30 }
 0x3c1   : > { %v2463_v2 = vrot.slane %v2152_v27, 2  ;;  %2090 = vst [vmem:[#allocation1 + $0x1] ss:$4 sm:$0xff] %v1915_v57  ;;  %v2410_v10 = vrot.slane %v2152_v27, 1 }
 0x3c2   : > { %2091 = vst [vmem:[#allocation1 + $0x2] ss:$4 sm:$0xff] %v1916_v12 }
 0x3c3   : > { %v2464_v60 = vsel %vm472_vm1, %v2461_v5, %v2463_v2  ;;  %2092 = vst [vmem:[#allocation1 + $0x3] ss:$4 sm:$0xff] %v1827_v62  ;;  %v2411_v47 = vsel %vm331_vm0, %v2408_v24, %v2410_v10  ;;  %v5785_v30 = vpop.permute.xlu1 %3179 }
 0x3c4   : > { %v5679_v6 = vpack.i.bf16 %v2464_v60, %v2462_v36  ;;  %v5681_v46 = vpack.i.bf16 %v2411_v47, %v2409_v58 }
 0x3c6   : > { %3289 = vrot.lane.b32.xlu2 %v5470_v14, %s3568_s9  ;;  %v5687_v39 = vld.sshfl [vmem:[#allocation1 + $0x20] sm:$0xff pattern:$0x73625140]  ;;  %v5698_v14 = vpack.i.bf16 %v5582_v13, %v5579_v15 }
 0x3c7   : > { %3239 = vrot.lane.b32.xlu1 %v5564_v59, %s3566_s7  ;;  %2093 = vst [vmem:[#allocation1 + $0x20] ss:$4 sm:$0xff] %v1917_v55 }
 0x3c8   : > { %3264 = vrot.lane.b32.xlu0 %v3263_v50, %s3567_s8 }
 0x3ce   : > { %3304 = vrot.lane.b32.xlu2 %v5491_v20, %s3571_s12 }
 0x3cf   : > { %3254 = vrot.lane.b32.xlu1 %v3253_v51, %s3567_s8 }
 0x3d0   : > { %3279 = vrot.lane.b32.xlu0 %v5698_v14, %s3567_s8 }
 0x3d6   : > { %3319 = vrot.lane.b32.xlu2 %v3223_v29, %s3569_s10 }
 0x3d7   : > { %3269 = vrot.lane.b32.xlu1 %v3268_v8, %s3567_s8 }
 0x3d8   : > { %3294 = vrot.lane.b32.xlu0 %v5621_v11, %s3569_s10 }
 0x3de   : > { %3334 = vrot.lane.b32.xlu2 %v5516_v1, %s3572_s13 }
 0x3df   : > { %3284 = vrot.lane.b32.xlu1 %v3283_v45, %s3567_s8 }
 0x3e0   : > { %3309 = vrot.lane.b32.xlu0 %v3223_v29, %s3572_s13 }
 0x3e6   : > { %3349 = vrot.lane.b32.xlu2 %v3283_v45, %s3570_s11  ;;  %v3190_v32 = vpop.permute.xlu0 %3189 }
 0x3e7   : > { %3299 = vrot.lane.b32.xlu1 %v5636_v54, %s3570_s11  ;;  %v3191_v29 = vunpack.i.l.bf16 %v3190_v32 }
 0x3e8   : > { %3324 = vrot.lane.b32.xlu0 %v3263_v50, %s3570_s11 }
 0x3e9   : > { %v2676_v5 = vsel %vm1179_vm3, %v5499_v22, %v3191_v29  ;;  %v1943_v22 = vstv %s1942_s30 }
 0x3ea   : > { %vm5767_vm11 = vcmp.eq.s32.totalorder %v1943_v22, 1 }
 0x3eb   : > { %vm1948_vm13 = vmand %vm1922_vm12, %vm5767_vm11 }
 0x3ec   : > { %v5788_v62 = vsel %vm1948_vm13, %v5687_v39, 0.0  ;;  %vm1950_vm12 = vmand %vm1927_vm14, %vm5767_vm11 }
 0x3ed   : > { %v2564_v45 = vrot.slane %v5788_v62, 1 }
 0x3ee   : > { %3364 = vrot.lane.b32.xlu2 %v5514_v21, %s3568_s9 }
 0x3ef   : > { %3314 = vrot.lane.b32.xlu1 %v5491_v20, %s3568_s9  ;;  %v3192_v20 = vunpack.i.h.bf16 %v3190_v32 }
 0x3f0   : > { %3339 = vrot.lane.b32.xlu0 %v5597_v23, %s3568_s9  ;;  %v5727_v11 = vpop.permute.xlu2 %3199 }
 0x3f1   : > { %v2677_v19 = vsel %vm1179_vm3, %v5501_v53, %v3192_v20 }
 0x3f6   : > { %3379 = vrot.lane.b32.xlu2 %v5538_v26, %s3571_s12 }
 0x3f7   : > { %3329 = vrot.lane.b32.xlu1 %v5514_v21, %s3571_s12 }
 0x3f8   : > { %3354 = vrot.lane.b32.xlu0 %v5643_v41, %s3571_s12  ;;  %v5737_v54 = vpop.permute.xlu2 %3214 }
 0x3fe   : > { %3394 = vrot.lane.b32.xlu2 %v5650_v35, %s3569_s10 }
 0x3ff   : > { %3344 = vrot.lane.b32.xlu1 %v5606_v7, %s3569_s10 }
 0x400   : > { %3369 = vrot.lane.b32.xlu0 %v5516_v1, %s3569_s10  ;;  %v3230_v25 = vpop.permute.xlu2 %3229 }
 0x401   : > { %v3232_v21 = vunpack.i.h.bf16 %v3230_v25  ;;  %v3231_v38 = vunpack.i.l.bf16 %v3230_v25 }
 0x403   : > { %v5750_v4 = vsel %vm1210_vm4, %v2677_v19, %v3232_v21  ;;  %v5753_v24 = vsel %vm1210_vm4, %v2676_v5, %v3231_v38  ;;  %v3187_v5 = vunpack.i.h.bf16 %v5716_v18 }
 0x406   : > { %3409 = vrot.lane.b32.xlu2 %v5679_v6, %s3572_s13 }
 0x407   : > { %3359 = vrot.lane.b32.xlu1 %v5650_v35, %s3572_s13  ;;  %v2094_v35 = vld.sshfl [vmem:[#allocation1] sm:$0xff pattern:$0x73625140] }
 0x408   : > { %3384 = vrot.lane.b32.xlu0 %v5541_v31, %s3572_s13  ;;  %v3245_v53 = vpop.permute.xlu2 %3244 }
 0x409   : > { %v3246_v3 = vunpack.i.l.bf16 %v3245_v53 }
 0x40e   : > { %3424 = vrot.lane.b32.xlu2 %v5664_v49, %s3570_s11  ;;  %v5783_v49 = vsel %vm5767_vm11, %v2094_v35, 0.0 }
 0x40f   : > { %3374 = vrot.lane.b32.xlu1 %v3268_v8, %s3570_s11  ;;  %v2565_v39 = vrot.slane %v5783_v49, 1 }
 0x410   : > { %3399 = vrot.lane.b32.xlu0 %v5666_v34, %s3570_s11  ;;  %v5803_v2 = vpop.permute.xlu2 %3259 }
 0x411   : > { %v2566_v19 = vsel %vm331_vm0, %v2564_v45, %v2565_v39  ;;  %v2617_v45 = vrot.slane %v5788_v62, 2 }
 0x416   : > { %3439 = vrot.lane.b32.xlu2 %v5666_v34, %s3567_s8 }
 0x417   : > { %3389 = vrot.lane.b32.xlu1 %v5643_v41, %s3568_s9  ;;  %v3247_v41 = vunpack.i.h.bf16 %v3245_v53 }
 0x418   : > { %3414 = vrot.lane.b32.xlu0 %v5538_v26, %s3568_s9  ;;  %v3453_v26 = vpack.i.bf16 %v5783_v49, %v5788_v62  ;;  %v3275_v28 = vpop.permute.xlu2 %3274 }
 0x419   : > { %v3277_v25 = vunpack.i.h.bf16 %v3275_v28  ;;  %v3276_v21 = vunpack.i.l.bf16 %v3275_v28 }
 0x41a   : > { %v3205_v57 = vpop.permute.xlu0 %3204 }
 0x41b   : > { %v3207_v34 = vunpack.i.h.bf16 %v3205_v57  ;;  %v3206_v36 = vunpack.i.l.bf16 %v3205_v57  ;;  %v2675_v57 = vsel %vm1179_vm3, %v5479_v61, %v3187_v5  ;;  %v3176_v5 = vunpack.i.l.bf16 %v5729_v44 }
 0x41d   : > { %v2683_v56 = vsel %vm1179_vm3, %v5582_v13, %v3207_v34  ;;  %v2682_v58 = vsel %vm1179_vm3, %v5579_v15, %v3206_v36  ;;  %v2095_v15 = vld.sshfl [vmem:[#allocation1 + $0x20] sm:$0xff pattern:$0x73625140]  ;;  %v3195_v13 = vpop.permute.xlu1 %3194  ;;  %v2810_v36 = vld [vmem:[%s6166_s3 + $0x10] sm:$0x3] }
 0x41e   : > { %3454 = vrot.lane.b32.xlu2 %v3453_v26, %s3570_s11  ;;  %v5798_v12 = vsel %vm1210_vm4, %v2682_v58, %v3246_v3  ;;  %v5801_v27 = vsel %vm1210_vm4, %v2683_v56, %v3247_v41  ;;  %v5815_v60 = vsel %vm1950_vm12, %v2095_v15, 0.0  ;;  %v3197_v55 = vunpack.i.h.bf16 %v3195_v13 }
 0x41f   : > { %3404 = vrot.lane.b32.xlu1 %v5681_v46, %s3571_s12  ;;  %v2567_v47 = vrot.slane %v5815_v60, 1  ;;  %v3196_v50 = vunpack.i.l.bf16 %v3195_v13  ;;  %v2840_v61 = vunpack.c.l.b16 %v2810_v36 }
 0x420   : > { %3429 = vrot.lane.b32.xlu0 %v5562_v9, %s3571_s12  ;;  %v2679_v29 = vsel %vm1179_vm3, %v5521_v0, %v3197_v55  ;;  %v3290_v28 = vpop.permute.xlu2 %3289 }
 0x422   : > { %v5813_v10 = vpop.permute.xlu0 %3219 }
 0x426   : > { %3469 = vrot.lane.b32.xlu2 %v5562_v9, %s3568_s9  ;;  %v2568_v9 = vsel %vm331_vm0, %v2565_v39, %v2567_v47  ;;  %v2618_v39 = vrot.slane %v5783_v49, 2  ;;  %v3113_v49 = vld [vmem:[%s6166_s3] sm:$0xff]  ;;  %vm6622_vm0 = vcmask 293888  }
 0x427   : > { %3419 = vrot.lane.b32.xlu1 %v5541_v31, %s3569_s10  ;;  %v2678_v31 = vsel %vm1179_vm3, %v5526_v16, %v3196_v50  ;;  %v3458_v22 = vpack.i.bf16 %v2568_v9, %v2566_v19  ;;  %v3186_v16 = vunpack.i.l.bf16 %v5716_v18  ;;  %v3177_v19 = vunpack.i.h.bf16 %v5729_v44  ;;  %vm6626_vm14 = vmmov %vm6622_vm0 }
 0x428   : > { %3444 = vrot.lane.b32.xlu0 %v5681_v46, %s3568_s9  ;;  %vm6627_vm15 = vmmov %vm6622_vm0 }
 0x429   : > { %v3210_v51 = vpop.permute.xlu1 %3209  ;;  %v2674_v56 = vsel %vm1179_vm3, %v5477_v40, %v3186_v16  ;;  %v2843_v40 = vpack.c.b16 %v2840_v61, %v2840_v61  ;;  %v3217_v16 = vunpack.i.h.bf16 %v5737_v54 }
 0x42a   : > { %v3235_v8 = vpop.permute.xlu0 %3234  ;;  %v3212_v1 = vunpack.i.h.bf16 %v3210_v51  ;;  %v3211_v35 = vunpack.i.l.bf16 %v3210_v51 }
 0x42b   : > { %v3237_v32 = vunpack.i.h.bf16 %v3235_v8  ;;  %v3236_v20 = vunpack.i.l.bf16 %v3235_v8 }
 0x42c   : > { %v2685_v58 = vsel %vm1179_vm3, %v5613_v42, %v3212_v1  ;;  %v2684_v15 = vsel %vm1179_vm3, %v5617_v43, %v3211_v35  ;;  %v2620_v42 = vrot.slane %v5815_v60, 2  ;;  %v2871_v43 = vsel %vm1733_vm2, %v2843_v40, 0  ;;  %v3114_v60 = vld [vmem:[%s6166_s3 + $0x8] sm:$0xff]  ;;  %vm6624_vm2 = vmmov %vm6622_vm0 }
 0x42d   : > { %v2695_v46 = vsel %vm1210_vm4, %v2679_v29, %v3237_v32  ;;  %v2694_v38 = vsel %vm1210_vm4, %v2678_v31, %v3236_v20  ;;  %2878 = vmatpush.bf16.msra.mxu1 %v2871_v43  ;;  %3121 = vmatpush.bf16.msrb.mxu3 %v2871_v43  ;;  %v3305_v20 = vpop.permute.xlu2 %3304  ;;  %v3216_v1 = vunpack.i.l.bf16 %v5737_v54 }
 0x42e   : > { %3484 = vrot.lane.b32.xlu2 %v5597_v23, %s3571_s12  ;;  %v5838_v53 = vsel %vm1241_vm5, %v2694_v38, %v3276_v21  ;;  %v5841_v0 = vsel %vm1241_vm5, %v2695_v46, %v3277_v25  ;;  %v3307_v43 = vunpack.i.h.bf16 %v3305_v20 }
 0x42f   : > { %3434 = vrot.lane.b32.xlu1 %v5564_v59, %s3572_s13 }
 0x430   : > { %3459 = vrot.lane.b32.xlu0 %v3458_v22, %s3571_s12 }
 0x431   : > { %v3225_v23 = vpop.permute.xlu1 %3224  ;;  %2879 = vmatpush.bf16.msra.mxu1 %v3114_v60  ;;  %3122 = vmatpush.bf16.msrb.mxu3 %v3114_v60 }
 0x432   : > { %v3250_v34 = vpop.permute.xlu0 %3249  ;;  %v3227_v41 = vunpack.i.h.bf16 %v3225_v23  ;;  %v3226_v3 = vunpack.i.l.bf16 %v3225_v23 }
 0x433   : > { %v3252_v26 = vunpack.i.h.bf16 %v3250_v34  ;;  %v3251_v18 = vunpack.i.l.bf16 %v3250_v34 }
 0x434   : > { %v5859_v13 = vsel %vm1210_vm4, %v2675_v57, %v3227_v41  ;;  %v5862_v47 = vsel %vm1210_vm4, %v2674_v56, %v3226_v3  ;;  %v3182_v56 = vunpack.i.h.bf16 %v5785_v30 }
 0x435   : > { %v5865_v55 = vsel %vm1210_vm4, %v2684_v15, %v3251_v18  ;;  %v5868_v50 = vsel %vm1210_vm4, %v2685_v58, %v3252_v26  ;;  %2880 = vmatpush.bf16.msra.mxu1 %v3113_v49  ;;  %3123 = vmatpush.bf16.msrb.mxu3 %v3113_v49  ;;  %v5897_v25 = vpop.permute.xlu2 %3319  ;;  %v3292_v26 = vunpack.i.h.bf16 %v3290_v28  ;;  %v3291_v18 = vunpack.i.l.bf16 %v3290_v28 }
 0x436   : > { %v3181_v58 = vunpack.i.l.bf16 %v5785_v30  ;;  %v3222_v49 = vunpack.i.h.bf16 %v5813_v10 }
 0x437   : > { %3449 = vrot.lane.b32.xlu1 %v5679_v6, %s3569_s10  ;;  %v2621_v6 = vsel %vm472_vm1, %v2618_v39, %v2620_v42 }
 0x438   : > { %3474 = vrot.lane.b32.xlu0 %v5564_v59, %s3569_s10  ;;  %v2619_v59 = vsel %vm472_vm1, %v2617_v45, %v2618_v39  ;;  %v3306_v39 = vunpack.i.l.bf16 %v3305_v20  ;;  %vm6623_vm1 = vmmov %vm6622_vm0 }
 0x439   : > { %v5877_v51 = vpop.permute.xlu1 %3239  ;;  %v3463_v32 = vpack.i.bf16 %v2621_v6, %v2619_v59 }
 0x43a   : > { %v5879_v8 = vpop.permute.xlu0 %3264 }
 0x43d   : > { %v5913_v23 = vpop.permute.xlu2 %3334 }
 0x43f   : > { %3464 = vrot.lane.b32.xlu1 %v3463_v32, %s3572_s13  ;;  %v3221_v32 = vunpack.i.l.bf16 %v5813_v10 }
 0x440   : > { %3489 = vrot.lane.b32.xlu0 %v5606_v7, %s3572_s13 }
 0x441   : > { %v3255_v9 = vpop.permute.xlu1 %3254 }
 0x442   : > { %v5893_v62 = vpop.permute.xlu0 %3279  ;;  %v3257_v35 = vunpack.i.h.bf16 %v3255_v9  ;;  %v3256_v57 = vunpack.i.l.bf16 %v3255_v9 }
 0x447   : > { %3479 = vrot.lane.b32.xlu1 %v5698_v14, %s3570_s11  ;;  %s3069_s11 = sshll.u32 %s3547_s18, 3 }
 0x448   : > { %p256_p9 = scmp.lt.s32.totalorder %s3069_s11, 15 }
 0x449   : > { %v3270_v29 = vpop.permute.xlu1 %3269 }
 0x44a   : > { %v3295_v31 = vpop.permute.xlu0 %3294  ;;  %v3272_v21 = vunpack.i.h.bf16 %v3270_v29  ;;  %v3271_v46 = vunpack.i.l.bf16 %v3270_v29  ;;  %s6661_s11 = smov (!%p256_p9, %s3069_s11), 15 }
 0x44b   : > { %v3297_v3 = vunpack.i.h.bf16 %v3295_v31  ;;  %v3296_v54 = vunpack.i.l.bf16 %v3295_v31  ;;  %v5935_v31 = vpop.permute.xlu2 %3349  ;;  %s3070_s13 = sshll.u32 %s6661_s11, 1 }
 0x44c   : > { %v5901_v38 = vsel %vm1241_vm5, %v5750_v4, %v3272_v21  ;;  %v5905_v7 = vsel %vm1241_vm5, %v5753_v24, %v3271_v46  ;;  %v2671_v4 = vsel %vm1179_vm3, %v5438_v52, %v3177_v19  ;;  %v2670_v24 = vsel %vm1179_vm3, %v5442_v63, %v3176_v5  ;;  %s260_s17 = sadd.s32 %s3071_s14, %s3070_s13 }
 0x44d   : > { %v2687_v34 = vsel %vm1210_vm4, %v2671_v4, %v3217_v16  ;;  %v2686_v44 = vsel %vm1210_vm4, %v2670_v24, %v3216_v1  ;;  %v2673_v19 = vsel %vm1179_vm3, %v5454_v17, %v3182_v56  ;;  %v2672_v5 = vsel %vm1179_vm3, %v5458_v48, %v3181_v58  ;;  %s3072_s25 = sshll.u32 %s260_s17, 3 }
 0x44e   : > { %v2703_v36 = vsel %vm1241_vm5, %v2687_v34, %v3257_v35  ;;  %v2702_v41 = vsel %vm1241_vm5, %v2686_v44, %v3256_v57  ;;  %v2688_v10 = vsel %vm1210_vm4, %v2672_v5, %v3221_v32  ;;  %v3262_v35 = vunpack.i.h.bf16 %v5803_v2  ;;  %s6084_s27 = scalar_lea.vmem %s6168_s5, %s3072_s25 }
 0x44f   : > { %v2718_v63 = vsel %vm1272_vm6, %v2702_v41, %v3291_v18  ;;  %v2719_v61 = vsel %vm1272_vm6, %v2703_v36, %v3292_v26  ;;  %v3261_v57 = vunpack.i.l.bf16 %v5803_v2  ;;  %v3322_v36 = vunpack.i.h.bf16 %v5897_v25 }
 0x450   : > { %v2734_v60 = vsel %vm1303_vm7, %v2718_v63, %v3296_v54  ;;  %v2735_v45 = vsel %vm1303_vm7, %v2719_v61, %v3297_v3  ;;  %v3321_v41 = vunpack.i.l.bf16 %v5897_v25  ;;  %v3337_v61 = vunpack.i.h.bf16 %v5913_v23 }
 0x451   : > { %v5909_v22 = vpop.permute.xlu1 %3284  ;;  %v2704_v34 = vsel %vm1241_vm5, %v2688_v10, %v3261_v57  ;;  %v3351_v57 = vunpack.i.l.bf16 %v5935_v31 }
 0x452   : > { %v3310_v14 = vpop.permute.xlu0 %3309 }
 0x453   : > { %v3312_v6 = vunpack.i.h.bf16 %v3310_v14  ;;  %v3311_v28 = vunpack.i.l.bf16 %v3310_v14  ;;  %v2689_v14 = vsel %vm1210_vm4, %v2673_v19, %v3222_v49  ;;  %v5954_v3 = vpop.permute.xlu2 %3364  ;;  %v3281_v49 = vunpack.i.l.bf16 %v5893_v62 }
 0x454   : > { %v2705_v17 = vsel %vm1241_vm5, %v2689_v14, %v3262_v35  ;;  %v3352_v35 = vunpack.i.h.bf16 %v5935_v31  ;;  %v3267_v31 = vunpack.i.h.bf16 %v5879_v8 }
 0x459   : > { %v3300_v52 = vpop.permute.xlu1 %3299 }
 0x45a   : > { %v3325_v15 = vpop.permute.xlu0 %3324  ;;  %v3302_v40 = vunpack.i.h.bf16 %v3300_v52  ;;  %v3301_v42 = vunpack.i.l.bf16 %v3300_v52 }
 0x45b   : > { %v3327_v26 = vunpack.i.h.bf16 %v3325_v15  ;;  %v3326_v18 = vunpack.i.l.bf16 %v3325_v15  ;;  %v3201_v15 = vunpack.i.l.bf16 %v5727_v11  ;;  %v3380_v19 = vpop.permute.xlu2 %3379 }
 0x45c   : > { %v2750_v59 = vsel %vm1334_vm8, %v2734_v60, %v3301_v42  ;;  %v2751_v30 = vsel %vm1334_vm8, %v2735_v45, %v3302_v40  ;;  %v3336_v40 = vunpack.i.l.bf16 %v5913_v23  ;;  %v3202_v60 = vunpack.i.h.bf16 %v5727_v11 }
 0x45d   : > { %v2766_v9 = vsel %vm1365_vm9, %v2750_v59, %v3306_v39  ;;  %v2767_v29 = vsel %vm1365_vm9, %v2751_v30, %v3307_v43  ;;  %v3241_v23 = vunpack.i.l.bf16 %v5877_v51  ;;  %v3282_v30 = vunpack.i.h.bf16 %v5893_v62 }
 0x45e   : > { %v2782_v20 = vsel %vm1396_vm10, %v2766_v9, %v3311_v28  ;;  %v2783_v21 = vsel %vm1396_vm10, %v2767_v29, %v3312_v6  ;;  %v3242_v28 = vunpack.i.h.bf16 %v5877_v51  ;;  %v2681_v29 = vsel %vm1179_vm3, %v5550_v33, %v3202_v60 }
 0x45f   : > { %v2798_v46 = vpack.c.bf16 %v2783_v21, %v2782_v20  ;;  %v2680_v11 = vsel %vm1179_vm3, %v5547_v37, %v3201_v15 }
 0x460   : > { %v2696_v51 = vsel %vm1210_vm4, %v2680_v11, %v3241_v23 }
 0x461   : > { %v3315_v16 = vpop.permute.xlu1 %3314  ;;  %3101 = vmatmul.msk.bf16.vlgmr.msra.gmra.mxu1 %vm6622_vm0, %v2798_v46  ;;  %v2697_v46 = vsel %vm1210_vm4, %v2681_v29, %v3242_v28  ;;  %v2712_v62 = vsel %vm1241_vm5, %v2696_v51, %v3281_v49  ;;  %v3382_v28 = vunpack.i.h.bf16 %v3380_v19  ;;  %v3286_v51 = vunpack.i.l.bf16 %v5909_v22  ;;  %vm6625_vm4 = vmmov %vm6622_vm0 }
 0x462   : > { %v3340_v1 = vpop.permute.xlu0 %3339  ;;  %v3317_v4 = vunpack.i.h.bf16 %v3315_v16  ;;  %v3316_v24 = vunpack.i.l.bf16 %v3315_v16  ;;  %v2713_v10 = vsel %vm1241_vm5, %v2697_v46, %v3282_v30  ;;  %v3287_v46 = vunpack.i.h.bf16 %v5909_v22 }
 0x463   : > { %v3342_v32 = vunpack.i.h.bf16 %v3340_v1  ;;  %v3341_v9 = vunpack.i.l.bf16 %v3340_v1 }
 0x464   : > { %v2721_v48 = vsel %vm1272_vm6, %v2705_v17, %v3317_v4  ;;  %v2720_v44 = vsel %vm1272_vm6, %v2704_v34, %v3316_v24 }
 0x465   : > { %v2737_v54 = vsel %vm1303_vm7, %v2721_v48, %v3322_v36  ;;  %v2736_v2 = vsel %vm1303_vm7, %v2720_v44, %v3321_v41  ;;  %v2728_v33 = vsel %vm1272_vm6, %v2712_v62, %v3341_v9  ;;  %v2729_v16 = vsel %vm1272_vm6, %v2713_v10, %v3342_v32 }
 0x466   : > { %v2752_v42 = vsel %vm1334_vm8, %v2736_v2, %v3326_v18  ;;  %v2753_v25 = vsel %vm1334_vm8, %v2737_v54, %v3327_v26  ;;  %v3395_v26 = vpop.permute.xlu2 %3394  ;;  %v2715_v10 = vsel %vm1241_vm5, %v5801_v27, %v3287_v46 }
 0x469   : > { %v3330_v56 = vpop.permute.xlu1 %3329 }
 0x46a   : > { %v3355_v58 = vpop.permute.xlu0 %3354  ;;  %v3332_v52 = vunpack.i.h.bf16 %v3330_v56  ;;  %v3331_v63 = vunpack.i.l.bf16 %v3330_v56 }
 0x46b   : > { %v3357_v34 = vunpack.i.h.bf16 %v3355_v58  ;;  %v3356_v17 = vunpack.i.l.bf16 %v3355_v58  ;;  %v3367_v58 = vunpack.i.h.bf16 %v5954_v3 }
 0x46c   : > { %v2768_v43 = vsel %vm1365_vm9, %v2752_v42, %v3331_v63  ;;  %v2769_v39 = vsel %vm1365_vm9, %v2753_v25, %v3332_v52  ;;  %v3266_v52 = vunpack.i.l.bf16 %v5879_v8 }
 0x46d   : > { %v2784_v45 = vsel %vm1396_vm10, %v2768_v43, %v3336_v40  ;;  %v2785_v6 = vsel %vm1396_vm10, %v2769_v39, %v3337_v61  ;;  %v3366_v61 = vunpack.i.l.bf16 %v5954_v3  ;;  %v2707_v43 = vsel %vm1241_vm5, %v5859_v13, %v3267_v31 }
 0x46e   : > { %v2799_v59 = vpack.c.bf16 %v2785_v6, %v2784_v45  ;;  %v2706_v25 = vsel %vm1241_vm5, %v5862_v47, %v3266_v52  ;;  %v2723_v8 = vsel %vm1272_vm6, %v2707_v43, %v3367_v58  ;;  %v3381_v3 = vunpack.i.l.bf16 %v3380_v19  ;;  %v3410_v29 = vpop.permute.xlu2 %3409 }
 0x46f   : > { %v2722_v15 = vsel %vm1272_vm6, %v2706_v25, %v3366_v61 }
 0x471   : > { %v3345_v20 = vpop.permute.xlu1 %3344  ;;  %3102 = vmatmul.msk.bf16.gmra.mxu1 %vm6623_vm1, %v2799_v59 }
 0x472   : > { %v3370_v21 = vpop.permute.xlu0 %3369  ;;  %v3347_v5 = vunpack.i.h.bf16 %v3345_v20  ;;  %v3346_v14 = vunpack.i.l.bf16 %v3345_v20 }
 0x473   : > { %v3372_v40 = vunpack.i.h.bf16 %v3370_v21  ;;  %v3371_v42 = vunpack.i.l.bf16 %v3370_v21 }
 0x474   : > { %v2744_v37 = vsel %vm1303_vm7, %v2728_v33, %v3346_v14  ;;  %v2745_v1 = vsel %vm1303_vm7, %v2729_v16, %v3347_v5  ;;  %v2714_v33 = vsel %vm1241_vm5, %v5798_v12, %v3286_v51 }
 0x475   : > { %v2760_v4 = vsel %vm1334_vm8, %v2744_v37, %v3351_v57  ;;  %v2761_v24 = vsel %vm1334_vm8, %v2745_v1, %v3352_v35  ;;  %v2738_v23 = vsel %vm1303_vm7, %v2722_v15, %v3371_v42  ;;  %v2739_v59 = vsel %vm1303_vm7, %v2723_v8, %v3372_v40 }
 0x476   : > { %v2776_v54 = vsel %vm1365_vm9, %v2760_v4, %v3356_v17  ;;  %v2777_v2 = vsel %vm1365_vm9, %v2761_v24, %v3357_v34  ;;  %v3397_v1 = vunpack.i.h.bf16 %v3395_v26  ;;  %v3396_v35 = vunpack.i.l.bf16 %v3395_v26  ;;  %v3425_v57 = vpop.permute.xlu2 %3424 }
 0x477   : > { %v3427_v8 = vunpack.i.h.bf16 %v3425_v57 }
 0x479   : > { %v3360_v48 = vpop.permute.xlu1 %3359 }
 0x47a   : > { %v3385_v44 = vpop.permute.xlu0 %3384  ;;  %v3362_v36 = vunpack.i.h.bf16 %v3360_v48  ;;  %v3361_v41 = vunpack.i.l.bf16 %v3360_v48 }
 0x47b   : > { %v3387_v30 = vunpack.i.h.bf16 %v3385_v44  ;;  %v3386_v49 = vunpack.i.l.bf16 %v3385_v44 }
 0x47c   : > { %v2792_v18 = vsel %vm1396_vm10, %v2776_v54, %v3361_v41  ;;  %v2793_v56 = vsel %vm1396_vm10, %v2777_v2, %v3362_v36  ;;  %v3412_v36 = vunpack.i.h.bf16 %v3410_v29  ;;  %v3411_v41 = vunpack.i.l.bf16 %v3410_v29 }
 0x47d   : > { %v2803_v63 = vpack.c.bf16 %v2793_v56, %v2792_v18 }
 0x47e   : > { %v3440_v61 = vpop.permute.xlu2 %3439 }
 0x47f   : > { %3106 = vmatmul.msk.bf16.vlgmr.msrb.gmra.mxu3 %vm6624_vm2, %v2803_v63 }
 0x481   : > { %v3375_v39 = vpop.permute.xlu1 %3374 }
 0x482   : > { %v3400_v60 = vpop.permute.xlu0 %3399  ;;  %v3377_v45 = vunpack.i.h.bf16 %v3375_v39  ;;  %v3376_v6 = vunpack.i.l.bf16 %v3375_v39 }
 0x483   : > { %v3402_v24 = vunpack.i.h.bf16 %v3400_v60  ;;  %v3401_v34 = vunpack.i.l.bf16 %v3400_v60 }
 0x484   : > { %v2754_v47 = vsel %vm1334_vm8, %v2738_v23, %v3376_v6  ;;  %v2755_v13 = vsel %vm1334_vm8, %v2739_v59, %v3377_v45  ;;  %v3426_v45 = vunpack.i.l.bf16 %v3425_v57 }
 0x485   : > { %v2770_v32 = vsel %vm1365_vm9, %v2754_v47, %v3381_v3  ;;  %v2771_v9 = vsel %vm1365_vm9, %v2755_v13, %v3382_v28 }
 0x486   : > { %v2786_v11 = vsel %vm1396_vm10, %v2770_v32, %v3386_v49  ;;  %v2787_v20 = vsel %vm1396_vm10, %v2771_v9, %v3387_v30 }
 0x487   : > { %v2800_v21 = vpack.c.bf16 %v2787_v20, %v2786_v11  ;;  %v3442_v11 = vunpack.i.h.bf16 %v3440_v61  ;;  %v3441_v20 = vunpack.i.l.bf16 %v3440_v61 }
 0x489   : > { %v3390_v19 = vpop.permute.xlu1 %3389  ;;  %3103 = vmatmul.msk.bf16.gmra.mxu1 %vm6625_vm4, %v2800_v21 }
 0x48a   : > { %v3415_v5 = vpop.permute.xlu0 %3414  ;;  %v3392_v14 = vunpack.i.h.bf16 %v3390_v19  ;;  %v3391_v62 = vunpack.i.l.bf16 %v3390_v19 }
 0x48b   : > { %v3417_v52 = vunpack.i.h.bf16 %v3415_v5  ;;  %v3416_v63 = vunpack.i.l.bf16 %v3415_v5 }
 0x48c   : > { %v2730_v16 = vsel %vm1272_vm6, %v2714_v33, %v3391_v62  ;;  %v2731_v37 = vsel %vm1272_vm6, %v2715_v10, %v3392_v14  ;;  %v2717_v14 = vsel %vm1241_vm5, %v5868_v50, %v3442_v11  ;;  %v2716_v62 = vsel %vm1241_vm5, %v5865_v55, %v3441_v20  ;;  %vm6628_vm5 = vmmov %vm6622_vm0 }
 0x48d   : > { %v2746_v22 = vsel %vm1303_vm7, %v2730_v16, %v3396_v35  ;;  %v2747_v4 = vsel %vm1303_vm7, %v2731_v37, %v3397_v1  ;;  %v2725_v43 = vsel %vm1272_vm6, %v5901_v38, %v3417_v52  ;;  %v2724_v39 = vsel %vm1272_vm6, %v5905_v7, %v3416_v63  ;;  %v3455_v7 = vpop.permute.xlu2 %3454 }
 0x48e   : > { %v2763_v12 = vsel %vm1334_vm8, %v2747_v4, %v3402_v24  ;;  %v2762_v54 = vsel %vm1334_vm8, %v2746_v22, %v3401_v34  ;;  %v3457_v1 = vunpack.i.h.bf16 %v3455_v7  ;;  %v3456_v35 = vunpack.i.l.bf16 %v3455_v7 }
 0x491   : > { %v3405_v17 = vpop.permute.xlu1 %3404 }
 0x492   : > { %v3430_v48 = vpop.permute.xlu0 %3429  ;;  %v3407_v44 = vunpack.i.h.bf16 %v3405_v17  ;;  %v3406_v27 = vunpack.i.l.bf16 %v3405_v17 }
 0x493   : > { %v3432_v3 = vunpack.i.h.bf16 %v3430_v48  ;;  %v3431_v23 = vunpack.i.l.bf16 %v3430_v48 }
 0x494   : > { %v2779_v2 = vsel %vm1365_vm9, %v2763_v12, %v3407_v44  ;;  %v2778_v26 = vsel %vm1365_vm9, %v2762_v54, %v3406_v27 }
 0x495   : > { %v2794_v18 = vsel %vm1396_vm10, %v2778_v26, %v3411_v41  ;;  %v2795_v56 = vsel %vm1396_vm10, %v2779_v2, %v3412_v36  ;;  %v3470_v57 = vpop.permute.xlu2 %3469 }
 0x496   : > { %v2804_v31 = vpack.c.bf16 %v2795_v56, %v2794_v18  ;;  %v3472_v54 = vunpack.i.h.bf16 %v3470_v57  ;;  %v3471_v2 = vunpack.i.l.bf16 %v3470_v57 }
 0x498   : > { %3107 = vmatmul.msk.bf16.gmra.mxu3 %vm6626_vm14, %v2804_v31  ;;  %v2727_v63 = vsel %vm1272_vm6, %v5841_v0, %v3472_v54 }
 0x499   : > { %v3420_v58 = vpop.permute.xlu1 %3419 }
 0x49a   : > { %v3422_v40 = vunpack.i.h.bf16 %v3420_v58  ;;  %v3421_v42 = vunpack.i.l.bf16 %v3420_v58  ;;  %v3445_v25 = vpop.permute.xlu0 %3444  ;;  %v2726_v58 = vsel %vm1272_vm6, %v5838_v53, %v3471_v2 }
 0x49b   : > { %v3447_v21 = vunpack.i.h.bf16 %v3445_v25  ;;  %v3446_v46 = vunpack.i.l.bf16 %v3445_v25 }
 0x49c   : > { %v2741_v60 = vsel %vm1303_vm7, %v2725_v43, %v3422_v40  ;;  %v2740_v15 = vsel %vm1303_vm7, %v2724_v39, %v3421_v42 }
 0x49d   : > { %v2757_v6 = vsel %vm1334_vm8, %v2741_v60, %v3427_v8  ;;  %v2756_v28 = vsel %vm1334_vm8, %v2740_v15, %v3426_v45  ;;  %v2733_v10 = vsel %vm1272_vm6, %v2717_v14, %v3447_v21  ;;  %v2732_v33 = vsel %vm1272_vm6, %v2716_v62, %v3446_v46  ;;  %v3485_v56 = vpop.permute.xlu2 %3484  ;;  %vm6629_vm6 = vmmov %vm6622_vm0  ;;  %v6632_v21 = vld [vmem:[#allocation19_spill] sm:$0xff]  ;;  %v6633_v14 = vld [vmem:[#allocation18_spill] sm:$0xff] }
 0x49e   : > { %v2772_v38 = vsel %vm1365_vm9, %v2756_v28, %v3431_v23  ;;  %v2773_v47 = vsel %vm1365_vm9, %v2757_v6, %v3432_v3  ;;  %v3487_v42 = vunpack.i.h.bf16 %v3485_v56  ;;  %v3486_v25 = vunpack.i.l.bf16 %v3485_v56  ;;  %v6077_v23 = vld [vmem:[%s6167_s4] ss:$0 sm:$0xff] }
 0x4a1   : > { %v3435_v59 = vpop.permute.xlu1 %3434 }
 0x4a2   : > { %v3437_v30 = vunpack.i.h.bf16 %v3435_v59  ;;  %v3436_v49 = vunpack.i.l.bf16 %v3435_v59  ;;  %v3460_v29 = vpop.permute.xlu0 %3459 }
 0x4a3   : > { %v3462_v50 = vunpack.i.h.bf16 %v3460_v29  ;;  %v3461_v34 = vunpack.i.l.bf16 %v3460_v29 }
 0x4a4   : > { %v2788_v13 = vsel %vm1396_vm10, %v2772_v38, %v3436_v49  ;;  %v2789_v32 = vsel %vm1396_vm10, %v2773_v47, %v3437_v30  ;;  %v6630_v49 = vld [vmem:[#allocation15_spill] sm:$0xff] }
 0x4a5   : > { %v2801_v9 = vpack.c.bf16 %v2789_v32, %v2788_v13  ;;  %v6631_v32 = vld [vmem:[#allocation14_spill] sm:$0xff] }
 0x4a7   : > { %3104 = vmatmul.msk.bf16.gmra.mxu1 %vm6627_vm15, %v2801_v9 }
 0x4a9   : > { %v3450_v51 = vpop.permute.xlu1 %3449 }
 0x4aa   : > { %v3452_v19 = vunpack.i.h.bf16 %v3450_v51  ;;  %v3451_v5 = vunpack.i.l.bf16 %v3450_v51  ;;  %v3475_v22 = vpop.permute.xlu0 %3474 }
 0x4ab   : > { %v3477_v26 = vunpack.i.h.bf16 %v3475_v22  ;;  %v3476_v18 = vunpack.i.l.bf16 %v3475_v22 }
 0x4ac   : > { %v2749_v16 = vsel %vm1303_vm7, %v2733_v10, %v3452_v19  ;;  %v2748_v37 = vsel %vm1303_vm7, %v2732_v33, %v3451_v5 }
 0x4ad   : > { %v2764_v4 = vsel %vm1334_vm8, %v2748_v37, %v3456_v35  ;;  %v2765_v24 = vsel %vm1334_vm8, %v2749_v16, %v3457_v1  ;;  %v2743_v43 = vsel %vm1303_vm7, %v2727_v63, %v3477_v26  ;;  %v2742_v39 = vsel %vm1303_vm7, %v2726_v58, %v3476_v18  ;;  %v6634_v37 = vld [vmem:[#allocation41_spill] sm:$0xff]  ;;  %v6638_v18 = vld [vmem:[#allocation47_spill] sm:$0xff] }
 0x4ae   : > { %v2781_v44 = vsel %vm1365_vm9, %v2765_v24, %v3462_v50  ;;  %v2780_v27 = vsel %vm1365_vm9, %v2764_v4, %v3461_v34  ;;  %v6635_v4 = vld [vmem:[#allocation23_spill] sm:$0xff] }
 0x4b1   : > { %v3465_v17 = vpop.permute.xlu1 %3464 }
 0x4b2   : > { %v3467_v55 = vunpack.i.h.bf16 %v3465_v17  ;;  %v3466_v48 = vunpack.i.l.bf16 %v3465_v17  ;;  %v3490_v52 = vpop.permute.xlu0 %3489 }
 0x4b3   : > { %v3492_v8 = vunpack.i.h.bf16 %v3490_v52  ;;  %v3491_v0 = vunpack.i.l.bf16 %v3490_v52 }
 0x4b4   : > { %v2796_v36 = vsel %vm1396_vm10, %v2780_v27, %v3466_v48  ;;  %v2797_v41 = vsel %vm1396_vm10, %v2781_v44, %v3467_v55  ;;  %v6636_v55 = vld [vmem:[#allocation40_spill] sm:$0xff] }
 0x4b5   : > { %v2805_v12 = vpack.c.bf16 %v2797_v41, %v2796_v36  ;;  %v6637_v41 = vld [vmem:[#allocation22_spill] sm:$0xff] }
 0x4b7   : > { %3108 = vmatmul.msk.bf16.gmra.mxu3 %vm6628_vm5, %v2805_v12 }
 0x4b9   : > { %v3480_v31 = vpop.permute.xlu1 %3479 }
 0x4ba   : > { %v3482_v61 = vunpack.i.h.bf16 %v3480_v31  ;;  %v3481_v40 = vunpack.i.l.bf16 %v3480_v31 }
 0x4bc   : > { %v2758_v60 = vsel %vm1334_vm8, %v2742_v39, %v3481_v40  ;;  %v2759_v15 = vsel %vm1334_vm8, %v2743_v43, %v3482_v61  ;;  %v6639_v40 = vld [vmem:[#allocation46_spill] sm:$0xff] }
 0x4bd   : > { %v2774_v45 = vsel %vm1365_vm9, %v2758_v60, %v3486_v25  ;;  %v2775_v53 = vsel %vm1365_vm9, %v2759_v15, %v3487_v42  ;;  %v6640_v25 = vld [vmem:[#allocation29_spill] sm:$0xff] }
 0x4be   : > { %v2790_v6 = vsel %vm1396_vm10, %v2774_v45, %v3491_v0  ;;  %v2791_v28 = vsel %vm1396_vm10, %v2775_v53, %v3492_v8  ;;  %v6641_v0 = vld [vmem:[#allocation28_spill] sm:$0xff] }
 0x4bf   : > { %v2802_v3 = vpack.c.bf16 %v2791_v28, %v2790_v6 }
 0x4c1   : > { %3105 = vmatmul.msk.bf16.gmra.mxu1 %vm6629_vm6, %v2802_v3  ;;  %v6642_v3 = vld [vmem:[#allocation53_spill] sm:$0xff] }
 0x4de   : > { %v2882_v59 = vpop.f32.mrf.mxu1 }
 0x4df   : > { %v2883_v30 = vadd.f32 %v6077_v23, %v2882_v59 }
 0x4e1   : > { %v2922_v38 = vadd.f32 %v2883_v30, %v6630_v49 }
 0x4e3   : > { %v2938_v47 = vmax.f32 %v2922_v38, 0.0 }
 0x4e5   : > { %2954 = vst.msk [vmem:[%s6084_s27] sm:$0xff] %vm1179_vm3, %v2938_v47  ;;  %v6643_v47 = vld [vmem:[#allocation35_spill] sm:$0xff] }
 0x4e6   : > { %v2884_v7 = vpop.f32.mrf.mxu1 }
 0x4e7   : > { %v2885_v13 = vadd.f32 %v6077_v23, %v2884_v7 }
 0x4e9   : > { %v2923_v9 = vadd.f32 %v2885_v13, %v6631_v32 }
 0x4eb   : > { %v2939_v29 = vmax.f32 %v2923_v9, 0.0 }
 0x4ed   : > { %2955 = vst.msk [vmem:[%s6084_s27 + $0x8] sm:$0xff] %vm1179_vm3, %v2939_v29  ;;  %v6644_v29 = vld [vmem:[#allocation52_spill] sm:$0xff] }
 0x4ee   : > { %v2887_v11 = vpop.f32.mrf.mxu1 }
 0x4ef   : > { %v2888_v20 = vadd.f32 %v6077_v23, %v2887_v11 }
 0x4f1   : > { %v2924_v46 = vadd.f32 %v2888_v20, %v6632_v21 }
 0x4f3   : > { %v2940_v51 = vmax.f32 %v2924_v46, 0.0 }
 0x4f5   : > { %2956 = vst.msk [vmem:[%s6084_s27 + $0x10] sm:$0xff] %vm1179_vm3, %v2940_v51  ;;  %v6645_v51 = vld [vmem:[#allocation34_spill] sm:$0xff] }
 0x4f6   : > { %v2889_v19 = vpop.f32.mrf.mxu1 }
 0x4f7   : > { %v2890_v5 = vadd.f32 %v6077_v23, %v2889_v19 }
 0x4f9   : > { %v2925_v62 = vadd.f32 %v2890_v5, %v6633_v14 }
 0x4fb   : > { %v2941_v10 = vmax.f32 %v2925_v62, 0.0 }
 0x4fd   : > { %2957 = vst.msk [vmem:[%s6084_s27 + $0x18] sm:$0xff] %vm1179_vm3, %v2941_v10 }
 0x502   : > { %v2907_v33 = vpop.f32.mrf.mxu3 }
 0x503   : > { %v2908_v16 = vadd.f32 %v6077_v23, %v2907_v33 }
 0x505   : > { %v2932_v1 = vadd.f32 %v2908_v16, %v6634_v37 }
 0x506   : > { %v2892_v35 = vpop.f32.mrf.mxu1 }
 0x507   : > { %v2948_v57 = vmax.f32 %v2932_v1, 0.0  ;;  %v2893_v22 = vadd.f32 %v6077_v23, %v2892_v35 }
 0x509   : > { %2964 = vst.msk [vmem:[%s6084_s27 + $0x50] sm:$0xff] %vm1179_vm3, %v2948_v57  ;;  %v2926_v24 = vadd.f32 %v2893_v22, %v6635_v4 }
 0x50a   : > { %v2909_v50 = vpop.f32.mrf.mxu3 }
 0x50b   : > { %v2942_v34 = vmax.f32 %v2926_v24, 0.0  ;;  %v2910_v17 = vadd.f32 %v6077_v23, %v2909_v50 }
 0x50d   : > { %2958 = vst.msk [vmem:[%s6084_s27 + $0x20] sm:$0xff] %vm1179_vm3, %v2942_v34  ;;  %v2933_v48 = vadd.f32 %v2910_v17, %v6636_v55 }
 0x50e   : > { %v2894_v44 = vpop.f32.mrf.mxu1 }
 0x50f   : > { %v2949_v27 = vmax.f32 %v2933_v48, 0.0  ;;  %v2895_v36 = vadd.f32 %v6077_v23, %v2894_v44 }
 0x511   : > { %2965 = vst.msk [vmem:[%s6084_s27 + $0x58] sm:$0xff] %vm1179_vm3, %v2949_v27  ;;  %v2927_v12 = vadd.f32 %v2895_v36, %v6637_v41 }
 0x513   : > { %v2943_v54 = vmax.f32 %v2927_v12, 0.0 }
 0x515   : > { %2959 = vst.msk [vmem:[%s6084_s27 + $0x28] sm:$0xff] %vm1179_vm3, %v2943_v54 }
 0x51b   : > { %v2912_v2 = vpop.f32.mrf.mxu3 }
 0x51c   : > { %v2913_v26 = vadd.f32 %v6077_v23, %v2912_v2 }
 0x51e   : > { %v2934_v56 = vadd.f32 %v2913_v26, %v6638_v18 }
 0x520   : > { %v2950_v31 = vmax.f32 %v2934_v56, 0.0 }
 0x522   : > { %2966 = vst.msk [vmem:[%s6084_s27 + $0x60] sm:$0xff] %vm1179_vm3, %v2950_v31 }
 0x523   : > { %v2914_v52 = vpop.f32.mrf.mxu3 }
 0x524   : > { %v2915_v63 = vadd.f32 %v6077_v23, %v2914_v52  ;;  %v2897_v58 = vpop.f32.mrf.mxu1 }
 0x525   : > { %v2898_v61 = vadd.f32 %v6077_v23, %v2897_v58 }
 0x526   : > { %v2935_v42 = vadd.f32 %v2915_v63, %v6639_v40 }
 0x527   : > { %v2928_v43 = vadd.f32 %v2898_v61, %v6640_v25 }
 0x528   : > { %v2951_v39 = vmax.f32 %v2935_v42, 0.0 }
 0x529   : > { %v2944_v60 = vmax.f32 %v2928_v43, 0.0 }
 0x52a   : > { %2967 = vst.msk [vmem:[%s6084_s27 + $0x68] sm:$0xff] %vm1179_vm3, %v2951_v39 }
 0x52b   : > { %2960 = vst.msk [vmem:[%s6084_s27 + $0x30] sm:$0xff] %vm1179_vm3, %v2944_v60 }
 0x52c   : > { %v2899_v15 = vpop.f32.mrf.mxu1 }
 0x52d   : > { %v2900_v8 = vadd.f32 %v6077_v23, %v2899_v15 }
 0x52f   : > { %v2929_v45 = vadd.f32 %v2900_v8, %v6641_v0 }
 0x531   : > { %v2945_v53 = vmax.f32 %v2929_v45, 0.0 }
 0x533   : > { %2961 = vst.msk [vmem:[%s6084_s27 + $0x38] sm:$0xff] %vm1179_vm3, %v2945_v53 }
 0x53a   : > { %v2917_v6 = vpop.f32.mrf.mxu3 }
 0x53b   : > { %v2918_v28 = vadd.f32 %v6077_v23, %v2917_v6 }
 0x53d   : > { %v2936_v59 = vadd.f32 %v2918_v28, %v6642_v3 }
 0x53e   : > { %v2902_v30 = vpop.f32.mrf.mxu1 }
 0x53f   : > { %v2952_v49 = vmax.f32 %v2936_v59, 0.0  ;;  %v2903_v38 = vadd.f32 %v6077_v23, %v2902_v30 }
 0x541   : > { %2968 = vst.msk [vmem:[%s6084_s27 + $0x70] sm:$0xff] %vm1179_vm3, %v2952_v49  ;;  %v2930_v7 = vadd.f32 %v2903_v38, %v6643_v47 }
 0x542   : > { %v2919_v13 = vpop.f32.mrf.mxu3 }
 0x543   : > { %v2946_v32 = vmax.f32 %v2930_v7, 0.0  ;;  %v2920_v9 = vadd.f32 %v6077_v23, %v2919_v13 }
 0x545   : > { %2962 = vst.msk [vmem:[%s6084_s27 + $0x40] sm:$0xff] %vm1179_vm3, %v2946_v32  ;;  %v2937_v11 = vadd.f32 %v2920_v9, %v6644_v29 }
 0x546   : > { %v2904_v20 = vpop.f32.mrf.mxu1 }
 0x547   : > { %v2953_v21 = vmax.f32 %v2937_v11, 0.0  ;;  %v2905_v46 = vadd.f32 %v6077_v23, %v2904_v20 }
 0x549   : > { %2969 = vst.msk [vmem:[%s6084_s27 + $0x78] sm:$0xff] %vm1179_vm3, %v2953_v21  ;;  %v2931_v19 = vadd.f32 %v2905_v46, %v6645_v51 }
 0x54b   : > { %v2947_v5 = vmax.f32 %v2931_v19, 0.0 }
 0x54d   : > { %2963 = vst.msk [vmem:[%s6084_s27 + $0x48] sm:$0xff] %vm1179_vm3, %v2947_v5 }
 0x54e PF: > { %s15_s22 = sadd.s32 1, %s3563_s22   ;;  %s6646_s18 = smov %s3555_s20 }
 0x54f   : > { %p12_p10 = scmp.ge.s32.totalorder %s15_s22, 6   ;;  %s6647_s19 = smov %s3559_s21 }
 0x550   : > { %s6648_s20 = smov %s6651_s23  ;;  %s6649_s21 = smov %s6655_s24 }
 0x551   :  { %14 = sbr.rel (!%p12_p10) target bundleno = 3 (0x3), region = 84 }

</bundles_post_ra>
